<compile_context>
chip_gen: v5e
topology: v5e:2x2
jax: 0.10.0
libtpu: 0.0.40
codegen_flags: <defaults>
</compile_context>

<pallas_src>
import functools

import jax
import jax.numpy as jnp
import numpy as np
from jax.experimental import pallas as pl
from jax.experimental.pallas import tpu as pltpu


# ----------------------------------------------------------------------------
# Pallas kernel
# ----------------------------------------------------------------------------
def swegnn_kernel(xsd_ref, xd_ref, ea_ref,
                  row_ref, colN_ref, rc_ref, colT_ref,
                  w0_ref, w1rc_ref, w1e_ref, b1_ref,
                  w2_ref, b2_ref, wk_ref, out_ref, *, K):
    f32 = jnp.float32
    xsd = xsd_ref[...]            # [N, S+D]  (= concat(x_s, x_d))
    xd = xd_ref[...]              # [N, D]
    ea = ea_ref[...]              # [E, F]
    N = xsd.shape[0]
    E = ea.shape[0]
    D = xd.shape[1]
    HID = w1rc_ref.shape[1] // 2

    # ---- edge-MLP layer 1 at node granularity, row/col weights fused ----
    h_both = jnp.dot(xsd, w1rc_ref[...], preferred_element_type=f32)      # [N, 2*HID]
    # Restack the two lane halves along sublanes (once) so the edge gather
    # becomes a single matmul with contraction dim 2N.
    h_stack = jnp.concatenate([h_both[:, :HID], h_both[:, HID:]], axis=0)  # [2N, HID]

    # ---- fused row|col one-hot gather of the layer-1 activations ----
    # One [E, 2N] one-hot: lane row[e] in the first half, lane N+col[e] in
    # the second half (built right before use; temporaries scoped here).
    lane2n = jax.lax.broadcasted_iota(jnp.int32, (E, 2 * N), 1)
    g_rc = jnp.logical_or(lane2n == row_ref[...],
                          lane2n == colN_ref[...]).astype(f32)             # [E, 2N]
    h = (jnp.dot(g_rc, h_stack, preferred_element_type=f32)
         + jnp.dot(ea, w1e_ref[...], preferred_element_type=f32)
         + b1_ref[...])
    h = jnp.maximum(h, 0.0)                                                # ReLU
    s_ij = jnp.dot(h, w2_ref[...], preferred_element_type=f32) + b2_ref[...]  # [E, D]

    # ---- L2 normalize over features; 0/0 -> 0 (masked rsqrt, no inf) ----
    sq = jnp.sum(s_ij * s_ij, axis=1, keepdims=True)
    nz = sq > 0.0
    inv = jnp.where(nz, jax.lax.rsqrt(jnp.where(nz, sq, 1.0)), 0.0)
    s_ij = s_ij * inv

    # ---- loop-invariant one-hots for the K propagation steps ----
    # G = [g_row; g_col] ([2E, N]): one gather matmul per step.
    lane_n = jax.lax.broadcasted_iota(jnp.int32, (2 * E, N), 1)
    G = (lane_n == rc_ref[...]).astype(f32)                                # [2E, N]
    # Transposed col one-hot built once: the scatter-add becomes a plain dot
    # with no per-iteration transposed contraction.
    subl_n = jax.lax.broadcasted_iota(jnp.int32, (N, E), 0)
    g_colT = (subl_n == colT_ref[...]).astype(f32)                         # [N, E]

    # ---- out = filter_matrix[0](x_d) ----
    out = jnp.dot(xd, w0_ref[...], preferred_element_type=f32)             # [N, D]

    # ---- K propagation steps (K is small and static -> unrolled) ----
    for k in range(K):
        rc_c = jnp.dot(G, out, preferred_element_type=f32)                 # [2E, D]
        row_c = rc_c[:E]                                                   # out[row]
        col_c = rc_c[E:]                                                   # out[col]
        # Node mask derived from the gathered features: one-hot selection is
        # exact, so sum(out[row], -1) == sum(out, -1)[row] bit-for-bit.
        nm = jnp.sum(rc_c, axis=1, keepdims=True) != 0.0                   # [2E, 1]
        edge_mask = jnp.logical_or(nm[:E], nm[E:]).astype(f32)             # [E, 1]
        grad = col_c - row_c                                               # hydraulic gradient
        shift_sum = grad * s_ij * edge_mask                                # [E, D]
        scattered = jnp.dot(g_colT, shift_sum, preferred_element_type=f32)  # [N, D]
        scattered = jnp.dot(scattered, wk_ref[k], preferred_element_type=f32)
        out = out + scattered

    out_ref[...] = out


# ----------------------------------------------------------------------------
# Wrapper
# ----------------------------------------------------------------------------
def swegnn_pallas(x_s, x_d, edge_index, edge_attr, params, K=2):
    N, D = x_d.shape
    S = x_s.shape[1]
    E, F = edge_attr.shape
    HID = params["w2"].shape[0]

    xsd = jnp.concatenate([x_s, x_d], axis=1).astype(jnp.float32)    # [N, S+D]

    # NOTE: indices are assumed in-range [0, N); out-of-range edges would be
    # silently dropped by the in-kernel one-hot (unlike PyTorch indexing).
    row = edge_index[0].astype(jnp.int32)
    col = edge_index[1].astype(jnp.int32)
    row_e1 = row.reshape(E, 1)                                        # [E, 1]
    colN_e1 = (col + N).reshape(E, 1)                                 # [E, 1] (second half lanes)
    rc_2e1 = jnp.concatenate([row, col], axis=0).reshape(2 * E, 1)    # [2E, 1]
    colT_1e = col.reshape(1, E)                                       # [1, E]

    # Split edge-MLP layer-1 weights into row / col / edge-attr blocks so the
    # layer runs at node granularity before the gather; fuse row|col lane-wise.
    w1 = params["w1"]                                                 # [2S+2D+F, HID]
    w1_row = jnp.concatenate([w1[:S], w1[2 * S:2 * S + D]], axis=0)   # [S+D, HID]
    w1_col = jnp.concatenate([w1[S:2 * S], w1[2 * S + D:2 * S + 2 * D]], axis=0)
    w1_rc = jnp.concatenate([w1_row, w1_col], axis=1)                 # [S+D, 2*HID]
    w1_ea = w1[2 * S + 2 * D:]                                        # [F, HID]

    inputs = (xsd, x_d, edge_attr,
              row_e1, colN_e1, rc_2e1, colT_1e,
              params["w0"], w1_rc, w1_ea, params["b1"],
              params["w2"], params["b2"], params["wk"])

    flops = int(
        2 * N * (S + D) * 2 * HID          # fused layer-1 at node granularity
        + 2 * E * (2 * N) * HID            # fused row|col gather of layer-1 acts
        + 2 * E * F * HID                  # edge-attr contribution
        + 2 * E * HID * D                  # edge-MLP layer 2
        + 2 * N * D * D                    # filter_matrix[0]
        + K * (2 * (2 * E) * N * D         # fused gather of `out`
               + 2 * N * E * D             # scatter-add via g_colT
               + 2 * N * D * D))           # filter_matrix[k+1]
    bytes_accessed = int(4 * sum(int(np.prod(a.shape)) for a in inputs)
                         + 4 * N * D)

    vmem = pltpu.MemorySpace.VMEM
    return pl.pallas_call(
        functools.partial(swegnn_kernel, K=K),
        out_shape=jax.ShapeDtypeStruct((N, D), jnp.float32),
        in_specs=[pl.BlockSpec(memory_space=vmem) for _ in inputs],
        out_specs=pl.BlockSpec(memory_space=vmem),
        # Explicit scoped-VMEM budget (headroom over the v5e 16 MiB default,
        # within v7x's 64 MiB physical).  Re-derive / tile for larger graphs.
        compiler_params=pltpu.CompilerParams(
            vmem_limit_bytes=32 * 1024 * 1024),
        cost_estimate=pl.CostEstimate(flops=flops, transcendentals=E,
                                      bytes_accessed=bytes_accessed),
    )(*inputs)


# ----------------------------------------------------------------------------
# Pure-JAX reference (mirrors the PyTorch semantics) for verification
# ----------------------------------------------------------------------------
def swegnn_ref(x_s, x_d, edge_index, edge_attr, params, K=2):
    hi = jax.lax.Precision.HIGHEST
    row, col = edge_index[0], edge_index[1]
    N = x_d.shape[0]

    out = jnp.dot(x_d, params["w0"], precision=hi)
    e_ij = jnp.concatenate(
        [x_s[row], x_s[col], x_d[row], x_d[col], edge_attr], axis=1)
    h = jnp.maximum(jnp.dot(e_ij, params["w1"], precision=hi) + params["b1"], 0.0)
    s_ij = jnp.dot(h, params["w2"], precision=hi) + params["b2"]
    norm = jnp.linalg.norm(s_ij, axis=1, keepdims=True)
    s_ij = jnp.where(norm > 0.0, s_ij / norm, 0.0)

    for k in range(K):
        node_mask = jnp.sum(out, axis=1) != 0.0
        edge_mask = (node_mask[row] | node_mask[col]).astype(jnp.float32)[:, None]
        grad = out[col] - out[row]
        shift = grad * s_ij * edge_mask
        scattered = jax.ops.segment_sum(shift, col, num_segments=N)
        scattered = jnp.dot(scattered, params["wk"][k], precision=hi)
        out = out + scattered
    return out


# ----------------------------------------------------------------------------
# Main
# ----------------------------------------------------------------------------
if __name__ == "__main__":
    # Small, module-consistent shapes
    N = 64        # nodes
    E = 128       # edges
    S = 8         # static node features
    D = 8         # dynamic node features
    F = 4         # edge features
    K = 2
    HID = 2 * D   # edge MLP hidden size
    IN = 2 * S + 2 * D + F  # edge MLP input size

    key = jax.random.PRNGKey(0)
    ks = jax.random.split(key, 12)

    x_s = jax.random.normal(ks[0], (N, S), jnp.float32)
    x_d = jax.random.normal(ks[1], (N, D), jnp.float32)
    edge_attr = jax.random.normal(ks[2], (E, F), jnp.float32)
    row = jax.random.randint(ks[3], (E,), 0, N, jnp.int32)
    col = jax.random.randint(ks[4], (E,), 0, N, jnp.int32)
    edge_index = jnp.stack([row, col], axis=0)

    def lin_init(k, fan_in, shape):
        bound = 1.0 / jnp.sqrt(jnp.float32(fan_in))
        return jax.random.uniform(k, shape, jnp.float32, -bound, bound)

    # Deterministic parameters. All weight matrices are stored already
    # transposed (x @ W) relative to nn.Linear's (x @ W.T) convention.
    params = {
        "w0": lin_init(ks[5], D, (D, D)),            # filter_matrix[0]
        "w1": lin_init(ks[6], IN, (IN, HID)),        # edge MLP layer 1
        "b1": lin_init(ks[7], IN, (1, HID)),
        "w2": lin_init(ks[8], HID, (HID, D)),        # edge MLP layer 2
        "b2": lin_init(ks[9], HID, (1, D)),
        "wk": lin_init(ks[10], D, (K, D, D)),        # filter_matrix[1..K]
    }

    out = swegnn_pallas(x_s, x_d, edge_index, edge_attr, params, K=K)
    out = jax.block_until_ready(out)

    ref = jax.block_until_ready(
        swegnn_ref(x_s, x_d, edge_index, edge_attr, params, K=K))
    np.testing.assert_allclose(np.asarray(out), np.asarray(ref),
                               rtol=1e-2, atol=1e-2)

    print("KERNEL_OK")
</pallas_src>

<mosaic_0001>
module attributes {stable_mosaic.version = 11 : i64} {
  func.func @swegnn_kernel(%arg0: memref<64x16xf32, #tpu.memory_space<vmem>>, %arg1: memref<64x8xf32, #tpu.memory_space<vmem>>, %arg2: memref<128x4xf32, #tpu.memory_space<vmem>>, %arg3: memref<128x1xi32, #tpu.memory_space<vmem>>, %arg4: memref<128x1xi32, #tpu.memory_space<vmem>>, %arg5: memref<256x1xi32, #tpu.memory_space<vmem>>, %arg6: memref<1x128xi32, #tpu.memory_space<vmem>>, %arg7: memref<8x8xf32, #tpu.memory_space<vmem>>, %arg8: memref<16x32xf32, #tpu.memory_space<vmem>>, %arg9: memref<4x16xf32, #tpu.memory_space<vmem>>, %arg10: memref<1x16xf32, #tpu.memory_space<vmem>>, %arg11: memref<16x8xf32, #tpu.memory_space<vmem>>, %arg12: memref<1x8xf32, #tpu.memory_space<vmem>>, %arg13: memref<2x8x8xf32, #tpu.memory_space<vmem>>, %arg14: memref<64x8xf32, #tpu.memory_space<vmem>>) attributes {dimension_semantics = [], scalar_prefetch = 0 : i64, scratch_operands = 0 : i64, tpu.core_type = #tpu.core_type<tc>} {
    %c0 = arith.constant 0 : index
    %c0_0 = arith.constant 0 : index
    %0 = vector.load %arg0[%c0, %c0_0] : memref<64x16xf32, #tpu.memory_space<vmem>>, vector<64x16xf32>
    %c0_1 = arith.constant 0 : index
    %c0_2 = arith.constant 0 : index
    %1 = vector.load %arg1[%c0_1, %c0_2] : memref<64x8xf32, #tpu.memory_space<vmem>>, vector<64x8xf32>
    %c0_3 = arith.constant 0 : index
    %c0_4 = arith.constant 0 : index
    %2 = vector.load %arg2[%c0_3, %c0_4] : memref<128x4xf32, #tpu.memory_space<vmem>>, vector<128x4xf32>
    %c0_5 = arith.constant 0 : index
    %c0_6 = arith.constant 0 : index
    %3 = vector.load %arg8[%c0_5, %c0_6] : memref<16x32xf32, #tpu.memory_space<vmem>>, vector<16x32xf32>
    %cst = arith.constant dense<0.000000e+00> : vector<64x32xf32>
    %4 = tpu.matmul %0, %3, %cst {dimension_numbers = #tpu.dot_dimension_numbers<[1], [0], [0], [1], [0, 0, 1, 1], [], []>} : vector<64x16xf32>, vector<16x32xf32>, vector<64x32xf32> -> vector<64x32xf32>
    %5 = vector.extract_strided_slice %4 {offsets = [0, 0], sizes = [64, 16], strides = [1, 1]} : vector<64x32xf32> to vector<64x16xf32>
    %6 = vector.extract_strided_slice %4 {offsets = [0, 16], sizes = [64, 16], strides = [1, 1]} : vector<64x32xf32> to vector<64x16xf32>
    %7 = tpu.concatenate %5, %6 in 0 : vector<64x16xf32>, vector<64x16xf32> -> vector<128x16xf32>
    %8 = tpu.iota {dimensions = array<i32: 1>} : vector<128x128xi32>
    %c0_7 = arith.constant 0 : index
    %c0_8 = arith.constant 0 : index
    %9 = vector.load %arg3[%c0_7, %c0_8] : memref<128x1xi32, #tpu.memory_space<vmem>>, vector<128x1xi32>
    %10 = vector.broadcast %9 : vector<128x1xi32> to vector<128x128xi32>
    %11 = arith.cmpi eq, %8, %10 : vector<128x128xi32>
    %c0_9 = arith.constant 0 : index
    %c0_10 = arith.constant 0 : index
    %12 = vector.load %arg4[%c0_9, %c0_10] : memref<128x1xi32, #tpu.memory_space<vmem>>, vector<128x1xi32>
    %13 = vector.broadcast %12 : vector<128x1xi32> to vector<128x128xi32>
    %14 = arith.cmpi eq, %8, %13 : vector<128x128xi32>
    %15 = arith.ori %11, %14 : vector<128x128xi1>
    %16 = arith.extui %15 : vector<128x128xi1> to vector<128x128xi32>
    %17 = arith.sitofp %16 : vector<128x128xi32> to vector<128x128xf32>
    %cst_11 = arith.constant dense<0.000000e+00> : vector<128x16xf32>
    %18 = tpu.matmul %17, %7, %cst_11 {dimension_numbers = #tpu.dot_dimension_numbers<[1], [0], [0], [1], [0, 0, 1, 1], [], []>} : vector<128x128xf32>, vector<128x16xf32>, vector<128x16xf32> -> vector<128x16xf32>
    %c0_12 = arith.constant 0 : index
    %c0_13 = arith.constant 0 : index
    %19 = vector.load %arg9[%c0_12, %c0_13] : memref<4x16xf32, #tpu.memory_space<vmem>>, vector<4x16xf32>
    %cst_14 = arith.constant dense<0.000000e+00> : vector<128x16xf32>
    %20 = tpu.matmul %2, %19, %cst_14 {dimension_numbers = #tpu.dot_dimension_numbers<[1], [0], [0], [1], [0, 0, 1, 1], [], []>} : vector<128x4xf32>, vector<4x16xf32>, vector<128x16xf32> -> vector<128x16xf32>
    %21 = arith.addf %18, %20 : vector<128x16xf32>
    %c0_15 = arith.constant 0 : index
    %c0_16 = arith.constant 0 : index
    %22 = vector.load %arg10[%c0_15, %c0_16] : memref<1x16xf32, #tpu.memory_space<vmem>>, vector<1x16xf32>
    %23 = vector.broadcast %22 : vector<1x16xf32> to vector<128x16xf32>
    %24 = arith.addf %21, %23 : vector<128x16xf32>
    %cst_17 = arith.constant 0.000000e+00 : f32
    %25 = vector.broadcast %cst_17 : f32 to vector<128x16xf32>
    %26 = arith.maximumf %24, %25 : vector<128x16xf32>
    %c0_18 = arith.constant 0 : index
    %c0_19 = arith.constant 0 : index
    %27 = vector.load %arg11[%c0_18, %c0_19] : memref<16x8xf32, #tpu.memory_space<vmem>>, vector<16x8xf32>
    %cst_20 = arith.constant dense<0.000000e+00> : vector<128x8xf32>
    %28 = tpu.matmul %26, %27, %cst_20 {dimension_numbers = #tpu.dot_dimension_numbers<[1], [0], [0], [1], [0, 0, 1, 1], [], []>} : vector<128x16xf32>, vector<16x8xf32>, vector<128x8xf32> -> vector<128x8xf32>
    %c0_21 = arith.constant 0 : index
    %c0_22 = arith.constant 0 : index
    %29 = vector.load %arg12[%c0_21, %c0_22] : memref<1x8xf32, #tpu.memory_space<vmem>>, vector<1x8xf32>
    %30 = vector.broadcast %29 : vector<1x8xf32> to vector<128x8xf32>
    %31 = arith.addf %28, %30 : vector<128x8xf32>
    %32 = arith.mulf %31, %31 : vector<128x8xf32>
    %cst_23 = arith.constant dense<0.000000e+00> : vector<128xf32>
    %33 = vector.multi_reduction <add>, %32, %cst_23 [1] : vector<128x8xf32> to vector<128xf32>
    %34 = vector.shape_cast %33 : vector<128xf32> to vector<128x1xf32>
    %cst_24 = arith.constant 0.000000e+00 : f32
    %35 = vector.broadcast %cst_24 : f32 to vector<128x1xf32>
    %36 = arith.cmpf ogt, %34, %35 : vector<128x1xf32>
    %cst_25 = arith.constant 1.000000e+00 : f32
    %37 = vector.broadcast %cst_25 : f32 to vector<128x1xf32>
    %38 = arith.select %36, %34, %37 : vector<128x1xi1>, vector<128x1xf32>
    %39 = math.rsqrt %38 : vector<128x1xf32>
    %cst_26 = arith.constant 0.000000e+00 : f32
    %40 = vector.broadcast %cst_26 : f32 to vector<128x1xf32>
    %41 = arith.select %36, %39, %40 : vector<128x1xi1>, vector<128x1xf32>
    %42 = vector.broadcast %41 : vector<128x1xf32> to vector<128x8xf32>
    %43 = arith.mulf %31, %42 : vector<128x8xf32>
    %44 = tpu.iota {dimensions = array<i32: 1>} : vector<256x64xi32>
    %c0_27 = arith.constant 0 : index
    %c0_28 = arith.constant 0 : index
    %45 = vector.load %arg5[%c0_27, %c0_28] : memref<256x1xi32, #tpu.memory_space<vmem>>, vector<256x1xi32>
    %46 = vector.broadcast %45 : vector<256x1xi32> to vector<256x64xi32>
    %47 = arith.cmpi eq, %44, %46 : vector<256x64xi32>
    %48 = arith.extui %47 : vector<256x64xi1> to vector<256x64xi32>
    %49 = arith.sitofp %48 : vector<256x64xi32> to vector<256x64xf32>
    %50 = tpu.iota {dimensions = array<i32: 0>} : vector<64x128xi32>
    %c0_29 = arith.constant 0 : index
    %c0_30 = arith.constant 0 : index
    %51 = vector.load %arg6[%c0_29, %c0_30] : memref<1x128xi32, #tpu.memory_space<vmem>>, vector<1x128xi32>
    %52 = vector.broadcast %51 : vector<1x128xi32> to vector<64x128xi32>
    %53 = arith.cmpi eq, %50, %52 : vector<64x128xi32>
    %54 = arith.extui %53 : vector<64x128xi1> to vector<64x128xi32>
    %55 = arith.sitofp %54 : vector<64x128xi32> to vector<64x128xf32>
    %c0_31 = arith.constant 0 : index
    %c0_32 = arith.constant 0 : index
    %56 = vector.load %arg7[%c0_31, %c0_32] : memref<8x8xf32, #tpu.memory_space<vmem>>, vector<8x8xf32>
    %cst_33 = arith.constant dense<0.000000e+00> : vector<64x8xf32>
    %57 = tpu.matmul %1, %56, %cst_33 {dimension_numbers = #tpu.dot_dimension_numbers<[1], [0], [0], [1], [0, 0, 1, 1], [], []>} : vector<64x8xf32>, vector<8x8xf32>, vector<64x8xf32> -> vector<64x8xf32>
    %cst_34 = arith.constant dense<0.000000e+00> : vector<256x8xf32>
    %58 = tpu.matmul %49, %57, %cst_34 {dimension_numbers = #tpu.dot_dimension_numbers<[1], [0], [0], [1], [0, 0, 1, 1], [], []>} : vector<256x64xf32>, vector<64x8xf32>, vector<256x8xf32> -> vector<256x8xf32>
    %59 = vector.extract_strided_slice %58 {offsets = [0, 0], sizes = [128, 8], strides = [1, 1]} : vector<256x8xf32> to vector<128x8xf32>
    %60 = vector.extract_strided_slice %58 {offsets = [128, 0], sizes = [128, 8], strides = [1, 1]} : vector<256x8xf32> to vector<128x8xf32>
    %cst_35 = arith.constant dense<0.000000e+00> : vector<256xf32>
    %61 = vector.multi_reduction <add>, %58, %cst_35 [1] : vector<256x8xf32> to vector<256xf32>
    %62 = vector.shape_cast %61 : vector<256xf32> to vector<256x1xf32>
    %cst_36 = arith.constant 0.000000e+00 : f32
    %63 = vector.broadcast %cst_36 : f32 to vector<256x1xf32>
    %64 = arith.cmpf one, %62, %63 : vector<256x1xf32>
    %65 = vector.extract_strided_slice %64 {offsets = [0, 0], sizes = [128, 1], strides = [1, 1]} : vector<256x1xi1> to vector<128x1xi1>
    %66 = vector.extract_strided_slice %64 {offsets = [128, 0], sizes = [128, 1], strides = [1, 1]} : vector<256x1xi1> to vector<128x1xi1>
    %67 = arith.ori %65, %66 : vector<128x1xi1>
    %68 = arith.extui %67 : vector<128x1xi1> to vector<128x1xi32>
    %69 = arith.sitofp %68 : vector<128x1xi32> to vector<128x1xf32>
    %70 = arith.subf %60, %59 : vector<128x8xf32>
    %71 = arith.mulf %70, %43 : vector<128x8xf32>
    %72 = vector.broadcast %69 : vector<128x1xf32> to vector<128x8xf32>
    %73 = arith.mulf %71, %72 : vector<128x8xf32>
    %cst_37 = arith.constant dense<0.000000e+00> : vector<64x8xf32>
    %74 = tpu.matmul %55, %73, %cst_37 {dimension_numbers = #tpu.dot_dimension_numbers<[1], [0], [0], [1], [0, 0, 1, 1], [], []>} : vector<64x128xf32>, vector<128x8xf32>, vector<64x8xf32> -> vector<64x8xf32>
    %c0_38 = arith.constant 0 : index
    %c0_39 = arith.constant 0 : index
    %c0_40 = arith.constant 0 : index
    %75 = vector.load %arg13[%c0_38, %c0_39, %c0_40] : memref<2x8x8xf32, #tpu.memory_space<vmem>>, vector<1x8x8xf32>
    %76 = vector.shape_cast %75 : vector<1x8x8xf32> to vector<8x8xf32>
    %cst_41 = arith.constant dense<0.000000e+00> : vector<64x8xf32>
    %77 = tpu.matmul %74, %76, %cst_41 {dimension_numbers = #tpu.dot_dimension_numbers<[1], [0], [0], [1], [0, 0, 1, 1], [], []>} : vector<64x8xf32>, vector<8x8xf32>, vector<64x8xf32> -> vector<64x8xf32>
    %78 = arith.addf %57, %77 : vector<64x8xf32>
    %cst_42 = arith.constant dense<0.000000e+00> : vector<256x8xf32>
    %79 = tpu.matmul %49, %78, %cst_42 {dimension_numbers = #tpu.dot_dimension_numbers<[1], [0], [0], [1], [0, 0, 1, 1], [], []>} : vector<256x64xf32>, vector<64x8xf32>, vector<256x8xf32> -> vector<256x8xf32>
    %80 = vector.extract_strided_slice %79 {offsets = [0, 0], sizes = [128, 8], strides = [1, 1]} : vector<256x8xf32> to vector<128x8xf32>
    %81 = vector.extract_strided_slice %79 {offsets = [128, 0], sizes = [128, 8], strides = [1, 1]} : vector<256x8xf32> to vector<128x8xf32>
    %cst_43 = arith.constant dense<0.000000e+00> : vector<256xf32>
    %82 = vector.multi_reduction <add>, %79, %cst_43 [1] : vector<256x8xf32> to vector<256xf32>
    %83 = vector.shape_cast %82 : vector<256xf32> to vector<256x1xf32>
    %cst_44 = arith.constant 0.000000e+00 : f32
    %84 = vector.broadcast %cst_44 : f32 to vector<256x1xf32>
    %85 = arith.cmpf one, %83, %84 : vector<256x1xf32>
    %86 = vector.extract_strided_slice %85 {offsets = [0, 0], sizes = [128, 1], strides = [1, 1]} : vector<256x1xi1> to vector<128x1xi1>
    %87 = vector.extract_strided_slice %85 {offsets = [128, 0], sizes = [128, 1], strides = [1, 1]} : vector<256x1xi1> to vector<128x1xi1>
    %88 = arith.ori %86, %87 : vector<128x1xi1>
    %89 = arith.extui %88 : vector<128x1xi1> to vector<128x1xi32>
    %90 = arith.sitofp %89 : vector<128x1xi32> to vector<128x1xf32>
    %91 = arith.subf %81, %80 : vector<128x8xf32>
    %92 = arith.mulf %91, %43 : vector<128x8xf32>
    %93 = vector.broadcast %90 : vector<128x1xf32> to vector<128x8xf32>
    %94 = arith.mulf %92, %93 : vector<128x8xf32>
    %cst_45 = arith.constant dense<0.000000e+00> : vector<64x8xf32>
    %95 = tpu.matmul %55, %94, %cst_45 {dimension_numbers = #tpu.dot_dimension_numbers<[1], [0], [0], [1], [0, 0, 1, 1], [], []>} : vector<64x128xf32>, vector<128x8xf32>, vector<64x8xf32> -> vector<64x8xf32>
    %c1 = arith.constant 1 : index
    %c0_46 = arith.constant 0 : index
    %c0_47 = arith.constant 0 : index
    %96 = vector.load %arg13[%c1, %c0_46, %c0_47] : memref<2x8x8xf32, #tpu.memory_space<vmem>>, vector<1x8x8xf32>
    %97 = vector.shape_cast %96 : vector<1x8x8xf32> to vector<8x8xf32>
    %cst_48 = arith.constant dense<0.000000e+00> : vector<64x8xf32>
    %98 = tpu.matmul %95, %97, %cst_48 {dimension_numbers = #tpu.dot_dimension_numbers<[1], [0], [0], [1], [0, 0, 1, 1], [], []>} : vector<64x8xf32>, vector<8x8xf32>, vector<64x8xf32> -> vector<64x8xf32>
    %99 = arith.addf %78, %98 : vector<64x8xf32>
    %c0_49 = arith.constant 0 : index
    %c0_50 = arith.constant 0 : index
    %100 = vector.load %arg14[%c0_49, %c0_50] : memref<64x8xf32, #tpu.memory_space<vmem>>, vector<64x8xf32>
    tpu.vector_store %arg14[%c0_49, %c0_50], %99 {strides = array<i32>} : memref<64x8xf32, #tpu.memory_space<vmem>>, vector<64x8xf32>,
    return
  }
}

</mosaic_0001>

<bundles_post_ra>
// kernel: tpu_custom_call.1
= control target key start
LH: loop header
LB: loop body
LE: loop exit
PB: predicated region body
PF: predicated region fallthrough
CT: control target
= control target key end

     0   :  { %vm81_vm0 = vcmask 130048   ;;  %v2687_v7 = vmov 0   ;;  %vm439_vm1 = vcmask 1043456   ;;  %vm390_vm2 = vcmask 31744   ;;  %s4862_s8 = inlined_call_operand.vmem [shape: f32[16,32], index: 8, kind: input, shape index: {}]   ;;  %s4863_s0 = inlined_call_operand.vmem [shape: f32[64,16], index: 0, kind: input, shape index: {}]   ;;  %s4864_s3 = inlined_call_operand.vmem [shape: s32[128,1], index: 3, kind: input, shape index: {}]   ;;  %s4865_s4 = inlined_call_operand.vmem [shape: s32[128,1], index: 4, kind: input, shape index: {}]   ;;  %s4866_s5 = inlined_call_operand.vmem [shape: s32[256,1], index: 5, kind: input, shape index: {}]   ;;  %s4867_s9 = inlined_call_operand.vmem [shape: f32[4,16], index: 9, kind: input, shape index: {}]   ;;  %s4868_s2 = inlined_call_operand.vmem [shape: f32[128,4], index: 2, kind: input, shape index: {}]   ;;  %s4869_s10 = inlined_call_operand.vmem [shape: f32[1,16], index: 10, kind: input, shape index: {}]   ;;  %s4870_s7 = inlined_call_operand.vmem [shape: f32[8,8], index: 7, kind: input, shape index: {}]   ;;  %s4871_s1 = inlined_call_operand.vmem [shape: f32[64,8], index: 1, kind: input, shape index: {}]   ;;  %s4872_s11 = inlined_call_operand.vmem [shape: f32[16,8], index: 11, kind: input, shape index: {}]   ;;  %s4873_s12 = inlined_call_operand.vmem [shape: f32[1,8], index: 12, kind: input, shape index: {}]   ;;  %s4874_s6 = inlined_call_operand.vmem [shape: s32[1,128], index: 6, kind: input, shape index: {}]   ;;  %s4875_s13 = inlined_call_operand.vmem [shape: f32[2,8,8], index: 13, kind: input, shape index: {}]   ;;  %s4876_s14 = inlined_call_operand.vmem [shape: f32[64,8], index: 14, kind: output, shape index: {}]  }
   0x1   :  { %v80_v0 = vld [vmem:[%s4862_s8 + $0x8] sm:$0xff]  ;;  %v79_v1 = vld [vmem:[%s4862_s8] sm:$0xff]  ;;  %v54_v4 = vld [vmem:[%s4863_s0 + $0x38] sm:$0xff]  ;;  %2649 = vset.pattern.permute.xlu2 %v2687_v7  ;;  %2651 = vset.pattern.permute.xlu1 %v2687_v7 }
   0x2   :  { %120 = vmatpush.msra.mxu0 %v80_v0  ;;  %v47_v2 = vld [vmem:[%s4863_s0] sm:$0xff]  ;;  %2606 = vmatpush.msra.mxu3 %v80_v0  ;;  %v48_v3 = vld [vmem:[%s4863_s0 + $0x8] sm:$0xff]  ;;  %v49_v5 = vld [vmem:[%s4863_s0 + $0x10] sm:$0xff] }
   0x3   :  { %v181_v6 = vld [vmem:[%s4864_s3] sm:$0xff]  ;;  %2650 = vset.pattern.permute.xlu0 %v2687_v7  ;;  %v50_v8 = vld [vmem:[%s4863_s0 + $0x18] sm:$0xff]  ;;  %v183_v11 = vld [vmem:[%s4864_s3 + $0x10] sm:$0xff] }
   0x4   :  { %121 = vmatpush.msra.mxu0 %v79_v1  ;;  %2607 = vmatpush.msra.mxu3 %v79_v1  ;;  %v261_v9 = vld [vmem:[%s4865_s4] sm:$0xff]  ;;  %v52_v12 = vld [vmem:[%s4863_s0 + $0x28] sm:$0xff]  ;;  %v184_v13 = vld [vmem:[%s4864_s3 + $0x18] sm:$0xff] }
   0x5   :  { %2356 = vmatmul.msk.f32.vlgmr.msra.gmra.mxu0 %vm81_vm0, %v47_v2  ;;  %2363 = vmatmul.msk.f32.vlgmr.msra.gmra.mxu3 %vm81_vm0, %v54_v4  ;;  %v51_v10 = vld [vmem:[%s4863_s0 + $0x20] sm:$0xff]  ;;  %v53_v14 = vld [vmem:[%s4863_s0 + $0x30] sm:$0xff]  ;;  %v268_v17 = vld [vmem:[%s4865_s4 + $0x38] sm:$0xff]  ;;  %s2688_s0 = smov 112  }
   0x6   :  { %198 = vperm.xlu2 %2649, %v181_v6   ;;  %v265_v15 = vld [vmem:[%s4865_s4 + $0x20] sm:$0xff]  ;;  %v187_v16 = vld [vmem:[%s4864_s3 + $0x30] sm:$0xff]  ;;  %v190_v18 = vld [vmem:[%s4864_s3 + $0x48] sm:$0xff] }
   0x7   :  { %v1018_v19 = vld [vmem:[%s4866_s5 + $0x8] sm:$0xff]  ;;  %v1021_v20 = vld [vmem:[%s4866_s5 + $0x20] sm:$0xff]  ;;  %v1023_v22 = vld [vmem:[%s4866_s5 + $0x30] sm:$0xff] }
   0x8   :  { %v1022_v21 = vld [vmem:[%s4866_s5 + $0x28] sm:$0xff]  ;;  %v1024_v23 = vld [vmem:[%s4866_s5 + $0x38] sm:$0xff]  ;;  %v1025_v24 = vld [vmem:[%s4866_s5 + $0x40] sm:$0xff] }
   0x9   :  { %v1026_v26 = vld [vmem:[%s4866_s5 + $0x48] sm:$0xff]  ;;  %v1027_v28 = vld [vmem:[%s4866_s5 + $0x50] sm:$0xff]  ;;  %v1033_v33 = vld [vmem:[%s4866_s5 + $0x80] sm:$0xff] }
   0xa   :  { %v1030_v30 = vld [vmem:[%s4866_s5 + $0x68] sm:$0xff]  ;;  %v1036_v36 = vld [vmem:[%s4866_s5 + $0x98] sm:$0xff]  ;;  %v1039_v39 = vld [vmem:[%s4866_s5 + $0xb0] sm:$0xff] }
   0xb   :  { %v262_v38 = vld [vmem:[%s4865_s4 + $0x8] sm:$0xff]  ;;  %v263_v42 = vld [vmem:[%s4865_s4 + $0x10] sm:$0xff]  ;;  %v185_v45 = vld [vmem:[%s4864_s3 + $0x20] sm:$0xff] }
   0xc   :  { %v1042_v44 = vld [vmem:[%s4866_s5 + $0xc8] sm:$0xff]  ;;  %v1045_v47 = vld [vmem:[%s4866_s5 + $0xe0] sm:$0xff]  ;;  %v1048_v50 = vld [vmem:[%s4866_s5 + $0xf8] sm:$0xff] }
   0xd   :  { %2357 = vmatmul.msk.f32.gmra.mxu0 %vm81_vm0, %v48_v3  ;;  %v266_v48 = vld [vmem:[%s4865_s4 + $0x28] sm:$0xff]  ;;  %v188_v51 = vld [vmem:[%s4864_s3 + $0x38] sm:$0xff]  ;;  %v269_v53 = vld [vmem:[%s4865_s4 + $0x40] sm:$0xff] }
   0xe   :  { %278 = vperm.xlu2 %2649, %v261_v9   ;;  %v182_v49 = vld [vmem:[%s4864_s3 + $0x8] sm:$0xff]  ;;  %v264_v52 = vld [vmem:[%s4865_s4 + $0x18] sm:$0xff]  ;;  %v1017_v55 = vld [vmem:[%s4866_s5] sm:$0xff] }
   0xf   :  { %v186_v54 = vld [vmem:[%s4864_s3 + $0x28] sm:$0xff]  ;;  %v267_v56 = vld [vmem:[%s4865_s4 + $0x30] sm:$0xff]  ;;  %v1020_v57 = vld [vmem:[%s4866_s5 + $0x18] sm:$0xff] }
  0x10   :  { %v189_v58 = vld [vmem:[%s4864_s3 + $0x40] sm:$0xff]  ;;  %v271_v59 = vld [vmem:[%s4865_s4 + $0x50] sm:$0xff]  ;;  %v270_v60 = vld [vmem:[%s4865_s4 + $0x48] sm:$0xff] }
  0x11   :  { %v272_v61 = vld [vmem:[%s4865_s4 + $0x58] sm:$0xff]  ;;  %v1019_v62 = vld [vmem:[%s4866_s5 + $0x10] sm:$0xff]  ;;  %v273_v63 = vld [vmem:[%s4865_s4 + $0x60] sm:$0xff] }
  0x12   :  { %v191_v0 = vld [vmem:[%s4864_s3 + $0x50] sm:$0xff]  ;;  %v274_v1 = vld [vmem:[%s4865_s4 + $0x68] sm:$0xff]  ;;  %v192_v2 = vld [vmem:[%s4864_s3 + $0x58] sm:$0xff] }
  0x13   :  { %v275_v3 = vld [vmem:[%s4865_s4 + $0x70] sm:$0xff]  ;;  %v193_v4 = vld [vmem:[%s4864_s3 + $0x60] sm:$0xff]  ;;  %v276_v6 = vld [vmem:[%s4865_s4 + $0x78] sm:$0xff] }
  0x14   :  { %v194_v7 = vld [vmem:[%s4864_s3 + $0x68] sm:$0xff]  ;;  %v1029_v9 = vld [vmem:[%s4866_s5 + $0x60] sm:$0xff] }
  0x15   :  { %2358 = vmatmul.msk.f32.gmra.mxu0 %vm81_vm0, %v49_v5 }
  0x16   :  { %204 = vperm.xlu2 %2649, %v183_v11  }
  0x1d   :  { %2359 = vmatmul.msk.f32.gmra.mxu0 %vm81_vm0, %v50_v8 }
  0x1e   :  { %207 = vperm.xlu2 %2649, %v184_v13   ;;  %v196_v13 = vld [vmem:[%s4864_s3 + $0x78] sm:$0xff] }
  0x25   :  { %2360 = vmatmul.msk.f32.gmra.mxu0 %vm81_vm0, %v51_v10  ;;  %v195_v10 = vld [vmem:[%s4864_s3 + $0x70] sm:$0xff] }
  0x26   :  { %290 = vperm.xlu2 %2649, %v265_v15  }
  0x2d   :  { %2361 = vmatmul.msk.f32.gmra.mxu0 %vm81_vm0, %v52_v12  ;;  %v1032_v12 = vld [vmem:[%s4866_s5 + $0x78] sm:$0xff] }
  0x2e   :  { %216 = vperm.xlu2 %2649, %v187_v16  }
  0x35   :  { %2362 = vmatmul.msk.f32.gmra.mxu0 %vm81_vm0, %v53_v14 }
  0x36   :  { %299 = vperm.xlu2 %2649, %v268_v17  }
  0x3e   :  { %225 = vperm.xlu2 %2649, %v190_v18   ;;  %v1035_v18 = vld [vmem:[%s4866_s5 + $0x90] sm:$0xff] }
  0x46   :  { %1053 = vperm.xlu2 %2649, %v1018_v19   ;;  %v1028_v19 = vld [vmem:[%s4866_s5 + $0x58] sm:$0xff] }
  0x4e   :  { %1062 = vperm.xlu2 %2649, %v1021_v20   ;;  %v389_v20 = vld [vmem:[%s4867_s9] sm:$0xf] }
  0x4f   :  { %2380 = vmatpush.msk.msra.mxu1 %vm439_vm1, %v389_v20  ;;  %2608 = vmatpush.msk.msrb.mxu3 %vm439_vm1, %v389_v20 }
  0x56   :  { %1065 = vperm.xlu2 %2649, %v1022_v21   ;;  %v63_v21 = vld [vmem:[%s4868_s2] sm:$0xff] }
  0x57   :  { %2381 = vmatmul.msk.f32.vlgmr.msra.gmra.mxu1 %vm390_vm2, %v63_v21 }
  0x5e   :  { %1068 = vperm.xlu2 %2649, %v1023_v22  }
  0x66   :  { %1071 = vperm.xlu2 %2649, %v1024_v23  }
  0x6e   :  { %1074 = vperm.xlu2 %2649, %v1025_v24  }
  0x76   :  { %1077 = vperm.xlu2 %2649, %v1026_v26  }
  0x7e   :  { %1080 = vperm.xlu2 %2649, %v1027_v28   ;;  %v1038_v28 = vld [vmem:[%s4866_s5 + $0xa8] sm:$0xff] }
  0x82   :  { %v2846_v25 = vpop.f32.mrf.mxu0 }
  0x86   :  { %1089 = vperm.xlu2 %2649, %v1030_v30   ;;  %v1031_v30 = vld [vmem:[%s4866_s5 + $0x70] sm:$0xff] }
  0x88   :  { %v2883_v40 = vpop.f32.mrf.mxu3 }
  0x8a   :  { %v2851_v27 = vpop.f32.mrf.mxu0 }
  0x8b   :  { %v2644_v35 = vpack.i.bf16 %v2846_v25, %v2851_v27 }
  0x8e   :  { %1098 = vperm.xlu2 %2649, %v1033_v33   ;;  %v64_v33 = vld [vmem:[%s4868_s2 + $0x8] sm:$0xff] }
  0x8f   :  { %2382 = vmatmul.msk.f32.gmra.mxu1 %vm390_vm2, %v64_v33  ;;  %v57_v33 = vld [vmem:[%s4871_s1 + $0x10] sm:$0xff] }
  0x92   :  { %v2856_v29 = vpop.f32.mrf.mxu0 }
  0x96   :  { %1107 = vperm.xlu2 %2649, %v1036_v36  }
  0x9a   :  { %v2861_v31 = vpop.f32.mrf.mxu0 }
  0x9b   :  { %v2639_v32 = vpack.i.bf16 %v2856_v29, %v2861_v31 }
  0x9d   :  { %2640 = vrot.lane.b32.xlu1 %v2639_v32, %s2688_s0 }
  0x9e   :  { %1116 = vperm.xlu2 %2649, %v1039_v39  }
  0xa2   :  { %v2868_v34 = vpop.f32.mrf.mxu0 }
  0xa5   :  { %2645 = vrot.lane.b32.xlu1 %v2644_v35, %s2688_s0 }
  0xa6   :  { %1125 = vperm.xlu2 %2649, %v1042_v44   ;;  %v1034_v44 = vld [vmem:[%s4866_s5 + $0x88] sm:$0xff] }
  0xaa   :  { %v2875_v37 = vpop.f32.mrf.mxu0 }
  0xab   :  { %v2634_v46 = vpack.i.bf16 %v2868_v34, %v2875_v37 }
  0xad   :  { %281 = vperm.xlu1 %2651, %v262_v38  }
  0xae   :  { %1134 = vperm.xlu2 %2649, %v1045_v47  }
  0xb2   :  { %v2885_v41 = vpop.f32.mrf.mxu0 }
  0xb3   :  { %v2629_v43 = vpack.i.bf16 %v2885_v41, %v2883_v40 }
  0xb5   :  { %284 = vperm.xlu1 %2651, %v263_v42   ;;  %2630 = vrot.lane.b32.xlu0 %v2629_v43, %s2688_s0  ;;  %v1041_v43 = vld [vmem:[%s4866_s5 + $0xc0] sm:$0xff] }
  0xb6   :  { %1143 = vperm.xlu2 %2649, %v1048_v50   ;;  %v1044_v50 = vld [vmem:[%s4866_s5 + $0xd8] sm:$0xff] }
  0xbd   :  { %210 = vperm.xlu1 %2651, %v185_v45   ;;  %2635 = vrot.lane.b32.xlu0 %v2634_v46, %s2688_s0  ;;  %v65_v45 = vld [vmem:[%s4868_s2 + $0x10] sm:$0xff]  ;;  %v199_v46 = vpop.permute.xlu2 %198 }
  0xbe   :  { %2383 = vmatmul.msk.f32.gmra.mxu1 %vm390_vm2, %v65_v45  ;;  %v3232_v45 = vld [vmem:[%s4869_s10] ss:$0 sm:$0xff] }
  0xc5   :  { %293 = vperm.xlu1 %2651, %v266_v48   ;;  %201 = vperm.xlu0 %2650, %v182_v49   ;;  %v4879_v49 = vlaneseq }
  0xcd   :  { %219 = vperm.xlu1 %2651, %v188_v51   ;;  %287 = vperm.xlu0 %2650, %v264_v52  }
  0xd5   :  { %302 = vperm.xlu1 %2651, %v269_v53   ;;  %213 = vperm.xlu0 %2650, %v186_v54   ;;  %v72_v53 = vld [vmem:[%s4868_s2 + $0x48] sm:$0xff]  ;;  %v67_v54 = vld [vmem:[%s4868_s2 + $0x20] sm:$0xff] }
  0xd6   :  { %2390 = vmatmul.msk.f32.vlgmr.msrb.gmra.mxu3 %vm390_vm2, %v72_v53 }
  0xdd   :  { %1050 = vperm.xlu1 %2651, %v1017_v55   ;;  %296 = vperm.xlu0 %2650, %v267_v56  }
  0xe5   :  { %1059 = vperm.xlu1 %2651, %v1020_v57   ;;  %222 = vperm.xlu0 %2650, %v189_v58   ;;  %v1043_v57 = vld [vmem:[%s4866_s5 + $0xd0] sm:$0xff]  ;;  %v68_v58 = vld [vmem:[%s4868_s2 + $0x28] sm:$0xff] }
  0xed   :  { %308 = vperm.xlu1 %2651, %v271_v59   ;;  %305 = vperm.xlu0 %2650, %v270_v60  }
  0xf5   :  { %311 = vperm.xlu1 %2651, %v272_v61   ;;  %1056 = vperm.xlu0 %2650, %v1019_v62   ;;  %v74_v62 = vld [vmem:[%s4868_s2 + $0x58] sm:$0xff] }
  0xfd   :  { %314 = vperm.xlu1 %2651, %v273_v63   ;;  %228 = vperm.xlu0 %2650, %v191_v0   ;;  %v1046_v63 = vld [vmem:[%s4866_s5 + $0xe8] sm:$0xff]  ;;  %v69_v0 = vld [vmem:[%s4868_s2 + $0x30] sm:$0xff] }
 0x105   :  { %317 = vperm.xlu1 %2651, %v274_v1   ;;  %231 = vperm.xlu0 %2650, %v192_v2  }
 0x10d   :  { %320 = vperm.xlu1 %2651, %v275_v3   ;;  %234 = vperm.xlu0 %2650, %v193_v4   ;;  %v75_v3 = vld [vmem:[%s4868_s2 + $0x60] sm:$0xff] }
 0x10f   :  { %v2641_v5 = vpop.permute.xlu1 %2640 }
 0x110   :  { %v2642_v32 = vunpack.i.l.bf16 %v2641_v5  ;;  %v2643_v35 = vunpack.i.h.bf16 %v2641_v5  ;;  %v70_v5 = vld [vmem:[%s4868_s2 + $0x38] sm:$0xff] }
 0x115   :  { %323 = vperm.xlu1 %2651, %v276_v6   ;;  %237 = vperm.xlu0 %2650, %v194_v7   ;;  %v1276_v6 = vld [vmem:[%s4870_s7] sm:$0xff] }
 0x117   :  { %v2646_v8 = vpop.permute.xlu1 %2645 }
 0x118   :  { %v2647_v39 = vunpack.i.l.bf16 %v2646_v8  ;;  %v2648_v42 = vunpack.i.h.bf16 %v2646_v8 }
 0x11d   :  { %1086 = vperm.xlu1 %2651, %v1029_v9   ;;  %240 = vperm.xlu0 %2650, %v195_v10   ;;  %v76_v9 = vld [vmem:[%s4868_s2 + $0x68] sm:$0xff]  ;;  %v71_v10 = vld [vmem:[%s4868_s2 + $0x40] sm:$0xff] }
 0x11f   :  { %v2978_v11 = vpop.permute.xlu1 %281 }
 0x125   :  { %1095 = vperm.xlu1 %2651, %v1032_v12   ;;  %243 = vperm.xlu0 %2650, %v196_v13   ;;  %v77_v13 = vld [vmem:[%s4868_s2 + $0x70] sm:$0xff] }
 0x127   :  { %v2986_v14 = vpop.permute.xlu1 %284  ;;  %v2631_v15 = vpop.permute.xlu0 %2630 }
 0x128   :  { %v2632_v16 = vunpack.i.l.bf16 %v2631_v15  ;;  %v2633_v17 = vunpack.i.h.bf16 %v2631_v15 }
 0x12a   :  { %508 = vmatpush.msrb.mxu0 %v2632_v16  ;;  %2609 = vmatpush.msra.mxu2 %v2632_v16 }
 0x12c   :  { %509 = vmatpush.msrb.mxu0 %v2633_v17  ;;  %2610 = vmatpush.msra.mxu2 %v2633_v17  ;;  %v78_v17 = vld [vmem:[%s4868_s2 + $0x78] sm:$0xff] }
 0x12d   :  { %1104 = vperm.xlu1 %2651, %v1035_v18   ;;  %1083 = vperm.xlu0 %2650, %v1028_v19  }
 0x12f   :  { %v3001_v22 = vpop.permute.xlu1 %210  ;;  %v2636_v23 = vpop.permute.xlu0 %2635 }
 0x130   :  { %v2637_v24 = vunpack.i.l.bf16 %v2636_v23  ;;  %v2638_v26 = vunpack.i.h.bf16 %v2636_v23 }
 0x132   :  { %510 = vmatpush.msrb.mxu0 %v2637_v24  ;;  %2611 = vmatpush.msra.mxu2 %v2637_v24 }
 0x134   :  { %511 = vmatpush.msrb.mxu0 %v2638_v26  ;;  %2612 = vmatpush.msra.mxu2 %v2638_v26 }
 0x135   :  { %1113 = vperm.xlu1 %2651, %v1038_v28   ;;  %1092 = vperm.xlu0 %2650, %v1031_v30   ;;  %v55_v30 = vld [vmem:[%s4871_s1] sm:$0xff] }
 0x136   :  { %512 = vmatpush.msrb.mxu0 %v2642_v32  ;;  %2613 = vmatpush.msra.mxu2 %v2642_v32  ;;  %v56_v32 = vld [vmem:[%s4871_s1 + $0x8] sm:$0xff] }
 0x137   :  { %v3012_v36 = vpop.permute.xlu1 %293  ;;  %v3014_v38 = vpop.permute.xlu0 %201 }
 0x138   :  { %513 = vmatpush.msrb.mxu0 %v2643_v35  ;;  %2614 = vmatpush.msra.mxu2 %v2643_v35  ;;  %v610_v35 = vld [vmem:[%s4872_s11 + $0x8] sm:$0xff] }
 0x139   :  { %677 = vmatpush.msra.mxu3 %v610_v35 }
 0x13a   :  { %514 = vmatpush.msrb.mxu0 %v2647_v39  ;;  %2615 = vmatpush.msra.mxu2 %v2647_v39  ;;  %v460_v39 = vpop.f32.mrf.mxu1 }
 0x13c   :  { %515 = vmatpush.msrb.mxu0 %v2648_v42  ;;  %2616 = vmatpush.msra.mxu2 %v2648_v42  ;;  %v59_v42 = vld [vmem:[%s4871_s1 + $0x20] sm:$0xff] }
 0x13d   :  { %1122 = vperm.xlu1 %2651, %v1041_v43   ;;  %1101 = vperm.xlu0 %2650, %v1034_v44   ;;  %v60_v43 = vld [vmem:[%s4871_s1 + $0x28] sm:$0xff] }
 0x13e   :  { %516 = vmatpush.msrb.mxu0 %v2883_v40  ;;  %2617 = vmatpush.msra.mxu2 %v2883_v40  ;;  %v1037_v40 = vld [vmem:[%s4866_s5 + $0xa0] sm:$0xff] }
 0x13f   :  { %v3028_v47 = vpop.permute.xlu1 %219  ;;  %v3030_v48 = vpop.permute.xlu0 %287 }
 0x140   :  { %517 = vmatpush.msrb.mxu0 %v2885_v41  ;;  %2618 = vmatpush.msra.mxu2 %v2885_v41  ;;  %v66_v41 = vld [vmem:[%s4868_s2 + $0x18] sm:$0xff] }
 0x141   :  { %2384 = vmatmul.msk.f32.gmra.mxu1 %vm390_vm2, %v66_v41 }
 0x142   :  { %518 = vmatpush.msrb.mxu0 %v2875_v37  ;;  %2619 = vmatpush.msra.mxu2 %v2875_v37  ;;  %v3049_v37 = vand.u32 127, %v4879_v49  ;;  %v463_v44 = vpop.f32.mrf.mxu1 }
 0x144   :  { %519 = vmatpush.msrb.mxu0 %v2868_v34  ;;  %2620 = vmatpush.msra.mxu2 %v2868_v34  ;;  %v279_v34 = vpop.permute.xlu2 %278  ;;  %vm245_vm3 = vcmp.eq.s32.totalorder %v3049_v37, %v199_v46  ;;  %vm326_vm6 = vcmp.eq.s32.totalorder %v3049_v37, %v2978_v11  ;;  %vm246_vm7 = vcmp.eq.s32.totalorder %v3049_v37, %v3014_v38  ;;  %v58_v38 = vld [vmem:[%s4871_s1 + $0x18] sm:$0xff] }
 0x145   :  { %1131 = vperm.xlu1 %2651, %v1044_v50   ;;  %1110 = vperm.xlu0 %2650, %v1037_v40   ;;  %vm325_vm4 = vcmp.eq.s32.totalorder %v3049_v37, %v279_v34  ;;  %vm342_vm8 = vmor %vm246_vm7, %vm326_vm6  ;;  %vm327_vm10 = vcmp.eq.s32.totalorder %v3049_v37, %v2986_v14  ;;  %vm328_vm13 = vcmp.eq.s32.totalorder %v3049_v37, %v3030_v48 }
 0x146   :  { %520 = vmatpush.msrb.mxu0 %v2861_v31  ;;  %2621 = vmatpush.msra.mxu2 %v2861_v31  ;;  %v1047_v31 = vld [vmem:[%s4866_s5 + $0xf0] sm:$0xff]  ;;  %vm341_vm5 = vmor %vm245_vm3, %vm325_vm4  ;;  %vm249_vm1 = vcmp.eq.s32.totalorder %v3049_v37, %v3001_v22  ;;  %vm330_vm7 = vcmp.eq.s32.totalorder %v3049_v37, %v3012_v36  ;;  %v609_v36 = vld [vmem:[%s4872_s11] sm:$0xff] }
 0x147   :  { %v3053_v51 = vpop.permute.xlu1 %302  ;;  %v3055_v52 = vpop.permute.xlu0 %213  ;;  %678 = vmatpush.msra.mxu3 %v609_v36 }
 0x148   :  { %521 = vmatpush.msrb.mxu0 %v2856_v29  ;;  %2622 = vmatpush.msra.mxu2 %v2856_v29  ;;  %v1040_v29 = vld [vmem:[%s4866_s5 + $0xb8] sm:$0xff] }
 0x149   :  { %2385 = vmatmul.msk.f32.gmra.mxu1 %vm390_vm2, %v67_v54 }
 0x14a   :  { %522 = vmatpush.msrb.mxu0 %v2851_v27  ;;  %2623 = vmatpush.msra.mxu2 %v2851_v27  ;;  %v4877_v27 = vmov 1.0   ;;  %v466_v50 = vpop.f32.mrf.mxu1 }
 0x14c   :  { %523 = vmatpush.msrb.mxu0 %v2846_v25  ;;  %2624 = vmatpush.msra.mxu2 %v2846_v25  ;;  %v73_v25 = vld [vmem:[%s4868_s2 + $0x50] sm:$0xff]  ;;  %v205_v59 = vpop.permute.xlu2 %204 }
 0x14d   :  { %1140 = vperm.xlu1 %2651, %v1047_v31   ;;  %1119 = vperm.xlu0 %2650, %v1040_v29   ;;  %vm247_vm9 = vcmp.eq.s32.totalorder %v3049_v37, %v205_v59 }
 0x14e   :  { %2397 = vmatmul.msk.f32.vlgmr.msrb.gmra.mxu0 %vm341_vm5, %v4877_v27  ;;  %2391 = vmatmul.msk.f32.gmra.mxu3 %vm390_vm2, %v73_v25  ;;  %vm343_vm11 = vmor %vm247_vm9, %vm327_vm10 }
 0x14f   :  { %v3080_v55 = vpop.permute.xlu1 %1050  ;;  %v3082_v56 = vpop.permute.xlu0 %296  ;;  %1316 = vmatpush.msra.mxu0 %v1276_v6 }
 0x151   :  { %2386 = vmatmul.msk.f32.gmra.mxu1 %vm390_vm2, %v68_v58 }
 0x154   :  { %v208_v1 = vpop.permute.xlu2 %207 }
 0x155   :  { %1128 = vperm.xlu0 %2650, %v1043_v57   ;;  %vm248_vm12 = vcmp.eq.s32.totalorder %v3049_v37, %v208_v1 }
 0x156   :  { %2398 = vmatmul.msk.f32.gmra.mxu0 %vm342_vm8, %v4877_v27  ;;  %2392 = vmatmul.msk.f32.gmra.mxu3 %vm390_vm2, %v74_v62  ;;  %vm344_vm14 = vmor %vm248_vm12, %vm328_vm13  ;;  %vm250_vm8 = vcmp.eq.s32.totalorder %v3049_v37, %v3055_v52  ;;  %vm331_vm13 = vcmp.eq.s32.totalorder %v3049_v37, %v3082_v56  ;;  %v62_v52 = vld [vmem:[%s4871_s1 + $0x38] sm:$0xff] }
 0x157   :  { %v3100_v60 = vpop.permute.xlu0 %222  ;;  %v3103_v61 = vpop.permute.xlu1 %1059  ;;  %vm346_vm9 = vmor %vm250_vm8, %vm330_vm7 }
 0x159   :  { %2387 = vmatmul.msk.f32.gmra.mxu1 %vm390_vm2, %v69_v0 }
 0x15c   :  { %v291_v8 = vpop.permute.xlu2 %290 }
 0x15d   :  { %1137 = vperm.xlu0 %2650, %v1046_v63   ;;  %vm329_vm15 = vcmp.eq.s32.totalorder %v3049_v37, %v291_v8 }
 0x15e   :  { %2399 = vmatmul.msk.f32.gmra.mxu0 %vm343_vm11, %v4877_v27  ;;  %2393 = vmatmul.msk.f32.gmra.mxu3 %vm390_vm2, %v75_v3  ;;  %vm345_vm3 = vmor %vm249_vm1, %vm329_vm15 }
 0x15f   :  { %v3119_v2 = vpop.permute.xlu0 %305  ;;  %v309_v4 = vpop.permute.xlu1 %308 }
 0x160   :  { %vm335_vm4 = vcmp.eq.s32.totalorder %v3049_v37, %v309_v4 }
 0x161   :  { %2388 = vmatmul.msk.f32.gmra.mxu1 %vm390_vm2, %v70_v5 }
 0x164   :  { %v217_v14 = vpop.permute.xlu2 %216 }
 0x166   :  { %2400 = vmatmul.msk.f32.gmra.mxu0 %vm344_vm14, %v4877_v27  ;;  %2394 = vmatmul.msk.f32.gmra.mxu3 %vm390_vm2, %v76_v9  ;;  %vm251_vm14 = vcmp.eq.s32.totalorder %v3049_v37, %v217_v14 }
 0x167   :  { %v3136_v7 = vpop.permute.xlu0 %1056  ;;  %v312_v11 = vpop.permute.xlu1 %311  ;;  %vm347_vm15 = vmor %vm251_vm14, %vm331_vm13 }
 0x168   :  { %vm336_vm10 = vcmp.eq.s32.totalorder %v3049_v37, %v312_v11 }
 0x169   :  { %2389 = vmatmul.msk.f32.gmra.mxu1 %vm390_vm2, %v71_v10 }
 0x16c   :  { %v300_v19 = vpop.permute.xlu2 %299 }
 0x16e   :  { %2401 = vmatmul.msk.f32.gmra.mxu0 %vm345_vm3, %v4877_v27  ;;  %2395 = vmatmul.msk.f32.gmra.mxu3 %vm390_vm2, %v77_v13 }
 0x16f   :  { %v229_v12 = vpop.permute.xlu0 %228  ;;  %v315_v15 = vpop.permute.xlu1 %314 }
 0x170   :  { %vm255_vm5 = vcmp.eq.s32.totalorder %v3049_v37, %v229_v12  ;;  %vm337_vm1 = vcmp.eq.s32.totalorder %v3049_v37, %v315_v15  ;;  %v487_v15 = vpop.f32.mrf.mxu3 }
 0x171   :  { %vm351_vm6 = vmor %vm255_vm5, %vm335_vm4  ;;  %vm332_vm5 = vcmp.eq.s32.totalorder %v3049_v37, %v300_v19 }
 0x172   :  { %2407 = vmatmul.msk.f32.vlgmr.msra.gmra.mxu2 %vm351_vm6, %v4877_v27  ;;  %vm252_vm6 = vcmp.eq.s32.totalorder %v3049_v37, %v3028_v47  ;;  %v61_v47 = vld [vmem:[%s4871_s1 + $0x30] sm:$0xff] }
 0x174   :  { %v226_v24 = vpop.permute.xlu2 %225 }
 0x176   :  { %2402 = vmatmul.msk.f32.gmra.mxu0 %vm346_vm9, %v4877_v27  ;;  %2396 = vmatmul.msk.f32.gmra.mxu3 %vm390_vm2, %v78_v17  ;;  %vm348_vm2 = vmor %vm252_vm6, %vm332_vm5 }
 0x177   :  { %v232_v16 = vpop.permute.xlu0 %231  ;;  %v318_v20 = vpop.permute.xlu1 %317 }
 0x178   :  { %vm256_vm11 = vcmp.eq.s32.totalorder %v3049_v37, %v232_v16  ;;  %vm338_vm7 = vcmp.eq.s32.totalorder %v3049_v37, %v318_v20 }
 0x179   :  { %vm352_vm12 = vmor %vm256_vm11, %vm336_vm10  ;;  %vm253_vm10 = vcmp.eq.s32.totalorder %v3049_v37, %v3100_v60  ;;  %vm333_vm11 = vcmp.eq.s32.totalorder %v3049_v37, %v3053_v51 }
 0x17a   :  { %2408 = vmatmul.msk.f32.gmra.mxu2 %vm352_vm12, %v4877_v27  ;;  %vm349_vm12 = vmor %vm253_vm10, %vm333_vm11  ;;  %vm1147_vm10 = vcmp.eq.s32.totalorder %v3049_v37, %v3136_v7  ;;  %vm1148_vm11 = vcmp.eq.s32.totalorder %v3049_v37, %v3103_v61 }
 0x17e   :  { %2403 = vmatmul.msk.f32.gmra.mxu0 %vm347_vm15, %v4877_v27 }
 0x17f   :  { %v235_v18 = vpop.permute.xlu0 %234  ;;  %v321_v22 = vpop.permute.xlu1 %320 }
 0x180   :  { %vm257_vm3 = vcmp.eq.s32.totalorder %v3049_v37, %v235_v18  ;;  %vm339_vm13 = vcmp.eq.s32.totalorder %v3049_v37, %v321_v22 }
 0x181   :  { %vm353_vm4 = vmor %vm257_vm3, %vm337_vm1  ;;  %vm334_vm1 = vcmp.eq.s32.totalorder %v3049_v37, %v3119_v2  ;;  %vm254_vm3 = vcmp.eq.s32.totalorder %v3049_v37, %v226_v24 }
 0x182   :  { %2409 = vmatmul.msk.f32.gmra.mxu2 %vm353_vm4, %v4877_v27  ;;  %vm350_vm4 = vmor %vm254_vm3, %vm334_vm1 }
 0x186   :  { %2404 = vmatmul.msk.f32.gmra.mxu0 %vm348_vm2, %v4877_v27 }
 0x187   :  { %v238_v21 = vpop.permute.xlu0 %237  ;;  %v324_v26 = vpop.permute.xlu1 %323 }
 0x188   :  { %vm258_vm8 = vcmp.eq.s32.totalorder %v3049_v37, %v238_v21  ;;  %vm340_vm5 = vcmp.eq.s32.totalorder %v3049_v37, %v324_v26 }
 0x189   :  { %vm354_vm9 = vmor %vm258_vm8, %vm338_vm7  ;;  %vm4978_vm7 = vcmask 64512   ;;  %vm4977_vm8 = vcmask 523264  }
 0x18a   :  { %2410 = vmatmul.msk.f32.gmra.mxu2 %vm354_vm9, %v4877_v27 }
 0x18e   :  { %2405 = vmatmul.msk.f32.gmra.mxu0 %vm349_vm12, %v4877_v27 }
 0x18f   :  { %v241_v23 = vpop.permute.xlu0 %240 }
 0x190   :  { %vm259_vm14 = vcmp.eq.s32.totalorder %v3049_v37, %v241_v23 }
 0x191   :  { %vm355_vm15 = vmor %vm259_vm14, %vm339_vm13 }
 0x192   :  { %2411 = vmatmul.msk.f32.gmra.mxu2 %vm355_vm15, %v4877_v27 }
 0x196   :  { %2406 = vmatmul.msk.f32.gmra.mxu0 %vm350_vm4, %v4877_v27 }
 0x197   :  { %v244_v28 = vpop.permute.xlu0 %243 }
 0x198   :  { %vm260_vm6 = vcmp.eq.s32.totalorder %v3049_v37, %v244_v28 }
 0x199   :  { %vm356_vm2 = vmor %vm260_vm6, %vm340_vm5 }
 0x19a   :  { %2412 = vmatmul.msk.f32.gmra.mxu2 %vm356_vm2, %v4877_v27 }
 0x19e   :  { %2469 = vmatmul.msk.f32.vlgmr.msra.gmra.mxu0 %vm4978_vm7, %v55_v30 }
 0x1a6   :  { %2470 = vmatmul.msk.f32.gmra.mxu0 %vm4978_vm7, %v56_v32 }
 0x1ae   :  { %2471 = vmatmul.msk.f32.gmra.mxu0 %vm4978_vm7, %v57_v33 }
 0x1b6   :  { %2472 = vmatmul.msk.f32.gmra.mxu0 %vm4978_vm7, %v58_v38 }
 0x1be   :  { %2473 = vmatmul.msk.f32.gmra.mxu0 %vm4978_vm7, %v59_v42  ;;  %v469_v31 = vpop.f32.mrf.mxu1 }
 0x1c6   :  { %2474 = vmatmul.msk.f32.gmra.mxu0 %vm4978_vm7, %v60_v43  ;;  %v472_v58 = vpop.f32.mrf.mxu1 }
 0x1cb   :  { %v525_v46 = vpop.f32.mrf.mxu0 }
 0x1cc   :  { %v526_v48 = vadd.f32 %v525_v46, %v460_v39 }
 0x1ce   :  { %v577_v40 = vadd.f32 %v3232_v45, %v526_v48  ;;  %2475 = vmatmul.msk.f32.gmra.mxu0 %vm4978_vm7, %v61_v47  ;;  %v475_v1 = vpop.f32.mrf.mxu1 }
 0x1d0   :  { %v593_v41 = vmax.f32 %v577_v40, 0.0 }
 0x1d1   :  { %v490_v22 = vpop.f32.mrf.mxu3 }
 0x1d2   :  { %2413 = vmatmul.msk.f32.vlgmr.msra.gmra.mxu3 %vm81_vm0, %v593_v41 }
 0x1d3   :  { %v528_v51 = vpop.f32.mrf.mxu0 }
 0x1d4   :  { %v529_v34 = vadd.f32 %v528_v51, %v463_v44 }
 0x1d6   :  { %v578_v53 = vadd.f32 %v3232_v45, %v529_v34  ;;  %2476 = vmatmul.msk.f32.gmra.mxu0 %vm4978_vm7, %v62_v52  ;;  %v478_v8 = vpop.f32.mrf.mxu1 }
 0x1d8   :  { %v594_v29 = vmax.f32 %v578_v53, 0.0 }
 0x1d9   :  { %v493_v33 = vpop.f32.mrf.mxu3 }
 0x1da   :  { %2414 = vmatmul.msk.f32.gmra.mxu3 %vm81_vm0, %v594_v29 }
 0x1db   :  { %v531_v54 = vpop.f32.mrf.mxu0 }
 0x1dc   :  { %v532_v56 = vadd.f32 %v531_v54, %v466_v50 }
 0x1de   :  { %v579_v25 = vadd.f32 %v3232_v45, %v532_v56  ;;  %v481_v14 = vpop.f32.mrf.mxu1 }
 0x1e0   :  { %v595_v57 = vmax.f32 %v579_v25, 0.0 }
 0x1e1   :  { %v496_v46 = vpop.f32.mrf.mxu3 }
 0x1e2   :  { %2415 = vmatmul.msk.f32.gmra.mxu3 %vm81_vm0, %v595_v57 }
 0x1e3   :  { %v534_v59 = vpop.f32.mrf.mxu0 }
 0x1e4   :  { %v535_v60 = vadd.f32 %v534_v59, %v469_v31 }
 0x1e6   :  { %v580_v62 = vadd.f32 %v3232_v45, %v535_v60  ;;  %v484_v21 = vpop.f32.mrf.mxu1 }
 0x1e8   :  { %v596_v63 = vmax.f32 %v580_v62, 0.0 }
 0x1e9   :  { %v499_v52 = vpop.f32.mrf.mxu3 }
 0x1ea   :  { %2416 = vmatmul.msk.f32.gmra.mxu3 %vm81_vm0, %v596_v63 }
 0x1eb   :  { %v537_v0 = vpop.f32.mrf.mxu0 }
 0x1ec   :  { %v538_v2 = vadd.f32 %v537_v0, %v472_v58 }
 0x1ee   :  { %v581_v3 = vadd.f32 %v3232_v45, %v538_v2 }
 0x1f0   :  { %v597_v4 = vmax.f32 %v581_v3, 0.0 }
 0x1f1   :  { %v502_v25 = vpop.f32.mrf.mxu3 }
 0x1f2   :  { %2417 = vmatmul.msk.f32.gmra.mxu3 %vm81_vm0, %v597_v4 }
 0x1f3   :  { %v540_v5 = vpop.f32.mrf.mxu0 }
 0x1f4   :  { %v541_v6 = vadd.f32 %v540_v5, %v475_v1 }
 0x1f5   :  { %v555_v23 = vpop.f32.mrf.mxu2 }
 0x1f6   :  { %v582_v9 = vadd.f32 %v3232_v45, %v541_v6  ;;  %v556_v39 = vadd.f32 %v555_v23, %v490_v22 }
 0x1f8   :  { %v598_v10 = vmax.f32 %v582_v9, 0.0  ;;  %v587_v44 = vadd.f32 %v3232_v45, %v556_v39 }
 0x1f9   :  { %v505_v1 = vpop.f32.mrf.mxu3 }
 0x1fa   :  { %2418 = vmatmul.msk.f32.gmra.mxu3 %vm81_vm0, %v598_v10  ;;  %v603_v50 = vmax.f32 %v587_v44, 0.0  ;;  %v3291_v10 = vld [vmem:[%s4873_s12] ss:$0 sm:$0xff] }
 0x1fb   :  { %v543_v11 = vpop.f32.mrf.mxu0 }
 0x1fc   :  { %v544_v12 = vadd.f32 %v543_v11, %v478_v8 }
 0x1fd   :  { %v558_v36 = vpop.f32.mrf.mxu2 }
 0x1fe   :  { %v583_v13 = vadd.f32 %v3232_v45, %v544_v12  ;;  %v559_v48 = vadd.f32 %v558_v36, %v493_v33 }
 0x200   :  { %v599_v16 = vmax.f32 %v583_v13, 0.0  ;;  %v588_v41 = vadd.f32 %v3232_v45, %v559_v48 }
 0x202   :  { %2419 = vmatmul.msk.f32.gmra.mxu3 %vm81_vm0, %v599_v16  ;;  %v604_v34 = vmax.f32 %v588_v41, 0.0 }
 0x203   :  { %v546_v17 = vpop.f32.mrf.mxu0 }
 0x204   :  { %v547_v18 = vadd.f32 %v546_v17, %v481_v14 }
 0x205   :  { %v561_v47 = vpop.f32.mrf.mxu2 }
 0x206   :  { %v584_v19 = vadd.f32 %v3232_v45, %v547_v18  ;;  %v562_v51 = vadd.f32 %v561_v47, %v496_v46  ;;  %v4897_v18 = vmov 0.0  }
 0x208   :  { %v600_v20 = vmax.f32 %v584_v19, 0.0  ;;  %v589_v29 = vadd.f32 %v3232_v45, %v562_v51 }
 0x20a   :  { %2420 = vmatmul.msk.f32.gmra.mxu3 %vm81_vm0, %v600_v20  ;;  %v605_v56 = vmax.f32 %v589_v29, 0.0 }
 0x20b   :  { %v549_v24 = vpop.f32.mrf.mxu0 }
 0x20c   :  { %v550_v26 = vadd.f32 %v549_v24, %v484_v21 }
 0x20d   :  { %v564_v53 = vpop.f32.mrf.mxu2 }
 0x20e   :  { %v585_v28 = vadd.f32 %v3232_v45, %v550_v26  ;;  %v565_v54 = vadd.f32 %v564_v53, %v499_v52 }
 0x210   :  { %v601_v30 = vmax.f32 %v585_v28, 0.0  ;;  %v590_v59 = vadd.f32 %v3232_v45, %v565_v54 }
 0x212   :  { %2421 = vmatmul.msk.f32.gmra.mxu3 %vm81_vm0, %v601_v30  ;;  %v606_v62 = vmax.f32 %v590_v59, 0.0 }
 0x213   :  { %v552_v32 = vpop.f32.mrf.mxu0 }
 0x214   :  { %v553_v35 = vadd.f32 %v552_v32, %v487_v15 }
 0x215   :  { %v567_v57 = vpop.f32.mrf.mxu2 }
 0x216   :  { %v586_v38 = vadd.f32 %v3232_v45, %v553_v35  ;;  %v568_v60 = vadd.f32 %v567_v57, %v502_v25  ;;  %v3342_v35 = vsel %vm1147_vm10, 1.0, %v4897_v18 }
 0x217   :  { %5031 = vst [vmem:[#allocation16_spill] sm:$0xff] %v3342_v35 }
 0x218   :  { %v602_v42 = vmax.f32 %v586_v38, 0.0  ;;  %v591_v0 = vadd.f32 %v3232_v45, %v568_v60 }
 0x21a   :  { %2422 = vmatmul.msk.f32.gmra.mxu3 %vm81_vm0, %v602_v42  ;;  %v607_v4 = vmax.f32 %v591_v0, 0.0  ;;  %v3355_v42 = vsel %vm1148_vm11, 1.0, %v4897_v18 }
 0x21b   :  { %v3262_v43 = vpop.f32.mrf.mxu0  ;;  %5033 = vst [vmem:[#allocation18_spill] sm:$0xff] %v3355_v42 }
 0x21c   :  { %5017 = vst [vmem:[#allocation2_spill] sm:$0xff] %v3262_v43 }
 0x21d   :  { %v570_v2 = vpop.f32.mrf.mxu2 }
 0x21e   :  { %v571_v3 = vadd.f32 %v570_v2, %v505_v1 }
 0x220   :  { %v592_v6 = vadd.f32 %v3232_v45, %v571_v3 }
 0x222   :  { %2423 = vmatmul.msk.f32.gmra.mxu3 %vm81_vm0, %v603_v50  ;;  %v608_v8 = vmax.f32 %v592_v6, 0.0 }
 0x223   :  { %v3266_v40 = vpop.f32.mrf.mxu0 }
 0x224   :  { %5018 = vst [vmem:[#allocation3_spill] sm:$0xff] %v3266_v40 }
 0x22a   :  { %2424 = vmatmul.msk.f32.gmra.mxu3 %vm81_vm0, %v604_v34 }
 0x22b   :  { %v3270_v31 = vpop.f32.mrf.mxu0 }
 0x22c   :  { %5019 = vst [vmem:[#allocation4_spill] sm:$0xff] %v3270_v31 }
 0x232   :  { %2425 = vmatmul.msk.f32.gmra.mxu3 %vm81_vm0, %v605_v56 }
 0x233   :  { %v3274_v58 = vpop.f32.mrf.mxu0 }
 0x234   :  { %5020 = vst [vmem:[#allocation5_spill] sm:$0xff] %v3274_v58 }
 0x23a   :  { %2426 = vmatmul.msk.f32.gmra.mxu3 %vm81_vm0, %v606_v62 }
 0x23b   :  { %v3278_v63 = vpop.f32.mrf.mxu0 }
 0x23c   :  { %5021 = vst [vmem:[#allocation6_spill] sm:$0xff] %v3278_v63 }
 0x242   :  { %2427 = vmatmul.msk.f32.gmra.mxu3 %vm81_vm0, %v607_v4 }
 0x243   :  { %v3282_v5 = vpop.f32.mrf.mxu0 }
 0x244   :  { %5022 = vst [vmem:[#allocation7_spill] sm:$0xff] %v3282_v5 }
 0x24a   :  { %2428 = vmatmul.msk.f32.gmra.mxu3 %vm81_vm0, %v608_v8  ;;  %vm1145_vm0 = vcmp.eq.s32.totalorder %v3049_v37, %v3080_v55  ;;  %v1054_v55 = vpop.permute.xlu2 %1053 }
 0x24b   :  { %v3286_v9 = vpop.f32.mrf.mxu0  ;;  %v3316_v19 = vsel %vm1145_vm0, 1.0, %v4897_v18  ;;  %vm1146_vm9 = vcmp.eq.s32.totalorder %v3049_v37, %v1054_v55 }
 0x24c   :  { %5023 = vst [vmem:[#allocation8_spill] sm:$0xff] %v3286_v9  ;;  %v3329_v24 = vsel %vm1146_vm9, 1.0, %v4897_v18 }
 0x24d   :  { %5027 = vst [vmem:[#allocation12_spill] sm:$0xff] %v3316_v19 }
 0x24e   :  { %5029 = vst [vmem:[#allocation14_spill] sm:$0xff] %v3329_v24 }
 0x252   :  { %v1063_v33 = vpop.permute.xlu2 %1062 }
 0x253   :  { %v3293_v11 = vpop.f32.mrf.mxu0  ;;  %vm1149_vm12 = vcmp.eq.s32.totalorder %v3049_v37, %v1063_v33 }
 0x254   :  { %5024 = vst [vmem:[#allocation9_spill] sm:$0xff] %v3293_v11  ;;  %1447 = vmatpush.msrb.mxu1 %v3293_v11  ;;  %v3367_v50 = vsel %vm1149_vm12, 1.0, %v4897_v18 }
 0x255   :  { %v680_v12 = vpop.f32.mrf.mxu3  ;;  %5034 = vst [vmem:[#allocation19_spill] sm:$0xff] %v3367_v50 }
 0x256   :  { %v3297_v13 = vadd.f32 %v3291_v10, %v680_v12  ;;  %1448 = vmatpush.msrb.mxu1 %v3286_v9 }
 0x258   :  { %5025 = vst [vmem:[#allocation10_spill] sm:$0xff] %v3297_v13  ;;  %1449 = vmatpush.msrb.mxu1 %v3282_v5  ;;  %v728_v45 = vmul.f32 %v3297_v13, %v3297_v13 }
 0x25a   :  { %1450 = vmatpush.msrb.mxu1 %v3278_v63  ;;  %v745_v14 = vsel %vm4978_vm7, %v728_v45, 0.0  ;;  %v1066_v46 = vpop.permute.xlu2 %1065 }
 0x25b   :  { %746 = vadd.xlane.f32.xlu1 %v745_v14  ;;  %vm1150_vm13 = vcmp.eq.s32.totalorder %v3049_v37, %v1066_v46 }
 0x25c   :  { %1451 = vmatpush.msrb.mxu1 %v3274_v58  ;;  %v3379_v29 = vsel %vm1150_vm13, 1.0, %v4897_v18 }
 0x25d   :  { %v683_v15 = vpop.f32.mrf.mxu3  ;;  %5035 = vst [vmem:[#allocation20_spill] sm:$0xff] %v3379_v29 }
 0x25e   :  { %v3307_v16 = vadd.f32 %v3291_v10, %v683_v15  ;;  %1452 = vmatpush.msrb.mxu1 %v3270_v31 }
 0x260   :  { %5026 = vst [vmem:[#allocation11_spill] sm:$0xff] %v3307_v16  ;;  %1453 = vmatpush.msrb.mxu1 %v3266_v40  ;;  %v729_v17 = vmul.f32 %v3307_v16, %v3307_v16 }
 0x262   :  { %1454 = vmatpush.msrb.mxu1 %v3262_v43  ;;  %v748_v20 = vsel %vm4978_vm7, %v729_v17, 0.0  ;;  %v1069_v52 = vpop.permute.xlu2 %1068 }
 0x263   :  { %2477 = vmatmul.msk.f32.vlgmr.msrb.gmra.mxu1 %vm4977_vm8, %v3316_v19  ;;  %749 = vadd.xlane.f32.xlu1 %v748_v20  ;;  %vm1151_vm14 = vcmp.eq.s32.totalorder %v3049_v37, %v1069_v52  ;;  %v1087_v52 = vpop.permute.xlu1 %1086 }
 0x264   :  { %v3391_v60 = vsel %vm1151_vm14, 1.0, %v4897_v18  ;;  %vm1157_vm6 = vcmp.eq.s32.totalorder %v3049_v37, %v1087_v52 }
 0x265   :  { %v686_v21 = vpop.f32.mrf.mxu3  ;;  %5037 = vst [vmem:[#allocation22_spill] sm:$0xff] %v3391_v60 }
 0x266   :  { %v3323_v22 = vadd.f32 %v3291_v10, %v686_v21 }
 0x268   :  { %5028 = vst [vmem:[#allocation13_spill] sm:$0xff] %v3323_v22  ;;  %v730_v23 = vmul.f32 %v3323_v22, %v3323_v22 }
 0x26a   :  { %v751_v26 = vsel %vm4978_vm7, %v730_v23, 0.0  ;;  %v1072_v57 = vpop.permute.xlu2 %1071 }
 0x26b   :  { %2478 = vmatmul.msk.f32.gmra.mxu1 %vm4977_vm8, %v3329_v24  ;;  %752 = vadd.xlane.f32.xlu1 %v751_v26  ;;  %vm1152_vm15 = vcmp.eq.s32.totalorder %v3049_v37, %v1072_v57  ;;  %v3463_v57 = vsel %vm1157_vm6, 1.0, %v4897_v18 }
 0x26c   :  { %v3403_v3 = vsel %vm1152_vm15, 1.0, %v4897_v18  ;;  %5047 = vst [vmem:[#allocation32_spill] sm:$0xff] %v3463_v57 }
 0x26d   :  { %v689_v28 = vpop.f32.mrf.mxu3  ;;  %5038 = vst [vmem:[#allocation23_spill] sm:$0xff] %v3403_v3 }
 0x26e   :  { %v3335_v30 = vadd.f32 %v3291_v10, %v689_v28 }
 0x270   :  { %5030 = vst [vmem:[#allocation15_spill] sm:$0xff] %v3335_v30  ;;  %v731_v32 = vmul.f32 %v3335_v30, %v3335_v30 }
 0x272   :  { %v754_v36 = vsel %vm4978_vm7, %v731_v32, 0.0  ;;  %v1075_v4 = vpop.permute.xlu2 %1074 }
 0x273   :  { %2479 = vmatmul.msk.f32.gmra.mxu1 %vm4977_vm8, %v3342_v35  ;;  %755 = vadd.xlane.f32.xlu1 %v754_v36  ;;  %vm1153_vm1 = vcmp.eq.s32.totalorder %v3049_v37, %v1075_v4 }
 0x274   :  { %v3415_v14 = vsel %vm1153_vm1, 1.0, %v4897_v18 }
 0x275   :  { %v692_v38 = vpop.f32.mrf.mxu3  ;;  %5040 = vst [vmem:[#allocation25_spill] sm:$0xff] %v3415_v14 }
 0x276   :  { %v3348_v39 = vadd.f32 %v3291_v10, %v692_v38 }
 0x278   :  { %5032 = vst [vmem:[#allocation17_spill] sm:$0xff] %v3348_v39  ;;  %v732_v7 = vmul.f32 %v3348_v39, %v3348_v39 }
 0x27a   :  { %v757_v44 = vsel %vm4978_vm7, %v732_v7, 0.0  ;;  %v1078_v17 = vpop.permute.xlu2 %1077 }
 0x27b   :  { %2480 = vmatmul.msk.f32.gmra.mxu1 %vm4977_vm8, %v3355_v42  ;;  %758 = vadd.xlane.f32.xlu1 %v757_v44  ;;  %vm1154_vm3 = vcmp.eq.s32.totalorder %v3049_v37, %v1078_v17  ;;  %v1084_v44 = vpop.permute.xlu0 %1083 }
 0x27c   :  { %v3427_v23 = vsel %vm1154_vm3, 1.0, %v4897_v18  ;;  %vm1156_vm5 = vcmp.eq.s32.totalorder %v3049_v37, %v1084_v44 }
 0x27d   :  { %v695_v47 = vpop.f32.mrf.mxu3  ;;  %5042 = vst [vmem:[#allocation27_spill] sm:$0xff] %v3427_v23 }
 0x27e   :  { %v3361_v48 = vadd.f32 %v3291_v10, %v695_v47 }
 0x280   :  { %v733_v61 = vmul.f32 %v3361_v48, %v3361_v48 }
 0x282   :  { %v760_v41 = vsel %vm4978_vm7, %v733_v61, 0.0  ;;  %v1081_v32 = vpop.permute.xlu2 %1080 }
 0x283   :  { %2481 = vmatmul.msk.f32.gmra.mxu1 %vm4977_vm8, %v3367_v50  ;;  %761 = vadd.xlane.f32.xlu0 %v760_v41  ;;  %vm1155_vm4 = vcmp.eq.s32.totalorder %v3049_v37, %v1081_v32  ;;  %v3451_v41 = vsel %vm1156_vm5, 1.0, %v4897_v18 }
 0x284   :  { %v3439_v38 = vsel %vm1155_vm4, 1.0, %v4897_v18  ;;  %5045 = vst [vmem:[#allocation30_spill] sm:$0xff] %v3451_v41 }
 0x285   :  { %v698_v51 = vpop.f32.mrf.mxu3  ;;  %5044 = vst [vmem:[#allocation29_spill] sm:$0xff] %v3439_v38 }
 0x286   :  { %v3373_v34 = vadd.f32 %v3291_v10, %v698_v51 }
 0x288   :  { %v734_v53 = vmul.f32 %v3373_v34, %v3373_v34 }
 0x28a   :  { %v763_v54 = vsel %vm4978_vm7, %v734_v53, 0.0 }
 0x28b   :  { %2482 = vmatmul.msk.f32.gmra.mxu1 %vm4977_vm8, %v3379_v29  ;;  %764 = vadd.xlane.f32.xlu2 %v763_v54 }
 0x28d   :  { %v701_v56 = vpop.f32.mrf.mxu3 }
 0x28e   :  { %v3385_v25 = vadd.f32 %v3291_v10, %v701_v56 }
 0x290   :  { %5036 = vst [vmem:[#allocation21_spill] sm:$0xff] %v3385_v25  ;;  %v735_v59 = vmul.f32 %v3385_v25, %v3385_v25 }
 0x292   :  { %v766_v62 = vsel %vm4978_vm7, %v735_v59, 0.0 }
 0x293   :  { %2483 = vmatmul.msk.f32.gmra.mxu1 %vm4977_vm8, %v3391_v60  ;;  %767 = vadd.xlane.f32.xlu1 %v766_v62 }
 0x295   :  { %v704_v0 = vpop.f32.mrf.mxu3 }
 0x296   :  { %v3397_v1 = vadd.f32 %v3291_v10, %v704_v0  ;;  %v1090_v0 = vpop.permute.xlu2 %1089 }
 0x297   :  { %vm1158_vm2 = vcmp.eq.s32.totalorder %v3049_v37, %v1090_v0 }
 0x298   :  { %v736_v2 = vmul.f32 %v3397_v1, %v3397_v1 }
 0x29a   :  { %v769_v6 = vsel %vm4978_vm7, %v736_v2, 0.0 }
 0x29b   :  { %2484 = vmatmul.msk.f32.gmra.mxu1 %vm4977_vm8, %v3403_v3  ;;  %770 = vadd.xlane.f32.xlu0 %v769_v6  ;;  %v3475_v6 = vsel %vm1158_vm2, 1.0, %v4897_v18 }
 0x29c   :  { %5049 = vst [vmem:[#allocation34_spill] sm:$0xff] %v3475_v6 }
 0x29d   :  { %v707_v8 = vpop.f32.mrf.mxu3 }
 0x29e   :  { %v3409_v12 = vadd.f32 %v3291_v10, %v707_v8  ;;  %v1099_v32 = vpop.permute.xlu2 %1098 }
 0x29f   :  { %vm1161_vm10 = vcmp.eq.s32.totalorder %v3049_v37, %v1099_v32 }
 0x2a0   :  { %5039 = vst [vmem:[#allocation24_spill] sm:$0xff] %v3409_v12  ;;  %v737_v45 = vmul.f32 %v3409_v12, %v3409_v12 }
 0x2a2   :  { %v772_v15 = vsel %vm4978_vm7, %v737_v45, 0.0  ;;  %v1093_v45 = vpop.permute.xlu0 %1092 }
 0x2a3   :  { %2485 = vmatmul.msk.f32.gmra.mxu1 %vm4977_vm8, %v3415_v14  ;;  %773 = vadd.xlane.f32.xlu2 %v772_v15  ;;  %vm1159_vm0 = vcmp.eq.s32.totalorder %v3049_v37, %v1093_v45 }
 0x2a5   :  { %v710_v20 = vpop.f32.mrf.mxu3 }
 0x2a6   :  { %v3421_v21 = vadd.f32 %v3291_v10, %v710_v20 }
 0x2a8   :  { %5041 = vst [vmem:[#allocation26_spill] sm:$0xff] %v3421_v21  ;;  %v738_v55 = vmul.f32 %v3421_v21, %v3421_v21 }
 0x2aa   :  { %v775_v26 = vsel %vm4978_vm7, %v738_v55, 0.0  ;;  %v3487_v55 = vsel %vm1159_vm0, 1.0, %v4897_v18  ;;  %v1102_v44 = vpop.permute.xlu0 %1101 }
 0x2ab   :  { %2486 = vmatmul.msk.f32.gmra.mxu1 %vm4977_vm8, %v3427_v23  ;;  %776 = vadd.xlane.f32.xlu1 %v775_v26  ;;  %5050 = vst [vmem:[#allocation35_spill] sm:$0xff] %v3487_v55  ;;  %vm1162_vm11 = vcmp.eq.s32.totalorder %v3049_v37, %v1102_v44 }
 0x2ad   :  { %v713_v28 = vpop.f32.mrf.mxu3 }
 0x2ae   :  { %v3433_v33 = vadd.f32 %v3291_v10, %v713_v28  ;;  %v1096_v28 = vpop.permute.xlu1 %1095 }
 0x2af   :  { %vm1160_vm9 = vcmp.eq.s32.totalorder %v3049_v37, %v1096_v28 }
 0x2b0   :  { %5043 = vst [vmem:[#allocation28_spill] sm:$0xff] %v3433_v33  ;;  %v739_v36 = vmul.f32 %v3433_v33, %v3433_v33 }
 0x2b2   :  { %v778_v7 = vsel %vm4978_vm7, %v739_v36, 0.0  ;;  %v1111_v0 = vpop.permute.xlu0 %1110 }
 0x2b3   :  { %2487 = vmatmul.msk.f32.gmra.mxu1 %vm4977_vm8, %v3439_v38  ;;  %779 = vadd.xlane.f32.xlu0 %v778_v7  ;;  %v3502_v7 = vsel %vm1161_vm10, 1.0, %v4897_v18  ;;  %vm1165_vm14 = vcmp.eq.s32.totalorder %v3049_v37, %v1111_v0 }
 0x2b4   :  { %5053 = vst [vmem:[#allocation38_spill] sm:$0xff] %v3502_v7 }
 0x2b5   :  { %v716_v46 = vpop.f32.mrf.mxu3 }
 0x2b6   :  { %v3445_v47 = vadd.f32 %v3291_v10, %v716_v46 }
 0x2b8   :  { %v740_v61 = vmul.f32 %v3445_v47, %v3445_v47 }
 0x2ba   :  { %v781_v51 = vsel %vm4978_vm7, %v740_v61, 0.0  ;;  %v3510_v61 = vsel %vm1162_vm11, 1.0, %v4897_v18 }
 0x2bb   :  { %2488 = vmatmul.msk.f32.gmra.mxu1 %vm4977_vm8, %v3451_v41  ;;  %782 = vadd.xlane.f32.xlu2 %v781_v51  ;;  %5055 = vst [vmem:[#allocation40_spill] sm:$0xff] %v3510_v61  ;;  %v1105_v51 = vpop.permute.xlu1 %1104 }
 0x2bc   :  { %vm1163_vm12 = vcmp.eq.s32.totalorder %v3049_v37, %v1105_v51 }
 0x2bd   :  { %v719_v53 = vpop.f32.mrf.mxu3 }
 0x2be   :  { %v3457_v54 = vadd.f32 %v3291_v10, %v719_v53  ;;  %v3518_v53 = vsel %vm1163_vm12, 1.0, %v4897_v18 }
 0x2bf   :  { %5057 = vst [vmem:[#allocation42_spill] sm:$0xff] %v3518_v53 }
 0x2c0   :  { %5046 = vst [vmem:[#allocation31_spill] sm:$0xff] %v3457_v54  ;;  %v741_v56 = vmul.f32 %v3457_v54, %v3457_v54 }
 0x2c2   :  { %v784_v59 = vsel %vm4978_vm7, %v741_v56, 0.0  ;;  %v1108_v56 = vpop.permute.xlu2 %1107 }
 0x2c3   :  { %2489 = vmatmul.msk.f32.gmra.mxu1 %vm4977_vm8, %v3463_v57  ;;  %785 = vadd.xlane.f32.xlu2 %v784_v59  ;;  %vm1164_vm13 = vcmp.eq.s32.totalorder %v3049_v37, %v1108_v56  ;;  %v1114_v45 = vpop.permute.xlu1 %1113  ;;  %v1120_v56 = vpop.permute.xlu0 %1119 }
 0x2c4   :  { %vm1166_vm15 = vcmp.eq.s32.totalorder %v3049_v37, %v1114_v45  ;;  %vm1168_vm3 = vcmp.eq.s32.totalorder %v3049_v37, %v1120_v56 }
 0x2c5   :  { %v722_v62 = vpop.f32.mrf.mxu3 }
 0x2c6   :  { %v3469_v2 = vadd.f32 %v3291_v10, %v722_v62  ;;  %v3526_v62 = vsel %vm1164_vm13, 1.0, %v4897_v18 }
 0x2c7   :  { %5059 = vst [vmem:[#allocation44_spill] sm:$0xff] %v3526_v62 }
 0x2c8   :  { %5048 = vst [vmem:[#allocation33_spill] sm:$0xff] %v3469_v2  ;;  %v742_v4 = vmul.f32 %v3469_v2, %v3469_v2 }
 0x2ca   :  { %v787_v8 = vsel %vm4978_vm7, %v742_v4, 0.0  ;;  %v1117_v28 = vpop.permute.xlu2 %1116 }
 0x2cb   :  { %2490 = vmatmul.msk.f32.gmra.mxu1 %vm4977_vm8, %v3475_v6  ;;  %788 = vadd.xlane.f32.xlu1 %v787_v8  ;;  %v3534_v8 = vsel %vm1165_vm14, 1.0, %v4897_v18  ;;  %vm1167_vm1 = vcmp.eq.s32.totalorder %v3049_v37, %v1117_v28  ;;  %v1123_v28 = vpop.permute.xlu1 %1122 }
 0x2cc   :  { %5061 = vst [vmem:[#allocation46_spill] sm:$0xff] %v3534_v8  ;;  %v3554_v51 = vsel %vm1167_vm1, 1.0, %v4897_v18  ;;  %vm1169_vm4 = vcmp.eq.s32.totalorder %v3049_v37, %v1123_v28 }
 0x2cd   :  { %v725_v15 = vpop.f32.mrf.mxu3  ;;  %5064 = vst [vmem:[#allocation49_spill] sm:$0xff] %v3554_v51  ;;  %v3574_v27 = vsel %vm1169_vm4, 1.0, %v4897_v18 }
 0x2ce   :  { %v3481_v17 = vadd.f32 %v3291_v10, %v725_v15  ;;  %v3494_v10 = vsel %vm1160_vm9, 1.0, %v4897_v18  ;;  %5067 = vst [vmem:[#allocation52_spill] sm:$0xff] %v3574_v27 }
 0x2cf   :  { %5051 = vst [vmem:[#allocation36_spill] sm:$0xff] %v3494_v10 }
 0x2d0   :  { %v743_v20 = vmul.f32 %v3481_v17, %v3481_v17 }
 0x2d2   :  { %v790_v26 = vsel %vm4978_vm7, %v743_v20, 0.0  ;;  %v1126_v49 = vpop.permute.xlu2 %1125 }
 0x2d3   :  { %2491 = vmatmul.msk.f32.gmra.mxu1 %vm4977_vm8, %v3487_v55  ;;  %791 = vadd.xlane.f32.xlu0 %v790_v26  ;;  %v3544_v26 = vsel %vm1166_vm15, 1.0, %v4897_v18  ;;  %vm1170_vm5 = vcmp.eq.s32.totalorder %v3049_v37, %v1126_v49 }
 0x2d4   :  { %5063 = vst [vmem:[#allocation48_spill] sm:$0xff] %v3544_v26 }
 0x2db   :  { %2492 = vmatmul.msk.f32.gmra.mxu1 %vm4977_vm8, %v3494_v10 }
 0x2e0   :  { %v3499_v36 = vpop.f32.mrf.mxu1 }
 0x2e1   :  { %5052 = vst [vmem:[#allocation37_spill] sm:$0xff] %v3499_v36 }
 0x2e3   :  { %2493 = vmatmul.msk.f32.gmra.mxu1 %vm4977_vm8, %v3502_v7 }
 0x2e8   :  { %v3507_v46 = vpop.f32.mrf.mxu1 }
 0x2e9   :  { %5054 = vst [vmem:[#allocation39_spill] sm:$0xff] %v3507_v46 }
 0x2eb   :  { %2494 = vmatmul.msk.f32.gmra.mxu1 %vm4977_vm8, %v3510_v61 }
 0x2f0   :  { %v3515_v52 = vpop.f32.mrf.mxu1 }
 0x2f1   :  { %5056 = vst [vmem:[#allocation41_spill] sm:$0xff] %v3515_v52 }
 0x2f3   :  { %2495 = vmatmul.msk.f32.gmra.mxu1 %vm4977_vm8, %v3518_v53 }
 0x2f8   :  { %v3523_v59 = vpop.f32.mrf.mxu1 }
 0x2f9   :  { %5058 = vst [vmem:[#allocation43_spill] sm:$0xff] %v3523_v59  ;;  %v1561_v11 = vsel %vm4978_vm7, %v3523_v59, 0.0  ;;  %v1552_v59 = vsel %vm4978_vm7, %v3499_v36, 0.0 }
 0x2fb   :  { %2496 = vmatmul.msk.f32.gmra.mxu1 %vm4977_vm8, %v3526_v62 }
 0x300   :  { %v3531_v4 = vpop.f32.mrf.mxu1 }
 0x301   :  { %5060 = vst [vmem:[#allocation45_spill] sm:$0xff] %v3531_v4 }
 0x303   :  { %2497 = vmatmul.msk.f32.gmra.mxu1 %vm4977_vm8, %v3534_v8  ;;  %v1135_v8 = vpop.permute.xlu2 %1134 }
 0x304   :  { %vm1173_vm0 = vcmp.eq.s32.totalorder %v3049_v37, %v1135_v8 }
 0x308   :  { %v3539_v15 = vpop.f32.mrf.mxu1 }
 0x309   :  { %5062 = vst [vmem:[#allocation47_spill] sm:$0xff] %v3539_v15  ;;  %v1567_v20 = vsel %vm4978_vm7, %v3539_v15, 0.0 }
 0x30a   :  { %1568 = vadd.xlane.f32.xlu2 %v1567_v20  ;;  %v3564_v20 = vsel %vm1168_vm3, 1.0, %v4897_v18 }
 0x30b   :  { %2498 = vmatmul.msk.f32.gmra.mxu1 %vm4977_vm8, %v3544_v26  ;;  %5066 = vst [vmem:[#allocation51_spill] sm:$0xff] %v3564_v20  ;;  %v1132_v26 = vpop.permute.xlu1 %1131  ;;  %v1144_v61 = vpop.permute.xlu2 %1143 }
 0x30c   :  { %vm1172_vm2 = vcmp.eq.s32.totalorder %v3049_v37, %v1132_v26  ;;  %vm1176_vm11 = vcmp.eq.s32.totalorder %v3049_v37, %v1144_v61 }
 0x310   :  { %v3549_v32 = vpop.f32.mrf.mxu1 }
 0x311   :  { %v1570_v44 = vsel %vm4978_vm7, %v3549_v32, 0.0 }
 0x312   :  { %1571 = vadd.xlane.f32.xlu0 %v1570_v44 }
 0x313   :  { %2499 = vmatmul.msk.f32.gmra.mxu1 %vm4977_vm8, %v3554_v51  ;;  %v1129_v51 = vpop.permute.xlu0 %1128  ;;  %v1141_v53 = vpop.permute.xlu1 %1140 }
 0x314   :  { %vm1171_vm6 = vcmp.eq.s32.totalorder %v3049_v37, %v1129_v51  ;;  %vm1175_vm10 = vcmp.eq.s32.totalorder %v3049_v37, %v1141_v53  ;;  %v765_v43 = vpop.xlane.xlu2 %764 }
 0x315   :  { %vm799_vm12 = vcmp.gt.f32.partialorder %v765_v43, 0.0 }
 0x318   :  { %v3559_v0 = vpop.f32.mrf.mxu1 }
 0x319   :  { %5065 = vst [vmem:[#allocation50_spill] sm:$0xff] %v3559_v0  ;;  %v1573_v45 = vsel %vm4978_vm7, %v3559_v0, 0.0 }
 0x31a   :  { %1574 = vadd.xlane.f32.xlu1 %v1573_v45 }
 0x31b   :  { %2500 = vmatmul.msk.f32.gmra.mxu1 %vm4977_vm8, %v3564_v20  ;;  %v3584_v20 = vsel %vm1170_vm5, 1.0, %v4897_v18  ;;  %v1138_v62 = vpop.permute.xlu0 %1137  ;;  %v3676_v23 = vpop.xlane.xlu1 %746 }
 0x31c   :  { %5069 = vst [vmem:[#allocation54_spill] sm:$0xff] %v3584_v20  ;;  %vm1174_vm9 = vcmp.eq.s32.totalorder %v3049_v37, %v1138_v62  ;;  %v3727_v31 = vpop.xlane.xlu2 %773 }
 0x31d   :  { %5088 = vst [vmem:[#allocation73_spill] sm:$0xff] %v3676_v23 }
 0x31e   :  { %5098 = vst [vmem:[#allocation83_spill] sm:$0xff] %v3727_v31 }
 0x320   :  { %v3569_v44 = vpop.f32.mrf.mxu1 }
 0x321   :  { %v1576_v56 = vsel %vm4978_vm7, %v3569_v44, 0.0 }
 0x322   :  { %1577 = vadd.xlane.f32.xlu2 %v1576_v56 }
 0x323   :  { %2501 = vmatmul.msk.f32.gmra.mxu1 %vm4977_vm8, %v3574_v27  ;;  %v3594_v27 = vsel %vm1171_vm6, 1.0, %v4897_v18  ;;  %v3684_v3 = vpop.xlane.xlu1 %749  ;;  %v3729_v58 = vpop.xlane.xlu0 %761 }
 0x324   :  { %5071 = vst [vmem:[#allocation56_spill] sm:$0xff] %v3594_v27 }
 0x325   :  { %5090 = vst [vmem:[#allocation75_spill] sm:$0xff] %v3684_v3 }
 0x328   :  { %v3579_v45 = vpop.f32.mrf.mxu1 }
 0x329   :  { %5068 = vst [vmem:[#allocation53_spill] sm:$0xff] %v3579_v45  ;;  %v1579_v28 = vsel %vm4978_vm7, %v3579_v45, 0.0 }
 0x32a   :  { %1580 = vadd.xlane.f32.xlu0 %v1579_v28 }
 0x32b   :  { %2502 = vmatmul.msk.f32.gmra.mxu1 %vm4977_vm8, %v3584_v20  ;;  %v3604_v20 = vsel %vm1172_vm2, 1.0, %v4897_v18 }
 0x32c   :  { %5073 = vst [vmem:[#allocation58_spill] sm:$0xff] %v3604_v20 }
 0x32e   :  { %v3735_v9 = vpop.xlane.xlu2 %782 }
 0x330   :  { %v3589_v56 = vpop.f32.mrf.mxu1 }
 0x331   :  { %5070 = vst [vmem:[#allocation55_spill] sm:$0xff] %v3589_v56  ;;  %v1582_v49 = vsel %vm4978_vm7, %v3589_v56, 0.0 }
 0x332   :  { %1583 = vadd.xlane.f32.xlu1 %v1582_v49 }
 0x333   :  { %2503 = vmatmul.msk.f32.gmra.mxu1 %vm4977_vm8, %v3594_v27  ;;  %v3614_v27 = vsel %vm1173_vm0, 1.0, %v4897_v18 }
 0x334   :  { %5075 = vst [vmem:[#allocation60_spill] sm:$0xff] %v3614_v27 }
 0x338   :  { %v3599_v28 = vpop.f32.mrf.mxu1 }
 0x339   :  { %5072 = vst [vmem:[#allocation57_spill] sm:$0xff] %v3599_v28  ;;  %v1585_v51 = vsel %vm4978_vm7, %v3599_v28, 0.0 }
 0x33a   :  { %1586 = vadd.xlane.f32.xlu2 %v1585_v51 }
 0x33b   :  { %2504 = vmatmul.msk.f32.gmra.mxu1 %vm4977_vm8, %v3604_v20  ;;  %v3624_v20 = vsel %vm1174_vm9, 1.0, %v4897_v18 }
 0x33c   :  { %5077 = vst [vmem:[#allocation62_spill] sm:$0xff] %v3624_v20 }
 0x340   :  { %v3609_v49 = vpop.f32.mrf.mxu1 }
 0x341   :  { %5074 = vst [vmem:[#allocation59_spill] sm:$0xff] %v3609_v49  ;;  %v1588_v26 = vsel %vm4978_vm7, %v3609_v49, 0.0 }
 0x342   :  { %1589 = vadd.xlane.f32.xlu2 %v1588_v26 }
 0x343   :  { %2505 = vmatmul.msk.f32.gmra.mxu1 %vm4977_vm8, %v3614_v27  ;;  %v3634_v27 = vsel %vm1175_vm10, 1.0, %v4897_v18 }
 0x344   :  { %5078 = vst [vmem:[#allocation63_spill] sm:$0xff] %v3634_v27 }
 0x348   :  { %v3619_v51 = vpop.f32.mrf.mxu1 }
 0x349   :  { %5076 = vst [vmem:[#allocation61_spill] sm:$0xff] %v3619_v51  ;;  %v1591_v8 = vsel %vm4978_vm7, %v3619_v51, 0.0 }
 0x34a   :  { %1592 = vadd.xlane.f32.xlu2 %v1591_v8 }
 0x34b   :  { %2506 = vmatmul.msk.f32.gmra.mxu1 %vm4977_vm8, %v3624_v20  ;;  %v3644_v20 = vsel %vm1176_vm11, 1.0, %v4897_v18 }
 0x34c   :  { %5079 = vst [vmem:[#allocation64_spill] sm:$0xff] %v3644_v20 }
 0x350   :  { %v3629_v26 = vpop.f32.mrf.mxu1 }
 0x351   :  { %v1594_v62 = vsel %vm4978_vm7, %v3629_v26, 0.0 }
 0x352   :  { %1595 = vadd.xlane.f32.xlu2 %v1594_v62 }
 0x353   :  { %2507 = vmatmul.msk.f32.gmra.mxu1 %vm4977_vm8, %v3634_v27 }
 0x358   :  { %v3639_v8 = vpop.f32.mrf.mxu1 }
 0x359   :  { %v1597_v53 = vsel %vm4978_vm7, %v3639_v8, 0.0 }
 0x35a   :  { %1598 = vadd.xlane.f32.xlu2 %v1597_v53 }
 0x35b   :  { %2508 = vmatmul.msk.f32.gmra.mxu1 %vm4977_vm8, %v3644_v20 }
 0x360   :  { %v3648_v7 = vpop.f32.mrf.mxu1 }
 0x361   :  { %5080 = vst [vmem:[#allocation65_spill] sm:$0xff] %v3648_v7  ;;  %v1600_v24 = vsel %vm4978_vm7, %v3648_v7, 0.0 }
 0x368   :  { %v3650_v62 = vpop.f32.mrf.mxu1 }
 0x369   :  { %5081 = vst [vmem:[#allocation66_spill] sm:$0xff] %v3650_v62 }
 0x370   :  { %v3652_v27 = vpop.f32.mrf.mxu1 }
 0x371   :  { %5082 = vst [vmem:[#allocation67_spill] sm:$0xff] %v3652_v27 }
 0x378   :  { %v3654_v10 = vpop.f32.mrf.mxu1 }
 0x379   :  { %5083 = vst [vmem:[#allocation68_spill] sm:$0xff] %v3654_v10  ;;  %v1609_v29 = vsel %vm4978_vm7, %v3654_v10, 0.0 }
 0x380   :  { %v3656_v37 = vpop.f32.mrf.mxu1 }
 0x381   :  { %5084 = vst [vmem:[#allocation69_spill] sm:$0xff] %v3656_v37  ;;  %v1612_v60 = vsel %vm4978_vm7, %v3656_v37, 0.0 }
 0x388   :  { %v3658_v61 = vpop.f32.mrf.mxu1 }
 0x389   :  { %5085 = vst [vmem:[#allocation70_spill] sm:$0xff] %v3658_v61 }
 0x390   :  { %v3660_v55 = vpop.f32.mrf.mxu1 }
 0x391   :  { %v1618_v53 = vsel %vm4978_vm7, %v3660_v55, 0.0  ;;  %v1734_v36 = vsub.f32 %v3660_v55, %v3549_v32 }
 0x392   :  { %1619 = vadd.xlane.f32.xlu1 %v1618_v53 }
 0x398   :  { %v3664_v18 = vpop.f32.mrf.mxu1 }
 0x399   :  { %5086 = vst [vmem:[#allocation71_spill] sm:$0xff] %v3664_v18  ;;  %v1621_v20 = vsel %vm4978_vm7, %v3664_v18, 0.0 }
 0x39a   :  { %1622 = vadd.xlane.f32.xlu2 %v1621_v20  ;;  %v1564_v20 = vsel %vm4978_vm7, %v3531_v4, 0.0 }
 0x3a0   :  { %v3668_v6 = vpop.f32.mrf.mxu1 }
 0x3a1   :  { %v1624_v57 = vsel %vm4978_vm7, %v3668_v6, 0.0 }
 0x3a2   :  { %1625 = vadd.xlane.f32.xlu0 %v1624_v57 }
 0x3a8   :  { %v3672_v41 = vpop.f32.mrf.mxu1 }
 0x3a9   :  { %5087 = vst [vmem:[#allocation72_spill] sm:$0xff] %v3672_v41  ;;  %v1627_v38 = vsel %vm4978_vm7, %v3672_v41, 0.0 }
 0x3aa   :  { %1628 = vadd.xlane.f32.xlu1 %v1627_v38 }
 0x3b0   :  { %v3678_v53 = vpop.f32.mrf.mxu1 }
 0x3b1   :  { %5089 = vst [vmem:[#allocation74_spill] sm:$0xff] %v3678_v53  ;;  %v1630_v14 = vsel %vm4978_vm7, %v3678_v53, 0.0 }
 0x3b2   :  { %1631 = vadd.xlane.f32.xlu2 %v1630_v14  ;;  %1565 = vadd.xlane.f32.xlu1 %v1564_v20  ;;  %v3696_v14 = vpop.xlane.xlu1 %752  ;;  %v1558_v20 = vsel %vm4978_vm7, %v3515_v52, 0.0 }
 0x3b3   :  { %5093 = vst [vmem:[#allocation78_spill] sm:$0xff] %v3696_v14 }
 0x3b8   :  { %v3686_v57 = vpop.f32.mrf.mxu1 }
 0x3b9   :  { %5091 = vst [vmem:[#allocation76_spill] sm:$0xff] %v3686_v57  ;;  %v1633_v38 = vsel %vm4978_vm7, %v3686_v57, 0.0 }
 0x3ba   :  { %1613 = vadd.xlane.f32.xlu2 %v1612_v60  ;;  %1634 = vadd.xlane.f32.xlu0 %v1633_v38  ;;  %v1555_v60 = vsel %vm4978_vm7, %v3507_v46, 0.0  ;;  %v3712_v19 = vpop.xlane.xlu1 %755  ;;  %v3744_v46 = vpop.xlane.xlu2 %785 }
 0x3bb   :  { %1610 = vadd.xlane.f32.xlu1 %v1609_v29  ;;  %v1603_v29 = vsel %vm4978_vm7, %v3650_v62, 0.0  ;;  %5095 = vst [vmem:[#allocation80_spill] sm:$0xff] %v3712_v19 }
 0x3c0   :  { %v3694_v50 = vpop.f32.mrf.mxu1 }
 0x3c1   :  { %5092 = vst [vmem:[#allocation77_spill] sm:$0xff] %v3694_v50  ;;  %v1636_v42 = vsel %vm4978_vm7, %v3694_v50, 0.0 }
 0x3c2   :  { %1559 = vadd.xlane.f32.xlu2 %v1558_v20  ;;  %1637 = vadd.xlane.f32.xlu0 %v1636_v42 }
 0x3c3   :  { %1556 = vadd.xlane.f32.xlu1 %v1555_v60  ;;  %v3718_v60 = vpop.xlane.xlu1 %758 }
 0x3c4   :  { %5096 = vst [vmem:[#allocation81_spill] sm:$0xff] %v3718_v60 }
 0x3c8   :  { %v3704_v38 = vpop.f32.mrf.mxu1 }
 0x3c9   :  { %5094 = vst [vmem:[#allocation79_spill] sm:$0xff] %v3704_v38  ;;  %v1639_v35 = vsel %vm4978_vm7, %v3704_v38, 0.0 }
 0x3ca   :  { %1604 = vadd.xlane.f32.xlu2 %v1603_v29  ;;  %1640 = vadd.xlane.f32.xlu0 %v1639_v35 }
 0x3cb   :  { %1601 = vadd.xlane.f32.xlu1 %v1600_v24  ;;  %v3724_v29 = vpop.xlane.xlu1 %767  ;;  %v815_v24 = vsel %vm799_vm12, %v765_v43, 1.0 }
 0x3cc   :  { %5097 = vst [vmem:[#allocation82_spill] sm:$0xff] %v3724_v29  ;;  %2655 = vrsqrt.f32 %v815_v24  ;;  %vm891_vm15 = vweird.f32 %v815_v24 }
 0x3d0   :  { %v3714_v42 = vpop.f32.mrf.mxu1 }
 0x3d1   :  { %v1642_v20 = vsel %vm4978_vm7, %v3714_v42, 0.0 }
 0x3d2   :  { %1643 = vadd.xlane.f32.xlu0 %v1642_v20  ;;  %v1615_v20 = vsel %vm4978_vm7, %v3658_v61, 0.0  ;;  %v2656_v5 = vpop.eup %2655 }
 0x3d3   :  { %v3733_v63 = vpop.xlane.xlu1 %776  ;;  %v886_v13 = vmul.f32 %v2656_v5, %v815_v24  ;;  %vm892_vm14 = vweird.f32 %v2656_v5 }
 0x3d4   :  { %vm893_vm1 = vmor %vm891_vm15, %vm892_vm14  ;;  %vm4983_vm14 = vcmp.gt.f32.partialorder %v3684_v3, 0.0  ;;  %vm4984_vm15 = vcmp.gt.f32.partialorder %v3696_v14, 0.0 }
 0x3d5   :  { %v887_v16 = vmul.f32 %v2656_v5, %v886_v13  ;;  %v3752_v13 = vpop.xlane.xlu2 %1568 }
 0x3d6   :  { %5100 = vst [vmem:[#allocation85_spill] sm:$0xff] %v3752_v13 }
 0x3d7   :  { %v888_v22 = vmul.f32 0.5, %v887_v16 }
 0x3d8   :  { %v3720_v40 = vpop.f32.mrf.mxu1 }
 0x3d9   :  { %v1645_v35 = vsel %vm4978_vm7, %v3720_v40, 0.0 }
 0x3da   :  { %1646 = vadd.xlane.f32.xlu0 %v1645_v35  ;;  %v771_v35 = vpop.xlane.xlu0 %770 }
 0x3db   :  { %vm801_vm13 = vcmp.gt.f32.partialorder %v771_v35, 0.0  ;;  %v3739_v7 = vpop.xlane.xlu1 %788 }
 0x3dc   :  { %v817_v62 = vsel %vm801_vm13, %v771_v35, 1.0 }
 0x3dd   :  { %2657 = vrsqrt.f32 %v817_v62  ;;  %v1578_v25 = vpop.xlane.xlu2 %1577  ;;  %vm911_vm2 = vweird.f32 %v817_v62 }
 0x3de   :  { %vm1656_vm9 = vcmp.ne.f32.partialorder %v1578_v25, 0.0 }
 0x3e2   :  { %1616 = vadd.xlane.f32.xlu0 %v1615_v20  ;;  %v1606_v20 = vsel %vm4978_vm7, %v3652_v27, 0.0  ;;  %v3746_v52 = vpop.xlane.xlu0 %779 }
 0x3e3   :  { %v3748_v30 = vpop.xlane.xlu1 %1574  ;;  %v2658_v10 = vpop.eup %2657 }
 0x3e4   :  { %5099 = vst [vmem:[#allocation84_spill] sm:$0xff] %v3748_v30  ;;  %v906_v27 = vmul.f32 %v2658_v10, %v817_v62  ;;  %vm912_vm6 = vweird.f32 %v2658_v10 }
 0x3e5   :  { %vm913_vm0 = vmor %vm911_vm2, %vm912_vm6  ;;  %vm805_vm2 = vcmp.gt.f32.partialorder %v3735_v9, 0.0 }
 0x3e6   :  { %v907_v4 = vmul.f32 %v2658_v10, %v906_v27 }
 0x3e8   :  { %v908_v18 = vmul.f32 0.5, %v907_v4 }
 0x3ea   :  { %1562 = vadd.xlane.f32.xlu0 %v1561_v11  ;;  %v889_v11 = vsub.f32 1.5, %v888_v22  ;;  %v3754_v37 = vpop.xlane.xlu0 %791  ;;  %v909_v24 = vsub.f32 1.5, %v908_v18  ;;  %v1736_v18 = vsub.f32 %v3668_v6, %v3569_v44  ;;  %v3810_v44 = vsel %vm4984_vm15, %v3696_v14, 1.0 }
 0x3eb   :  { %5112 = vst [vmem:[#allocation96_spill] sm:$0xff] %v3810_v44  ;;  %vm808_vm6 = vcmp.gt.f32.partialorder %v3754_v37, 0.0 }
 0x3ec   :  { %v890_v39 = vmul.f32 %v2656_v5, %v889_v11  ;;  %v910_v4 = vmul.f32 %v2658_v10, %v909_v24 }
 0x3ee   :  { %v894_v16 = vsel %vm893_vm1, %v2656_v5, %v890_v39  ;;  %v5103_v5 = vmov 0.0   ;;  %v3768_v39 = vpop.xlane.xlu2 %1586  ;;  %vm4985_vm1 = vcmp.gt.f32.partialorder %v3712_v19, 0.0 }
 0x3ef   :  { %v991_v22 = vsel %vm799_vm12, %v894_v16, 0.0  ;;  %5105 = vst [vmem:[#allocation89_spill] sm:$0xff] %v3768_v39  ;;  %vm798_vm12 = vcmp.gt.f32.partialorder %v3729_v58, 0.0  ;;  %v3818_v35 = vsel %vm4985_vm1, %v3712_v19, 1.0 }
 0x3f0   :  { %v3793_v25 = vsel %vm798_vm12, %v3729_v58, 1.0  ;;  %5113 = vst [vmem:[#allocation97_spill] sm:$0xff] %v3818_v35 }
 0x3f1   :  { %2659 = vrsqrt.f32 %v3793_v25  ;;  %vm881_vm7 = vweird.f32 %v3793_v25 }
 0x3f2   :  { %1607 = vadd.xlane.f32.xlu0 %v1606_v20  ;;  %v3756_v20 = vpop.xlane.xlu1 %1583  ;;  %v1572_v0 = vpop.xlane.xlu0 %1571 }
 0x3f3   :  { %5101 = vst [vmem:[#allocation86_spill] sm:$0xff] %v3756_v20  ;;  %vm1654_vm3 = vcmp.ne.f32.partialorder %v1572_v0, 0.0 }
 0x3fa   :  { %1553 = vadd.xlane.f32.xlu0 %v1552_v59  ;;  %v3762_v59 = vmul.f32 %v991_v22, %v3373_v34  ;;  %v3770_v55 = vpop.xlane.xlu0 %1580  ;;  %v914_v34 = vsel %vm913_vm0, %v2658_v10, %v910_v4  ;;  %v3804_v10 = vsel %vm4983_vm14, %v3684_v3, 1.0  ;;  %vm4991_vm0 = vcmp.gt.f32.partialorder %v3739_v7, 0.0 }
 0x3fb   :  { %5106 = vst [vmem:[#allocation90_spill] sm:$0xff] %v3770_v55  ;;  %v993_v32 = vsel %vm801_vm13, %v914_v34, 0.0  ;;  %vm4981_vm13 = vcmp.gt.f32.partialorder %v3676_v23, 0.0  ;;  %v3847_v4 = vsel %vm808_vm6, %v3754_v37, 1.0  ;;  %v3849_v34 = vpop.eup %2659 }
 0x3fc   :  { %5102 = vst [vmem:[#allocation87_spill] sm:$0xff] %v3762_v59  ;;  %v1750_v30 = vmul.f32 %v1734_v36, %v3762_v59  ;;  %v3775_v36 = vpop.xlane.xlu2 %1589  ;;  %v3778_v0 = vmul.f32 %v993_v32, %v3397_v1  ;;  %v3798_v1 = vsel %vm4981_vm13, %v3676_v23, 1.0  ;;  %v3855_v32 = vsel %vm805_vm2, %v3735_v9, 1.0 }
 0x3fd   :  { %5107 = vst [vmem:[#allocation91_spill] sm:$0xff] %v3775_v36  ;;  %2661 = vrsqrt.f32 %v3798_v1  ;;  %v876_v23 = vmul.f32 %v3849_v34, %v3793_v25  ;;  %vm882_vm8 = vweird.f32 %v3849_v34 }
 0x3fe   :  { %5108 = vst [vmem:[#allocation92_spill] sm:$0xff] %v3778_v0  ;;  %v1752_v16 = vmul.f32 %v1736_v18, %v3778_v0  ;;  %2663 = vrsqrt.f32 %v3804_v10  ;;  %vm3977_vm13 = vmor %vm881_vm7, %vm882_vm8 }
 0x3ff   :  { %5110 = vst [vmem:[#allocation94_spill] sm:$0xff] %v3798_v1  ;;  %2665 = vrsqrt.f32 %v3810_v44  ;;  %v877_v41 = vmul.f32 %v3849_v34, %v876_v23 }
 0x400   :  { %5111 = vst [vmem:[#allocation95_spill] sm:$0xff] %v3804_v10  ;;  %2667 = vrsqrt.f32 %v3818_v35 }
 0x401   :  { %v878_v20 = vmul.f32 0.5, %v877_v41 }
 0x404   :  { %v3787_v6 = vpop.xlane.xlu2 %1592 }
 0x405   :  { %v1620_v11 = vpop.xlane.xlu1 %1619 }
 0x406   :  { %vm1670_vm4 = vcmp.ne.f32.partialorder %v1620_v11, 0.0 }
 0x407   :  { %vm1686_vm5 = vmor %vm1654_vm3, %vm1670_vm4  ;;  %vm4987_vm3 = vcmp.gt.f32.partialorder %v3724_v29, 0.0  ;;  %vm4988_vm4 = vcmp.gt.f32.partialorder %v3727_v31, 0.0 }
 0x408   :  { %v2515_v27 = vsel %vm1686_vm5, 1.0, %v5103_v5  ;;  %vm803_vm5 = vcmp.gt.f32.partialorder %v3733_v63, 0.0  ;;  %v3825_v11 = vsel %vm4987_vm3, %v3724_v29, 1.0  ;;  %v3832_v24 = vsel %vm4988_vm4, %v3727_v31, 1.0 }
 0x409   :  { %v3766_v43 = vmul.f32 %v2515_v27, %v1750_v30  ;;  %v3839_v27 = vsel %vm803_vm5, %v3733_v63, 1.0  ;;  %2669 = vrsqrt.f32 %v3825_v11  ;;  %vm901_vm7 = vweird.f32 %v3825_v11 }
 0x40a   :  { %2671 = vrsqrt.f32 %v3832_v24  ;;  %vm921_vm1 = vweird.f32 %v3832_v24  ;;  %v1742_v63 = vsub.f32 %v3714_v42, %v3629_v26  ;;  %v5143_v26 = vld [vmem:[#allocation33_spill] sm:$0xff] }
 0x40b   :  { %5104 = vst [vmem:[#allocation88_spill] sm:$0xff] %v3766_v43  ;;  %2673 = vrsqrt.f32 %v3839_v27 }
 0x40c   :  { %v3858_v18 = vpop.xlane.xlu2 %1595  ;;  %2675 = vrsqrt.f32 %v3847_v4 }
 0x40d   :  { %2677 = vrsqrt.f32 %v3855_v32 }
 0x414   :  { %v3917_v56 = vpop.xlane.xlu2 %1598 }
 0x415   :  { %v1626_v30 = vpop.xlane.xlu0 %1625 }
 0x416   :  { %vm1672_vm10 = vcmp.ne.f32.partialorder %v1626_v30, 0.0  ;;  %v3860_v30 = vpop.eup %2661 }
 0x417   :  { %vm1688_vm11 = vmor %vm1656_vm9, %vm1672_vm10  ;;  %vm4990_vm9 = vcmp.gt.f32.partialorder %v3746_v52, 0.0  ;;  %vm4989_vm10 = vcmp.gt.f32.partialorder %v3744_v46, 0.0  ;;  %5114 = vst [vmem:[#allocation98_spill] sm:$0xff] %v3860_v30 }
 0x418   :  { %v2517_v62 = vsel %vm1688_vm11, 1.0, %v5103_v5  ;;  %vm4986_vm11 = vcmp.gt.f32.partialorder %v3718_v60, 0.0  ;;  %v3874_v0 = vsel %vm4990_vm9, %v3746_v52, 1.0  ;;  %v3885_v3 = vsel %vm4989_vm10, %v3744_v46, 1.0 }
 0x419   :  { %v3782_v22 = vmul.f32 %v2517_v62, %v1752_v16  ;;  %v3867_v16 = vsel %vm4991_vm0, %v3739_v7, 1.0  ;;  %v3869_v62 = vpop.eup %2663  ;;  %v3892_v14 = vsel %vm4986_vm11, %v3718_v60, 1.0 }
 0x41a   :  { %5115 = vst [vmem:[#allocation99_spill] sm:$0xff] %v3869_v62  ;;  %v3877_v59 = vpop.eup %2665  ;;  %2679 = vrsqrt.f32 %v3867_v16  ;;  %v836_v13 = vmul.f32 %v3869_v62, %v3804_v10  ;;  %vm971_vm0 = vweird.f32 %v3867_v16 }
 0x41b   :  { %5109 = vst [vmem:[#allocation93_spill] sm:$0xff] %v3782_v22  ;;  %v3887_v43 = vpop.eup %2667  ;;  %2681 = vrsqrt.f32 %v3874_v0  ;;  %v846_v53 = vmul.f32 %v3877_v59, %v3810_v44  ;;  %v826_v44 = vmul.f32 %v3860_v30, %v3798_v1 }
 0x41c   :  { %5116 = vst [vmem:[#allocation100_spill] sm:$0xff] %v3877_v59  ;;  %v3895_v19 = vpop.eup %2669  ;;  %2683 = vrsqrt.f32 %v3885_v3  ;;  %v837_v28 = vmul.f32 %v3869_v62, %v836_v13  ;;  %v856_v50 = vmul.f32 %v3887_v43, %v3818_v35  ;;  %v879_v13 = vsub.f32 1.5, %v878_v20  ;;  %v3964_v2 = vpop.xlane.xlu2 %1622 }
 0x41d   :  { %5117 = vst [vmem:[#allocation101_spill] sm:$0xff] %v3892_v14  ;;  %v3900_v29 = vpop.eup %2671  ;;  %2685 = vrsqrt.f32 %v3892_v14  ;;  %v896_v31 = vmul.f32 %v3895_v19, %v3825_v11  ;;  %v847_v15 = vmul.f32 %v3877_v59, %v846_v53  ;;  %v827_v35 = vmul.f32 %v3860_v30, %v826_v44 }
 0x41e   :  { %v3903_v12 = vpop.eup %2673  ;;  %v916_v49 = vmul.f32 %v3900_v29, %v3832_v24  ;;  %v857_v51 = vmul.f32 %v3887_v43, %v856_v50  ;;  %5119 = vst [vmem:[#allocation103_spill] sm:$0xff] %v3964_v2  ;;  %vm902_vm14 = vweird.f32 %v3895_v19  ;;  %vm922_vm8 = vweird.f32 %v3900_v29  ;;  %v5150_v24 = vld [vmem:[#allocation59_spill] sm:$0xff] }
 0x41f   :  { %v3907_v60 = vpop.eup %2675  ;;  %v926_v10 = vmul.f32 %v3903_v12, %v3839_v27  ;;  %v897_v53 = vmul.f32 %v3895_v19, %v896_v31  ;;  %v3959_v38 = vmul.f32 0.5, %v847_v15  ;;  %v880_v31 = vmul.f32 %v3849_v34, %v879_v13  ;;  %vm3996_vm15 = vmor %vm901_vm7, %vm902_vm14 }
 0x420   :  { %v3909_v45 = vpop.eup %2677  ;;  %v976_v23 = vmul.f32 %v3907_v60, %v3847_v4  ;;  %vm982_vm11 = vweird.f32 %v3907_v60  ;;  %vm931_vm14 = vweird.f32 %v3839_v27 }
 0x421   :  { %v3913_v21 = vpop.eup %2679  ;;  %v946_v41 = vmul.f32 %v3909_v45, %v3855_v32  ;;  %v927_v59 = vmul.f32 %v3903_v12, %v926_v10  ;;  %v849_v13 = vsub.f32 1.5, %v3959_v38  ;;  %vm952_vm7 = vweird.f32 %v3909_v45 }
 0x422   :  { %v3919_v55 = vpop.eup %2681  ;;  %v966_v39 = vmul.f32 %v3913_v21, %v3867_v16  ;;  %v977_v54 = vmul.f32 %v3907_v60, %v976_v23  ;;  %v917_v23 = vmul.f32 %v3900_v29, %v916_v49  ;;  %vm972_vm4 = vweird.f32 %v3913_v21 }
 0x423   :  { %v3923_v33 = vpop.eup %2683  ;;  %v936_v1 = vmul.f32 %v3919_v55, %v3874_v0  ;;  %v947_v36 = vmul.f32 %v3909_v45, %v946_v41  ;;  %v928_v15 = vmul.f32 0.5, %v927_v59  ;;  %v3970_v41 = vmul.f32 0.5, %v827_v35 }
 0x424   :  { %v3929_v57 = vpop.eup %2685  ;;  %v956_v62 = vmul.f32 %v3923_v33, %v3885_v3  ;;  %v967_v20 = vmul.f32 %v3913_v21, %v966_v39  ;;  %v978_v10 = vmul.f32 0.5, %v977_v54  ;;  %v898_v39 = vmul.f32 0.5, %v897_v53 }
 0x425   :  { %v866_v5 = vmul.f32 %v3929_v57, %v3892_v14  ;;  %v937_v14 = vmul.f32 %v3919_v55, %v936_v1  ;;  %v948_v50 = vmul.f32 0.5, %v947_v36  ;;  %v918_v54 = vmul.f32 0.5, %v917_v23 }
 0x426   :  { %v968_v49 = vmul.f32 0.5, %v967_v20  ;;  %v884_v59 = vsel %vm3977_vm13, %v3849_v34, %v880_v31  ;;  %v979_v25 = vsub.f32 1.5, %v978_v10  ;;  %v899_v53 = vsub.f32 1.5, %v898_v39  ;;  %v3994_v34 = vpop.xlane.xlu2 %1631  ;;  %v4003_v10 = vpop.xlane.xlu1 %1628 }
 0x427   :  { %v867_v44 = vmul.f32 %v3929_v57, %v866_v5  ;;  %v938_v5 = vmul.f32 0.5, %v937_v14  ;;  %v929_v20 = vsub.f32 1.5, %v928_v15  ;;  %v949_v23 = vsub.f32 1.5, %v948_v50 }
 0x428   :  { %v969_v14 = vsub.f32 1.5, %v968_v49  ;;  %v919_v30 = vsub.f32 1.5, %v918_v54  ;;  %vm932_vm13 = vweird.f32 %v3903_v12  ;;  %v4006_v58 = vmul.f32 %v3895_v19, %v899_v53 }
 0x429   :  { %v3986_v35 = vmul.f32 0.5, %v867_v44  ;;  %v939_v2 = vsub.f32 1.5, %v938_v5  ;;  %v930_v39 = vmul.f32 %v3903_v12, %v929_v20  ;;  %vm4017_vm3 = vmor %vm931_vm14, %vm932_vm13  ;;  %v950_v15 = vmul.f32 %v3909_v45, %v949_v23  ;;  %v5154_v5 = vld [vmem:[#allocation47_spill] sm:$0xff] }
 0x42a   :  { %v970_v50 = vmul.f32 %v3913_v21, %v969_v14  ;;  %v4026_v54 = vmul.f32 %v3900_v29, %v919_v30  ;;  %vm951_vm13 = vweird.f32 %v3855_v32  ;;  %vm962_vm9 = vweird.f32 %v3923_v33  ;;  %v5161_v23 = vld [vmem:[#allocation83_spill] sm:$0xff] }
 0x42b   :  { %v940_v27 = vmul.f32 %v3919_v55, %v939_v2  ;;  %vm4037_vm10 = vmor %vm951_vm13, %vm952_vm7  ;;  %v934_v16 = vsel %vm4017_vm3, %v3903_v12, %v930_v39  ;;  %vm961_vm13 = vweird.f32 %v3885_v3  ;;  %v904_v20 = vsel %vm3996_vm15, %v3895_v19, %v4006_v58  ;;  %v5146_v2 = vld [vmem:[#allocation91_spill] sm:$0xff] }
 0x42c   :  { %vm4055_vm7 = vmor %vm971_vm0, %vm972_vm4  ;;  %v995_v14 = vsel %vm803_vm5, %v934_v16, 0.0  ;;  %v5157_v16 = vld [vmem:[#allocation57_spill] sm:$0xff] }
 0x42d   :  { %v3898_v22 = vpop.xlane.xlu0 %1634  ;;  %vm4082_vm3 = vmor %vm961_vm13, %vm962_vm9  ;;  %vm1662_vm9 = vcmp.ne.f32.partialorder %v3858_v18, 0.0  ;;  %vm1660_vm13 = vcmp.ne.f32.partialorder %v5146_v2, 0.0 }
 0x42e   :  { %5118 = vst [vmem:[#allocation102_spill] sm:$0xff] %v3898_v22  ;;  %v3955_v22 = vmul.f32 0.5, %v837_v28  ;;  %v957_v28 = vmul.f32 %v3923_v33, %v956_v62  ;;  %v3981_v62 = vmul.f32 0.5, %v857_v51  ;;  %v990_v51 = vsel %vm798_vm12, %v884_v59, 0.0  ;;  %vm4010_vm12 = vmor %vm921_vm1, %vm922_vm8  ;;  %v4115_v9 = vpop.xlane.xlu1 %1565  ;;  %v5155_v59 = vld [vmem:[#allocation70_spill] sm:$0xff] }
 0x42f   :  { %vm981_vm1 = vweird.f32 %v3847_v4  ;;  %vm942_vm8 = vweird.f32 %v3919_v55 }
 0x430   :  { %v958_v36 = vmul.f32 0.5, %v957_v28  ;;  %v980_v28 = vmul.f32 %v3907_v60, %v979_v25  ;;  %vm4033_vm14 = vmor %vm981_vm1, %vm982_vm11  ;;  %v859_v30 = vsub.f32 1.5, %v3981_v62  ;;  %v4050_v25 = vmul.f32 %v990_v51, %v3361_v48  ;;  %v5187_v62 = vld [vmem:[#allocation100_spill] sm:$0xff] }
 0x431   :  { %vm941_vm11 = vweird.f32 %v3874_v0  ;;  %v954_v48 = vsel %vm4037_vm10, %v3909_v45, %v950_v15  ;;  %v974_v0 = vsel %vm4055_vm7, %v3913_v21, %v970_v50  ;;  %v924_v21 = vsel %vm4010_vm12, %v3900_v29, %v4026_v54  ;;  %v4105_v29 = vpop.xlane.xlu2 %1613  ;;  %v5151_v15 = vld [vmem:[#allocation77_spill] sm:$0xff] }
 0x432   :  { %v959_v11 = vsub.f32 1.5, %v958_v36  ;;  %v984_v32 = vsel %vm4033_vm14, %v3907_v60, %v980_v28  ;;  %v869_v36 = vsub.f32 1.5, %v3986_v35  ;;  %vm4062_vm1 = vmor %vm941_vm11, %vm942_vm8  ;;  %v997_v37 = vsel %vm805_vm2, %v954_v48, 0.0  ;;  %v5178_v35 = vld [vmem:[#allocation101_spill] sm:$0xff] }
 0x433   :  { %v944_v12 = vsel %vm4062_vm1, %v3919_v55, %v940_v27  ;;  %v1000_v3 = vsel %vm808_vm6, %v984_v32, 0.0  ;;  %v1743_v55 = vsub.f32 %v3720_v40, %v3639_v8  ;;  %vm5138_vm6 = vcmp.gt.f32.partialorder %v3739_v7, 0.0  ;;  %v5156_v32 = vld [vmem:[#allocation89_spill] sm:$0xff] }
 0x434   :  { %v960_v4 = vmul.f32 %v3923_v33, %v959_v11  ;;  %v999_v51 = vsel %vm5138_vm6, %v974_v0, 0.0  ;;  %vm5139_vm10 = vcmp.gt.f32.partialorder %v3746_v52, 0.0  ;;  %v4110_v40 = vmul.f32 %v1000_v3, %v3481_v17  ;;  %v5182_v0 = vld [vmem:[#allocation50_spill] sm:$0xff] }
 0x435   :  { %v3938_v61 = vpop.xlane.xlu0 %1637  ;;  %vm1661_vm12 = vcmp.ne.f32.partialorder %v3787_v6, 0.0  ;;  %vm5140_vm2 = vcmp.gt.f32.partialorder %v3744_v46, 0.0  ;;  %vm1663_vm8 = vcmp.ne.f32.partialorder %v3917_v56, 0.0  ;;  %v4129_v52 = vmul.f32 %v997_v37, %v3445_v47  ;;  %v5144_v6 = vld [vmem:[#allocation61_spill] sm:$0xff]  ;;  %v5145_v46 = vld [vmem:[#allocation79_spill] sm:$0xff]  ;;  %v5164_v37 = vld [vmem:[#allocation86_spill] sm:$0xff] }
 0x436   :  { %v964_v45 = vsel %vm4082_vm3, %v3923_v33, %v960_v4  ;;  %v996_v33 = vsel %vm5139_vm10, %v944_v12, 0.0  ;;  %vm1676_vm14 = vcmp.ne.f32.partialorder %v3938_v61, 0.0  ;;  %v4132_v42 = vmul.f32 %v999_v51, %v5143_v26  ;;  %v5149_v47 = vld [vmem:[#allocation31_spill] sm:$0xff]  ;;  %v5158_v61 = vld [vmem:[#allocation76_spill] sm:$0xff] }
 0x437   :  { %v998_v8 = vsel %vm5140_vm2, %v964_v45, 0.0  ;;  %v1741_v18 = vsub.f32 %v5145_v46, %v5144_v6  ;;  %v1759_v56 = vmul.f32 %v1743_v55, %v4110_v40  ;;  %v5148_v11 = vmov 0.0   ;;  %v5163_v45 = vld [vmem:[#allocation28_spill] sm:$0xff]  ;;  %v5170_v46 = vld [vmem:[#allocation26_spill] sm:$0xff] }
 0x438   :  { %v4143_v39 = vmul.f32 %v998_v8, %v5149_v47  ;;  %v1740_v50 = vsub.f32 %v5151_v15, %v5150_v24  ;;  %v1733_v4 = vsub.f32 %v5155_v59, %v5154_v5  ;;  %vm1659_vm6 = vcmp.ne.f32.partialorder %v5156_v32, 0.0  ;;  %v5167_v8 = vld [vmem:[#allocation74_spill] sm:$0xff]  ;;  %v4210_v15 = vpop.xlane.xlu1 %1610  ;;  %v5177_v5 = vld [vmem:[#allocation24_spill] sm:$0xff] }
 0x439   :  { %vm862_vm10 = vweird.f32 %v3887_v43  ;;  %v1739_v60 = vsub.f32 %v5158_v61, %v5157_v16  ;;  %vm5162_vm2 = vcmp.gt.f32.partialorder %v5161_v23, 0.0  ;;  %v4175_v55 = vmul.f32 %v996_v33, %v5163_v45  ;;  %v5181_v61 = vld [vmem:[#allocation84_spill] sm:$0xff] }
 0x43a   :  { %v1757_v48 = vmul.f32 %v1741_v18, %v4143_v39  ;;  %v994_v3 = vsel %vm5162_vm2, %v924_v21, 0.0  ;;  %v1756_v26 = vmul.f32 %v1740_v50, %v4129_v52  ;;  %v4192_v18 = vmul.f32 %v995_v14, %v5170_v46  ;;  %v5175_v14 = vld [vmem:[#allocation72_spill] sm:$0xff] }
 0x43b   :  { %v1755_v24 = vmul.f32 %v1739_v60, %v4175_v55  ;;  %v870_v50 = vmul.f32 %v3929_v57, %v869_v36  ;;  %v4221_v59 = vmul.f32 %v994_v3, %v5177_v5  ;;  %v5179_v36 = vld [vmem:[#allocation82_spill] sm:$0xff]  ;;  %vm852_vm2 = vweird.f32 %v5187_v62 }
 0x43c   :  { %v5186_v3 = vld [vmem:[#allocation98_spill] sm:$0xff]  ;;  %v5198_v21 = vsub.f32 1.5, %v3955_v22  ;;  %v5202_v22 = vld [vmem:[#allocation81_spill] sm:$0xff] }
 0x43d   :  { %v3973_v1 = vpop.xlane.xlu0 %1640 }
 0x43e   :  { %vm1677_vm0 = vcmp.ne.f32.partialorder %v3973_v1, 0.0  ;;  %v5147_v1 = vld [vmem:[#allocation102_spill] sm:$0xff] }
 0x43f   :  { %vm4124_vm11 = vmor %vm1661_vm12, %vm1677_vm0  ;;  %vm1675_vm3 = vcmp.ne.f32.partialorder %v5147_v1, 0.0  ;;  %vm1673_vm12 = vcmp.ne.f32.partialorder %v4003_v10, 0.0  ;;  %v4204_v1 = vpop.xlane.xlu2 %1559 }
 0x440   :  { %vm4150_vm0 = vmor %vm1660_vm13, %vm1676_vm14  ;;  %v2522_v53 = vsel %vm4124_vm11, 1.0, %v5148_v11 }
 0x441   :  { %v2521_v51 = vsel %vm4150_vm0, 1.0, %v5148_v11  ;;  %v1773_v33 = vmul.f32 %v2522_v53, %v1757_v48  ;;  %v860_v48 = vmul.f32 %v3887_v43, %v859_v30  ;;  %v5188_v30 = vld [vmem:[#allocation97_spill] sm:$0xff] }
 0x442   :  { %v1772_v10 = vmul.f32 %v2521_v51, %v1756_v26  ;;  %v5191_v51 = vld [vmem:[#allocation21_spill] sm:$0xff]  ;;  %v5193_v26 = vld [vmem:[#allocation99_spill] sm:$0xff] }
 0x445   :  { %v1644_v49 = vpop.xlane.xlu0 %1643 }
 0x446   :  { %vm1678_vm4 = vcmp.ne.f32.partialorder %v1644_v49, 0.0  ;;  %v1758_v49 = vmul.f32 %v1742_v63, %v4132_v42  ;;  %v5165_v63 = vld [vmem:[#allocation90_spill] sm:$0xff] }
 0x447   :  { %vm1694_vm5 = vmor %vm1662_vm9, %vm1678_vm4  ;;  %vm872_vm4 = vweird.f32 %v3929_v57  ;;  %vm1674_vm9 = vcmp.ne.f32.partialorder %v3994_v34, 0.0  ;;  %vm1657_vm14 = vcmp.ne.f32.partialorder %v5165_v63, 0.0 }
 0x448   :  { %v2523_v28 = vsel %vm1694_vm5, 1.0, %v5148_v11  ;;  %vm4168_vm5 = vmor %vm1659_vm6, %vm1675_vm3  ;;  %vm871_vm6 = vweird.f32 %v5178_v35  ;;  %v5213_v35 = vld [vmem:[#allocation43_spill] sm:$0xff] }
 0x449   :  { %v1774_v12 = vmul.f32 %v2523_v28, %v1758_v49  ;;  %v2520_v34 = vsel %vm4168_vm5, 1.0, %v5148_v11  ;;  %v1749_v28 = vmul.f32 %v1733_v4, %v4050_v25  ;;  %v5176_v49 = vld [vmem:[#allocation103_spill] sm:$0xff]  ;;  %vm832_vm5 = vweird.f32 %v5186_v3 }
 0x44a   :  { %vm1671_vm0 = vcmp.ne.f32.partialorder %v5176_v49, 0.0  ;;  %v1771_v32 = vmul.f32 %v2520_v34, %v1755_v24  ;;  %v5206_v24 = vld [vmem:[#allocation69_spill] sm:$0xff]  ;;  %v1557_v49 = vpop.xlane.xlu1 %1556 }
 0x44d   :  { %v1647_v7 = vpop.xlane.xlu0 %1646 }
 0x44e   :  { %vm1679_vm7 = vcmp.ne.f32.partialorder %v1647_v7, 0.0  ;;  %v5166_v7 = vld [vmem:[#allocation55_spill] sm:$0xff] }
 0x44f   :  { %vm1695_vm1 = vmor %vm1663_vm8, %vm1679_vm7  ;;  %vm1658_vm8 = vcmp.ne.f32.partialorder %v5164_v37, 0.0  ;;  %v1738_v17 = vsub.f32 %v5167_v8, %v5166_v7  ;;  %v850_v37 = vmul.f32 %v5187_v62, %v849_v13 }
 0x450   :  { %v2524_v44 = vsel %vm1695_vm1, 1.0, %v5148_v11  ;;  %vm4187_vm11 = vmor %vm1658_vm8, %vm1674_vm9  ;;  %vm5180_vm9 = vcmp.gt.f32.partialorder %v5179_v36, 0.0  ;;  %vm861_vm8 = vweird.f32 %v5188_v30  ;;  %v5214_v36 = vld [vmem:[#allocation68_spill] sm:$0xff]  ;;  %v5221_v30 = vld [vmem:[#allocation75_spill] sm:$0xff] }
 0x451   :  { %v1775_v27 = vmul.f32 %v2524_v44, %v1759_v56  ;;  %v5171_v56 = vld [vmem:[#allocation85_spill] sm:$0xff]  ;;  %vm4197_vm1 = vmor %vm1657_vm14, %vm1673_vm12  ;;  %v2519_v54 = vsel %vm4187_vm11, 1.0, %v5148_v11  ;;  %v1754_v4 = vmul.f32 %v1738_v17, %v4192_v18  ;;  %v992_v16 = vsel %vm5180_vm9, %v904_v20, 0.0  ;;  %v5192_v17 = vld [vmem:[#allocation94_spill] sm:$0xff] }
 0x452   :  { %vm1653_vm7 = vcmp.ne.f32.partialorder %v5171_v56, 0.0  ;;  %v5174_v44 = vld [vmem:[#allocation53_spill] sm:$0xff]  ;;  %vm1655_vm12 = vcmp.ne.f32.partialorder %v5181_v61, 0.0  ;;  %v2518_v60 = vsel %vm4197_vm1, 1.0, %v5148_v11  ;;  %v829_v20 = vsub.f32 1.5, %v3970_v41  ;;  %vm4256_vm14 = vmor %vm871_vm6, %vm872_vm4 }
 0x453   :  { %1776 = vmatpush.msrb.mxu0 %v1775_v27  ;;  %v1737_v47 = vsub.f32 %v5175_v14, %v5174_v44  ;;  %vm4246_vm15 = vmor %vm1655_vm12, %vm1671_vm0  ;;  %v1770_v58 = vmul.f32 %v2519_v54, %v1754_v4  ;;  %v874_v41 = vsel %vm4256_vm14, %v3929_v57, %v870_v50  ;;  %v4267_v63 = vmul.f32 %v992_v16, %v5191_v51  ;;  %v1605_v44 = vpop.xlane.xlu2 %1604  ;;  %v5204_v14 = vld [vmem:[#allocation95_spill] sm:$0xff]  ;;  %v5207_v54 = vld [vmem:[#allocation93_spill] sm:$0xff] }
 0x454   :  { %vm831_vm11 = vweird.f32 %v5192_v17  ;;  %vm842_vm4 = vweird.f32 %v5193_v26  ;;  %v2516_v57 = vsel %vm4246_vm15, 1.0, %v5148_v11  ;;  %vm1668_vm1 = vcmp.ne.f32.partialorder %v4105_v29, 0.0  ;;  %v5212_v29 = vld [vmem:[#allocation17_spill] sm:$0xff]  ;;  %v5224_v51 = vld [vmem:[#allocation39_spill] sm:$0xff] }
 0x455   :  { %v1617_v6 = vpop.xlane.xlu0 %1616  ;;  %1777 = vmatpush.msrb.mxu0 %v1774_v12  ;;  %v5183_v12 = vld [vmem:[#allocation71_spill] sm:$0xff]  ;;  %v1753_v31 = vmul.f32 %v1737_v47, %v4221_v59  ;;  %v830_v2 = vmul.f32 %v5186_v3, %v829_v20  ;;  %vm5203_vm0 = vcmp.gt.f32.partialorder %v5202_v22, 0.0  ;;  %vm1652_vm6 = vcmp.ne.f32.partialorder %v4115_v9, 0.0  ;;  %v5205_v47 = vld [vmem:[#allocation45_spill] sm:$0xff] }
 0x456   :  { %vm1669_vm13 = vcmp.ne.f32.partialorder %v1617_v6, 0.0  ;;  %v1735_v23 = vsub.f32 %v5183_v12, %v5182_v0  ;;  %v5199_v6 = vld [vmem:[#allocation96_spill] sm:$0xff]  ;;  %vm841_vm12 = vweird.f32 %v5204_v14  ;;  %vm1684_vm15 = vmor %vm1652_vm6, %vm1668_vm1  ;;  %v1731_v16 = vsub.f32 %v5214_v36, %v5213_v35  ;;  %v5217_v0 = vld [vmem:[#allocation15_spill] sm:$0xff] }
 0x457   :  { %vm1685_vm3 = vmor %vm1653_vm7, %vm1669_vm13  ;;  %1778 = vmatpush.msrb.mxu0 %v1773_v33  ;;  %v1769_v7 = vmul.f32 %v2518_v60, %v1753_v31  ;;  %v840_v33 = vmul.f32 %v5193_v26, %v5198_v21  ;;  %vm1665_vm14 = vcmp.ne.f32.partialorder %v1605_v44, 0.0  ;;  %v5215_v60 = vld [vmem:[#allocation78_spill] sm:$0xff]  ;;  %v5219_v31 = vld [vmem:[#allocation67_spill] sm:$0xff]  ;;  %vm5222_vm1 = vcmp.gt.f32.partialorder %v5221_v30, 0.0 }
 0x458   :  { %v2514_v27 = vsel %vm1685_vm3, 1.0, %v5148_v11  ;;  %vm4273_vm7 = vmor %vm861_vm8, %vm862_vm10  ;;  %vm851_vm10 = vweird.f32 %v5199_v6  ;;  %v1751_v56 = vmul.f32 %v1735_v23, %v4267_v63  ;;  %vm1667_vm8 = vcmp.ne.f32.partialorder %v4210_v15, 0.0  ;;  %v5218_v23 = vld [vmem:[#allocation41_spill] sm:$0xff]  ;;  %v5231_v44 = vld [vmem:[#allocation10_spill] sm:$0xff] }
 0x459   :  { %v4224_v53 = vmul.f32 %v2514_v27, %v1749_v28  ;;  %1779 = vmatpush.msrb.mxu0 %v1772_v10  ;;  %vm4283_vm13 = vmor %vm831_vm11, %vm832_vm5  ;;  %v864_v46 = vsel %vm4273_vm7, %v3887_v43, %v860_v48  ;;  %v989_v28 = vsel %vm5203_vm0, %v874_v41, 0.0  ;;  %v1732_v10 = vsub.f32 %v5206_v24, %v5205_v47  ;;  %v5210_v27 = vld [vmem:[#allocation80_spill] sm:$0xff] }
 0x45a   :  { %vm4298_vm3 = vmor %vm851_vm10, %vm852_vm2  ;;  %v1767_v50 = vmul.f32 %v2516_v57, %v1751_v56  ;;  %vm5211_vm2 = vcmp.gt.f32.partialorder %v5210_v27, 0.0  ;;  %v834_v61 = vsel %vm4283_vm13, %v5186_v3, %v830_v2  ;;  %v2513_v48 = vsel %vm1684_vm15, 1.0, %v5148_v11  ;;  %v5226_v57 = vld [vmem:[#allocation11_spill] sm:$0xff]  ;;  %v5229_v56 = vld [vmem:[#allocation37_spill] sm:$0xff] }
 0x45b   :  { %1780 = vmatpush.msrb.mxu0 %v1771_v32  ;;  %v854_v43 = vsel %vm4298_vm3, %v5187_v62, %v850_v37  ;;  %vm4316_vm5 = vmor %vm841_vm12, %vm842_vm4  ;;  %v988_v5 = vsel %vm5211_vm2, %v864_v46, 0.0  ;;  %v4327_v32 = vmul.f32 %v989_v28, %v5212_v29  ;;  %vm5216_vm4 = vcmp.gt.f32.partialorder %v5215_v60, 0.0  ;;  %v5220_v62 = vld [vmem:[#allocation88_spill] sm:$0xff]  ;;  %v5223_v37 = vld [vmem:[#allocation13_spill] sm:$0xff] }
 0x45c   :  { %v844_v4 = vsel %vm4316_vm5, %v5193_v26, %v840_v33  ;;  %v987_v15 = vsel %vm5216_vm4, %v854_v43, 0.0  ;;  %v4339_v12 = vmul.f32 %v988_v5, %v5217_v0  ;;  %v1730_v19 = vsub.f32 %v5219_v31, %v5218_v23  ;;  %v5227_v33 = vld [vmem:[#allocation73_spill] sm:$0xff]  ;;  %v1817_v29 = vld [vmem:[%s4875_s13] sm:$0xff] }
 0x45d   :  { %v1563_v8 = vpop.xlane.xlu0 %1562  ;;  %1781 = vmatpush.msrb.mxu0 %v1770_v58  ;;  %v1748_v58 = vmul.f32 %v1732_v10, %v4327_v32  ;;  %vm1649_vm7 = vcmp.ne.f32.partialorder %v1557_v49, 0.0  ;;  %v986_v3 = vsel %vm5222_vm1, %v844_v4, 0.0  ;;  %vm1650_vm13 = vcmp.ne.f32.partialorder %v4204_v1, 0.0  ;;  %v5230_v2 = vld [vmem:[#allocation65_spill] sm:$0xff]  ;;  %1857 = vmatpush.msrb.mxu3 %v1817_v29  ;;  %v5280_v29 = vld [vmem:[#allocation22_spill] sm:$0xff] }
 0x45e   :  { %vm1651_vm9 = vcmp.ne.f32.partialorder %v1563_v8, 0.0  ;;  %vm1681_vm10 = vmor %vm1649_vm7, %vm1665_vm14  ;;  %v4350_v41 = vmul.f32 %v987_v15, %v5223_v37  ;;  %v1747_v17 = vmul.f32 %v1731_v16, %v4339_v12  ;;  %v4358_v1 = vmul.f32 %v986_v3, %v5226_v57 }
 0x45f   :  { %1782 = vmatpush.msrb.mxu0 %v1769_v7  ;;  %vm1683_vm11 = vmor %vm1651_vm9, %vm1667_vm8  ;;  %v5225_v7 = vld [vmem:[#allocation66_spill] sm:$0xff]  ;;  %v1764_v26 = vmul.f32 %v2513_v48, %v1748_v58  ;;  %vm5228_vm6 = vcmp.gt.f32.partialorder %v5227_v33, 0.0  ;;  %v2510_v46 = vsel %vm1681_vm10, 1.0, %v5148_v11  ;;  %v1728_v34 = vsub.f32 %v5230_v2, %v5229_v56  ;;  %v5262_v2 = vld [vmem:[#allocation4_spill] sm:$0xff] }
 0x460   :  { %v2512_v45 = vsel %vm1683_vm11, 1.0, %v5148_v11  ;;  %v1729_v8 = vsub.f32 %v5225_v7, %v5224_v51  ;;  %v1746_v13 = vmul.f32 %v1730_v19, %v4350_v41  ;;  %v985_v6 = vsel %vm5228_vm6, %v834_v61, 0.0  ;;  %v5258_v33 = vld [vmem:[#allocation6_spill] sm:$0xff] }
 0x461   :  { %1783 = vmatpush.msrb.mxu0 %v5207_v54  ;;  %v1763_v21 = vmul.f32 %v2512_v45, %v1747_v17  ;;  %v4368_v14 = vmul.f32 %v985_v6, %v5231_v44  ;;  %v5233_v24 = vlaneseq  ;;  %v5236_v27 = vmov 1.0   ;;  %v5252_v17 = vld [vmem:[#allocation9_spill] sm:$0xff] }
 0x462   :  { %v1745_v22 = vmul.f32 %v1729_v8, %v4358_v1 }
 0x463   :  { %1784 = vmatpush.msrb.mxu0 %v1767_v50  ;;  %5232 = vst [vmem:[#allocation33_spill] sm:$0xff] %v4368_v14  ;;  %v4371_v10 = vshrl.u32 %v5233_v24, 7  ;;  %v4376_v50 = vld [vmem:[%s4874_s6] ss:$0 sm:$0xff]  ;;  %v1744_v49 = vmul.f32 %v1728_v34, %v4368_v14  ;;  %v5272_v24 = vld [vmem:[#allocation16_spill] sm:$0xff] }
 0x464   :  { %v1761_v43 = vmul.f32 %v2510_v46, %v1745_v22  ;;  %5235 = vst [vmem:[#allocation79_spill] sm:$0xff] %v4376_v50  ;;  %v5260_v46 = vld [vmem:[#allocation5_spill] sm:$0xff]  ;;  %v5264_v22 = vld [vmem:[#allocation3_spill] sm:$0xff] }
 0x465   :  { %v1608_v20 = vpop.xlane.xlu0 %1607  ;;  %1785 = vmatpush.msrb.mxu0 %v5220_v62  ;;  %5234 = vst [vmem:[#allocation61_spill] sm:$0xff] %v4371_v10  ;;  %vm1252_vm5 = vcmp.eq.s32.totalorder %v4371_v10, %v4376_v50  ;;  %v4387_v5 = vadd.s32 8, %v4371_v10  ;;  %v4396_v4 = vadd.s32 16, %v4371_v10  ;;  %v4408_v35 = vadd.s32 24, %v4371_v10 }
 0x466   :  { %vm1666_vm3 = vcmp.ne.f32.partialorder %v1608_v20, 0.0  ;;  %v4417_v36 = vadd.s32 32, %v4371_v10  ;;  %v4426_v16 = vadd.s32 40, %v4371_v10  ;;  %v4435_v61 = vadd.s32 48, %v4371_v10 }
 0x467   :  { %vm1682_vm0 = vmor %vm1650_vm13, %vm1666_vm3  ;;  %1786 = vmatpush.msrb.mxu0 %v4224_v53  ;;  %v1602_v53 = vpop.xlane.xlu1 %1601  ;;  %5237 = vst [vmem:[#allocation91_spill] sm:$0xff] %v4387_v5  ;;  %vm1253_vm2 = vcmp.eq.s32.totalorder %v4387_v5, %v4376_v50  ;;  %vm1254_vm8 = vcmp.eq.s32.totalorder %v4396_v4, %v4376_v50  ;;  %vm5016_vm14 = vcmp.eq.s32.totalorder %v4408_v35, %v4376_v50  ;;  %v4444_v60 = vadd.s32 56, %v4371_v10 }
 0x468   :  { %v2511_v38 = vsel %vm1682_vm0, 1.0, %v5148_v11  ;;  %vm1664_vm9 = vcmp.ne.f32.partialorder %v1602_v53, 0.0  ;;  %5238 = vst [vmem:[#allocation102_spill] sm:$0xff] %v4396_v4  ;;  %vm5015_vm11 = vcmp.eq.s32.totalorder %v4417_v36, %v4376_v50  ;;  %vm5014_vm4 = vcmp.eq.s32.totalorder %v4426_v16, %v4376_v50 }
 0x469   :  { %1787 = vmatpush.msrb.mxu0 %v1764_v26  ;;  %v1762_v28 = vmul.f32 %v2511_v38, %v1746_v13  ;;  %5239 = vst [vmem:[#allocation31_spill] sm:$0xff] %v4408_v35  ;;  %vm5013_vm7 = vcmp.eq.s32.totalorder %v4435_v61, %v4376_v50  ;;  %vm5012_vm1 = vcmp.eq.s32.totalorder %v4444_v60, %v4376_v50  ;;  %vm5244_vm13 = vcmask 64512   ;;  %v5254_v38 = vld [vmem:[#allocation8_spill] sm:$0xff]  ;;  %v5256_v13 = vld [vmem:[#allocation7_spill] sm:$0xff] }
 0x46a   :  { %5240 = vst [vmem:[#allocation59_spill] sm:$0xff] %v4417_v36  ;;  %vm5245_vm10 = vmmov %vm5244_vm13 }
 0x46b   :  { %1788 = vmatpush.msrb.mxu0 %v1763_v21  ;;  %5241 = vst [vmem:[#allocation77_spill] sm:$0xff] %v4426_v16  ;;  %vm5246_vm3 = vmmov %vm5245_vm10 }
 0x46c   :  { %5242 = vst [vmem:[#allocation47_spill] sm:$0xff] %v4435_v61  ;;  %vm5247_vm0 = vmmov %vm5246_vm3 }
 0x46d   :  { %v1554_v47 = vpop.xlane.xlu0 %1553  ;;  %1789 = vmatpush.msrb.mxu0 %v1762_v28  ;;  %5243 = vst [vmem:[#allocation70_spill] sm:$0xff] %v4444_v60  ;;  %vm5248_vm6 = vmmov %vm5247_vm0  ;;  %v5266_v28 = vld [vmem:[#allocation2_spill] sm:$0xff] }
 0x46e   :  { %vm1648_vm12 = vcmp.ne.f32.partialorder %v1554_v47, 0.0  ;;  %v5270_v47 = vld [vmem:[#allocation14_spill] sm:$0xff] }
 0x46f   :  { %vm1680_vm15 = vmor %vm1648_vm12, %vm1664_vm9  ;;  %1790 = vmatpush.msrb.mxu0 %v1761_v43  ;;  %v5268_v43 = vld [vmem:[#allocation12_spill] sm:$0xff] }
 0x470   :  { %v2509_v54 = vsel %vm1680_vm15, 1.0, %v5148_v11  ;;  %vm5249_vm9 = vmmov %vm5247_vm0 }
 0x471   :  { %v1760_v9 = vmul.f32 %v2509_v54, %v1744_v49  ;;  %vm5250_vm12 = vmmov %vm5247_vm0  ;;  %v5274_v49 = vld [vmem:[#allocation18_spill] sm:$0xff]  ;;  %v5276_v54 = vld [vmem:[#allocation19_spill] sm:$0xff] }
 0x472   :  { %vm5251_vm15 = vmmov %vm5247_vm0 }
 0x473   :  { %1791 = vmatpush.msrb.mxu0 %v1760_v9  ;;  %v5278_v9 = vld [vmem:[#allocation20_spill] sm:$0xff] }
 0x474   :  { %2525 = vmatmul.msk.f32.vlgmr.msrb.gmra.mxu0 %vm1252_vm5, %v5236_v27 }
 0x47c   :  { %2526 = vmatmul.msk.f32.gmra.mxu0 %vm1253_vm2, %v5236_v27 }
 0x484   :  { %2527 = vmatmul.msk.f32.gmra.mxu0 %vm1254_vm8, %v5236_v27 }
 0x48c   :  { %2528 = vmatmul.msk.f32.gmra.mxu0 %vm5016_vm14, %v5236_v27 }
 0x494   :  { %2529 = vmatmul.msk.f32.gmra.mxu0 %vm5015_vm11, %v5236_v27 }
 0x49c   :  { %2530 = vmatmul.msk.f32.gmra.mxu0 %vm5014_vm4, %v5236_v27 }
 0x4a4   :  { %2531 = vmatmul.msk.f32.gmra.mxu0 %vm5013_vm7, %v5236_v27 }
 0x4ac   :  { %2532 = vmatmul.msk.f32.gmra.mxu0 %vm5012_vm1, %v5236_v27 }
 0x4f1   :  { %v1793_v15 = vpop.f32.mrf.mxu0 }
 0x4f2   :  { %2533 = vmatmul.msk.f32.vlgmr.msrb.gmra.mxu3 %vm5244_vm13, %v1793_v15  ;;  %vm5269_vm13 = vcmask 523264   ;;  %v5282_v15 = vld [vmem:[#allocation23_spill] sm:$0xff] }
 0x4f9   :  { %v1796_v48 = vpop.f32.mrf.mxu0 }
 0x4fa   :  { %2534 = vmatmul.msk.f32.gmra.mxu3 %vm5245_vm10, %v1796_v48  ;;  %vm5271_vm10 = vmmov %vm5269_vm13  ;;  %v5284_v48 = vld [vmem:[#allocation25_spill] sm:$0xff] }
 0x501   :  { %v1799_v0 = vpop.f32.mrf.mxu0 }
 0x502   :  { %2535 = vmatmul.msk.f32.gmra.mxu3 %vm5246_vm3, %v1799_v0  ;;  %vm5273_vm3 = vmmov %vm5271_vm10  ;;  %v5286_v0 = vld [vmem:[#allocation27_spill] sm:$0xff] }
 0x509   :  { %v1802_v23 = vpop.f32.mrf.mxu0 }
 0x50a   :  { %2536 = vmatmul.msk.f32.gmra.mxu3 %vm5247_vm0, %v1802_v23  ;;  %vm5275_vm0 = vmmov %vm5273_vm3  ;;  %v5288_v23 = vld [vmem:[#allocation29_spill] sm:$0xff] }
 0x511   :  { %v1805_v31 = vpop.f32.mrf.mxu0 }
 0x512   :  { %2537 = vmatmul.msk.f32.gmra.mxu3 %vm5248_vm6, %v1805_v31  ;;  %vm5277_vm6 = vmmov %vm5275_vm0  ;;  %v5290_v31 = vld [vmem:[#allocation30_spill] sm:$0xff] }
 0x519   :  { %v1808_v19 = vpop.f32.mrf.mxu0 }
 0x51a   :  { %2538 = vmatmul.msk.f32.gmra.mxu3 %vm5249_vm9, %v1808_v19  ;;  %vm5279_vm9 = vmmov %vm5275_vm0  ;;  %v5291_v19 = vld [vmem:[#allocation32_spill] sm:$0xff] }
 0x521   :  { %v1811_v58 = vpop.f32.mrf.mxu0 }
 0x522   :  { %2539 = vmatmul.msk.f32.gmra.mxu3 %vm5250_vm12, %v1811_v58  ;;  %vm5281_vm12 = vmmov %vm5275_vm0  ;;  %v5293_v58 = vld [vmem:[#allocation34_spill] sm:$0xff] }
 0x529   :  { %v1814_v20 = vpop.f32.mrf.mxu0 }
 0x52a   :  { %2540 = vmatmul.msk.f32.gmra.mxu3 %vm5251_vm15, %v1814_v20  ;;  %vm5283_vm15 = vmmov %vm5275_vm0  ;;  %v5295_v20 = vld [vmem:[#allocation35_spill] sm:$0xff] }
 0x575   :  { %v1859_v62 = vpop.f32.mrf.mxu3 }
 0x576   :  { %v4488_v44 = vadd.f32 %v1859_v62, %v5266_v28  ;;  %v5297_v62 = vld [vmem:[#allocation36_spill] sm:$0xff] }
 0x578   :  { %5267 = vst [vmem:[#allocation55_spill] sm:$0xff] %v4488_v44 }
 0x57d   :  { %v1862_v30 = vpop.f32.mrf.mxu3 }
 0x57e   :  { %v4484_v53 = vadd.f32 %v1862_v30, %v5264_v22  ;;  %v5299_v30 = vld [vmem:[#allocation38_spill] sm:$0xff]  ;;  %v5311_v22 = vld [vmem:[#allocation49_spill] sm:$0xff] }
 0x580   :  { %5265 = vst [vmem:[#allocation90_spill] sm:$0xff] %v4484_v53 }
 0x585   :  { %v1865_v3 = vpop.f32.mrf.mxu3 }
 0x586   :  { %v4480_v34 = vadd.f32 %v1865_v3, %v5262_v2 }
 0x588   :  { %5263 = vst [vmem:[#allocation86_spill] sm:$0xff] %v4480_v34 }
 0x58d   :  { %v1868_v45 = vpop.f32.mrf.mxu3 }
 0x58e   :  { %v4476_v56 = vadd.f32 %v1868_v45, %v5260_v46  ;;  %v5301_v45 = vld [vmem:[#allocation40_spill] sm:$0xff] }
 0x590   :  { %5261 = vst [vmem:[#allocation28_spill] sm:$0xff] %v4476_v56 }
 0x595   :  { %v1871_v37 = vpop.f32.mrf.mxu3 }
 0x596   :  { %v4472_v6 = vadd.f32 %v1871_v37, %v5258_v33  ;;  %v5308_v33 = vld [vmem:[#allocation48_spill] sm:$0xff] }
 0x598   :  { %5259 = vst [vmem:[#allocation83_spill] sm:$0xff] %v4472_v6 }
 0x59d   :  { %v1874_v51 = vpop.f32.mrf.mxu3 }
 0x59e   :  { %v4468_v21 = vadd.f32 %v1874_v51, %v5256_v13  ;;  %v5303_v51 = vld [vmem:[#allocation42_spill] sm:$0xff] }
 0x5a0   :  { %5257 = vst [vmem:[#allocation76_spill] sm:$0xff] %v4468_v21 }
 0x5a5   :  { %v1877_v7 = vpop.f32.mrf.mxu3 }
 0x5a6   :  { %v4464_v57 = vadd.f32 %v1877_v7, %v5254_v38  ;;  %v5306_v38 = vld [vmem:[#allocation46_spill] sm:$0xff] }
 0x5a8   :  { %5255 = vst [vmem:[#allocation57_spill] sm:$0xff] %v4464_v57 }
 0x5ad   :  { %v1880_v8 = vpop.f32.mrf.mxu3 }
 0x5ae   :  { %v4461_v26 = vadd.f32 %v1880_v8, %v5252_v17  ;;  %v5305_v8 = vld [vmem:[#allocation44_spill] sm:$0xff] }
 0x5b0   :  { %5253 = vst [vmem:[#allocation89_spill] sm:$0xff] %v4461_v26  ;;  %1899 = vmatpush.msrb.mxu2 %v4461_v26 }
 0x5b2   :  { %1900 = vmatpush.msrb.mxu2 %v4464_v57 }
 0x5b4   :  { %1901 = vmatpush.msrb.mxu2 %v4468_v21 }
 0x5b6   :  { %1902 = vmatpush.msrb.mxu2 %v4472_v6 }
 0x5b8   :  { %1903 = vmatpush.msrb.mxu2 %v4476_v56 }
 0x5ba   :  { %1904 = vmatpush.msrb.mxu2 %v4480_v34 }
 0x5bc   :  { %1905 = vmatpush.msrb.mxu2 %v4484_v53 }
 0x5be   :  { %1906 = vmatpush.msrb.mxu2 %v4488_v44 }
 0x5bf   :  { %2541 = vmatmul.msk.f32.vlgmr.msrb.gmra.mxu2 %vm5269_vm13, %v5268_v43  ;;  %vm5285_vm13 = vmmov %vm5275_vm0 }
 0x5c7   :  { %2542 = vmatmul.msk.f32.gmra.mxu2 %vm5271_vm10, %v5270_v47  ;;  %vm5287_vm10 = vmmov %vm5275_vm0  ;;  %v5314_v47 = vld [vmem:[#allocation51_spill] sm:$0xff] }
 0x5cf   :  { %2543 = vmatmul.msk.f32.gmra.mxu2 %vm5273_vm3, %v5272_v24  ;;  %vm5289_vm3 = vmmov %vm5275_vm0 }
 0x5d7   :  { %2544 = vmatmul.msk.f32.gmra.mxu2 %vm5275_vm0, %v5274_v49 }
 0x5df   :  { %2545 = vmatmul.msk.f32.gmra.mxu2 %vm5277_vm6, %v5276_v54  ;;  %vm5292_vm6 = vmmov %vm5275_vm0  ;;  %v5317_v54 = vld [vmem:[#allocation52_spill] sm:$0xff] }
 0x5e7   :  { %2546 = vmatmul.msk.f32.gmra.mxu2 %vm5279_vm9, %v5278_v9  ;;  %vm5294_vm9 = vmmov %vm5275_vm0 }
 0x5ef   :  { %2547 = vmatmul.msk.f32.gmra.mxu2 %vm5281_vm12, %v5280_v29  ;;  %vm5296_vm12 = vmmov %vm5275_vm0 }
 0x5f7   :  { %2548 = vmatmul.msk.f32.gmra.mxu2 %vm5283_vm15, %v5282_v15  ;;  %vm5298_vm15 = vmmov %vm5275_vm0  ;;  %v5319_v15 = vld [vmem:[#allocation54_spill] sm:$0xff] }
 0x5ff   :  { %2549 = vmatmul.msk.f32.gmra.mxu2 %vm5285_vm13, %v5284_v48  ;;  %vm5300_vm13 = vmmov %vm5275_vm0 }
 0x607   :  { %2550 = vmatmul.msk.f32.gmra.mxu2 %vm5287_vm10, %v5286_v0  ;;  %vm5302_vm10 = vmmov %vm5275_vm0 }
 0x60f   :  { %2551 = vmatmul.msk.f32.gmra.mxu2 %vm5289_vm3, %v5288_v23  ;;  %vm5304_vm3 = vmmov %vm5275_vm0  ;;  %v5322_v23 = vld [vmem:[#allocation56_spill] sm:$0xff] }
 0x617   :  { %2552 = vmatmul.msk.f32.gmra.mxu2 %vm5275_vm0, %v5290_v31 }
 0x61f   :  { %2553 = vmatmul.msk.f32.gmra.mxu2 %vm5292_vm6, %v5291_v19  ;;  %vm5307_vm6 = vmmov %vm5275_vm0 }
 0x627   :  { %2554 = vmatmul.msk.f32.gmra.mxu2 %vm5294_vm9, %v5293_v58  ;;  %vm5309_vm9 = vmmov %vm5275_vm0  ;;  %v5325_v58 = vld [vmem:[#allocation58_spill] sm:$0xff] }
 0x62f   :  { %2555 = vmatmul.msk.f32.gmra.mxu2 %vm5296_vm12, %v5295_v20  ;;  %vm5310_vm12 = vcmask 64512  }
 0x637   :  { %2556 = vmatmul.msk.f32.gmra.mxu2 %vm5298_vm15, %v5297_v62  ;;  %vm5312_vm15 = vmmov %vm5275_vm0 }
 0x63f   :  { %2557 = vmatmul.msk.f32.gmra.mxu2 %vm5300_vm13, %v5299_v30  ;;  %vm5313_vm13 = vmmov %vm5310_vm12  ;;  %v5327_v30 = vld [vmem:[#allocation60_spill] sm:$0xff] }
 0x642   :  { %v4526_v3 = vpop.f32.mrf.mxu2 }
 0x647   :  { %2558 = vmatmul.msk.f32.gmra.mxu2 %vm5302_vm10, %v5301_v45  ;;  %vm5315_vm10 = vmmov %vm5275_vm0 }
 0x64a   :  { %v4530_v37 = vpop.f32.mrf.mxu2 }
 0x64f   :  { %2559 = vmatmul.msk.f32.gmra.mxu2 %vm5304_vm3, %v5303_v51  ;;  %vm5316_vm3 = vmmov %vm5310_vm12 }
 0x652   :  { %v4534_v7 = vpop.f32.mrf.mxu2 }
 0x657   :  { %2560 = vmatmul.msk.f32.gmra.mxu2 %vm5275_vm0, %v5305_v8  ;;  %v5329_v8 = vld [vmem:[#allocation62_spill] sm:$0xff] }
 0x65a   :  { %v4538_v17 = vpop.f32.mrf.mxu2 }
 0x65f   :  { %2561 = vmatmul.msk.f32.gmra.mxu2 %vm5307_vm6, %v5306_v38  ;;  %vm5318_vm6 = vmmov %vm5316_vm3 }
 0x662   :  { %v4542_v13 = vpop.f32.mrf.mxu2 }
 0x667   :  { %2562 = vmatmul.msk.f32.gmra.mxu2 %vm5309_vm9, %v5308_v33  ;;  %vm5320_vm9 = vmmov %vm5275_vm0 }
 0x66a   :  { %v4546_v46 = vpop.f32.mrf.mxu2 }
 0x66b   :  { %v2019_v2 = vsel %vm5310_vm12, %v4546_v46, 0.0  ;;  %vm5321_vm12 = vmmov %vm5316_vm3 }
 0x66c   :  { %2020 = vadd.xlane.f32.xlu1 %v2019_v2  ;;  %v5332_v2 = vld [vmem:[#allocation63_spill] sm:$0xff] }
 0x66f   :  { %2563 = vmatmul.msk.f32.gmra.mxu2 %vm5312_vm15, %v5311_v22  ;;  %vm5323_vm15 = vmmov %vm5275_vm0 }
 0x672   :  { %v4552_v28 = vpop.f32.mrf.mxu2 }
 0x673   :  { %v2022_v43 = vsel %vm5313_vm13, %v4552_v28, 0.0  ;;  %vm5324_vm13 = vmmov %vm5316_vm3 }
 0x674   :  { %2023 = vadd.xlane.f32.xlu2 %v2022_v43 }
 0x677   :  { %2564 = vmatmul.msk.f32.gmra.mxu2 %vm5315_vm10, %v5314_v47  ;;  %vm5326_vm10 = vmmov %vm5275_vm0  ;;  %v5335_v47 = vld [vmem:[#allocation64_spill] sm:$0xff] }
 0x67a   :  { %v4558_v24 = vpop.f32.mrf.mxu2 }
 0x67b   :  { %v2025_v49 = vsel %vm5316_vm3, %v4558_v24, 0.0 }
 0x67c   :  { %2026 = vadd.xlane.f32.xlu0 %v2025_v49 }
 0x67f   :  { %2565 = vmatmul.msk.f32.gmra.mxu2 %vm5275_vm0, %v5317_v54 }
 0x682   :  { %v4564_v9 = vpop.f32.mrf.mxu2 }
 0x683   :  { %v2028_v29 = vsel %vm5318_vm6, %v4564_v9, 0.0  ;;  %vm5328_vm6 = vmmov %vm5316_vm3 }
 0x684   :  { %2029 = vadd.xlane.f32.xlu1 %v2028_v29 }
 0x687   :  { %2566 = vmatmul.msk.f32.gmra.mxu2 %vm5320_vm9, %v5319_v15  ;;  %vm5330_vm9 = vmmov %vm5275_vm0 }
 0x68a   :  { %v4570_v48 = vpop.f32.mrf.mxu2 }
 0x68b   :  { %v2031_v0 = vsel %vm5321_vm12, %v4570_v48, 0.0  ;;  %vm5331_vm12 = vmmov %vm5316_vm3 }
 0x68c   :  { %2032 = vadd.xlane.f32.xlu2 %v2031_v0 }
 0x68f   :  { %2567 = vmatmul.msk.f32.gmra.mxu2 %vm5323_vm15, %v5322_v23  ;;  %vm5333_vm15 = vmmov %vm5275_vm0 }
 0x692   :  { %v4576_v31 = vpop.f32.mrf.mxu2 }
 0x693   :  { %v2034_v19 = vsel %vm5324_vm13, %v4576_v31, 0.0  ;;  %vm5334_vm13 = vmmov %vm5316_vm3 }
 0x694   :  { %2035 = vadd.xlane.f32.xlu0 %v2034_v19 }
 0x697   :  { %2568 = vmatmul.msk.f32.gmra.mxu2 %vm5326_vm10, %v5325_v58  ;;  %vm5336_vm10 = vmmov %vm5275_vm0 }
 0x69a   :  { %v4582_v20 = vpop.f32.mrf.mxu2 }
 0x69b   :  { %v2037_v62 = vsel %vm5316_vm3, %v4582_v20, 0.0 }
 0x69c   :  { %2038 = vadd.xlane.f32.xlu1 %v2037_v62 }
 0x69f   :  { %2569 = vmatmul.msk.f32.gmra.mxu2 %vm5275_vm0, %v5327_v30  ;;  %vm5337_vm0 = vmmov %vm5316_vm3 }
 0x6a2   :  { %v4588_v45 = vpop.f32.mrf.mxu2 }
 0x6a3   :  { %v2040_v51 = vsel %vm5328_vm6, %v4588_v45, 0.0  ;;  %vm5338_vm6 = vmmov %vm5337_vm0 }
 0x6a4   :  { %2041 = vadd.xlane.f32.xlu2 %v2040_v51 }
 0x6a7   :  { %2570 = vmatmul.msk.f32.gmra.mxu2 %vm5330_vm9, %v5329_v8  ;;  %vm5339_vm9 = vmmov %vm5337_vm0 }
 0x6aa   :  { %v4594_v38 = vpop.f32.mrf.mxu2 }
 0x6ab   :  { %v2043_v33 = vsel %vm5331_vm12, %v4594_v38, 0.0  ;;  %vm5340_vm12 = vmmov %vm5337_vm0 }
 0x6ac   :  { %2044 = vadd.xlane.f32.xlu0 %v2043_v33 }
 0x6af   :  { %2571 = vmatmul.msk.f32.gmra.mxu2 %vm5333_vm15, %v5332_v2  ;;  %vm5341_vm15 = vmmov %vm5337_vm0 }
 0x6b2   :  { %v4600_v22 = vpop.f32.mrf.mxu2 }
 0x6b3   :  { %v2046_v43 = vsel %vm5334_vm13, %v4600_v22, 0.0  ;;  %vm5342_vm13 = vmmov %vm5337_vm0 }
 0x6b4   :  { %2047 = vadd.xlane.f32.xlu1 %v2046_v43 }
 0x6b7   :  { %2572 = vmatmul.msk.f32.gmra.mxu2 %vm5336_vm10, %v5335_v47  ;;  %vm5343_vm10 = vmmov %vm5337_vm0 }
 0x6ba   :  { %v4606_v49 = vpop.f32.mrf.mxu2 }
 0x6bb   :  { %v2049_v54 = vsel %vm5316_vm3, %v4606_v49, 0.0  ;;  %vm5344_vm3 = vmmov %vm5337_vm0 }
 0x6bc   :  { %2050 = vadd.xlane.f32.xlu2 %v2049_v54 }
 0x6c2   :  { %v4610_v29 = vpop.f32.mrf.mxu2 }
 0x6ca   :  { %v4612_v15 = vpop.f32.mrf.mxu2 }
 0x6d2   :  { %v4614_v0 = vpop.f32.mrf.mxu2 }
 0x6d3   :  { %v2058_v44 = vsel %vm5337_vm0, %v4614_v0, 0.0 }
 0x6da   :  { %v4616_v23 = vpop.f32.mrf.mxu2 }
 0x6e2   :  { %v4618_v19 = vpop.f32.mrf.mxu2 }
 0x6e7   :  { %v2024_v16 = vpop.xlane.xlu2 %2023 }
 0x6ea   :  { %v4620_v58 = vpop.f32.mrf.mxu2 }
 0x6f2   :  { %v4622_v62 = vpop.f32.mrf.mxu2 }
 0x6f3   :  { %v2070_v30 = vsel %vm5337_vm0, %v4622_v62, 0.0  ;;  %v2186_v36 = vsub.f32 %v4622_v62, %v4552_v28 }
 0x6f4   :  { %2071 = vadd.xlane.f32.xlu0 %v2070_v30 }
 0x6fa   :  { %v4626_v51 = vpop.f32.mrf.mxu2 }
 0x6fb   :  { %v2073_v8 = vsel %vm5338_vm6, %v4626_v51, 0.0  ;;  %vm5345_vm6 = vmmov %vm5337_vm0 }
 0x6fc   :  { %2074 = vadd.xlane.f32.xlu1 %v2073_v8 }
 0x702   :  { %v4630_v33 = vpop.f32.mrf.mxu2 }
 0x703   :  { %v2076_v2 = vsel %vm5339_vm9, %v4630_v33, 0.0  ;;  %vm5346_vm9 = vmmov %vm5337_vm0 }
 0x704   :  { %2077 = vadd.xlane.f32.xlu2 %v2076_v2 }
 0x70a   :  { %v4634_v43 = vpop.f32.mrf.mxu2 }
 0x70b   :  { %v2079_v47 = vsel %vm5340_vm12, %v4634_v43, 0.0  ;;  %vm5347_vm12 = vmmov %vm5337_vm0 }
 0x70c   :  { %2080 = vadd.xlane.f32.xlu0 %v2079_v47  ;;  %v2067_v34 = vsel %vm5347_vm12, %v4620_v58, 0.0  ;;  %vm5354_vm12 = vmmov %vm5337_vm0 }
 0x712   :  { %v4638_v54 = vpop.f32.mrf.mxu2 }
 0x713   :  { %v2082_v30 = vsel %vm5341_vm15, %v4638_v54, 0.0  ;;  %vm5348_vm15 = vmmov %vm5337_vm0 }
 0x714   :  { %2083 = vadd.xlane.f32.xlu1 %v2082_v30  ;;  %v2064_v30 = vsel %vm5337_vm0, %v4618_v19, 0.0 }
 0x71a   :  { %v4642_v26 = vpop.f32.mrf.mxu2 }
 0x71b   :  { %v2085_v8 = vsel %vm5342_vm13, %v4642_v26, 0.0  ;;  %vm5349_vm13 = vmmov %vm5337_vm0 }
 0x71c   :  { %2086 = vadd.xlane.f32.xlu2 %v2085_v8  ;;  %v2055_v53 = vsel %vm5349_vm13, %v4612_v15, 0.0  ;;  %vm2106_vm13 = vcmp.ne.f32.partialorder %v2024_v16, 0.0 }
 0x722   :  { %v4646_v57 = vpop.f32.mrf.mxu2 }
 0x723   :  { %v2088_v2 = vsel %vm5343_vm10, %v4646_v57, 0.0  ;;  %vm5350_vm10 = vmmov %vm5337_vm0 }
 0x724   :  { %2089 = vadd.xlane.f32.xlu0 %v2088_v2  ;;  %v2010_v2 = vsel %vm5346_vm9, %v4534_v7, 0.0  ;;  %vm5353_vm9 = vmmov %vm5337_vm0 }
 0x725   :  { %v2004_v60 = vsel %vm5353_vm9, %v4526_v3, 0.0 }
 0x72a   :  { %v4650_v21 = vpop.f32.mrf.mxu2 }
 0x72b   :  { %v2091_v47 = vsel %vm5344_vm3, %v4650_v21, 0.0  ;;  %vm5351_vm3 = vmmov %vm5337_vm0 }
 0x72c   :  { %2092 = vadd.xlane.f32.xlu1 %v2091_v47 }
 0x732   :  { %v4654_v6 = vpop.f32.mrf.mxu2 }
 0x733   :  { %v2094_v8 = vsel %vm5345_vm6, %v4654_v6, 0.0  ;;  %vm5352_vm6 = vmmov %vm5337_vm0 }
 0x734   :  { %2065 = vadd.xlane.f32.xlu1 %v2064_v30  ;;  %2095 = vadd.xlane.f32.xlu2 %v2094_v8  ;;  %v2013_v30 = vsel %vm5350_vm10, %v4538_v17, 0.0  ;;  %v2016_v8 = vsel %vm5351_vm3, %v4542_v13, 0.0 }
 0x73a   :  { %v4660_v56 = vpop.f32.mrf.mxu2 }
 0x73b   :  { %v2097_v47 = vsel %vm5348_vm15, %v4660_v56, 0.0  ;;  %vm5355_vm15 = vmmov %vm5337_vm0 }
 0x73c   :  { %2011 = vadd.xlane.f32.xlu1 %v2010_v2  ;;  %2068 = vadd.xlane.f32.xlu2 %v2067_v34  ;;  %v2061_v34 = vsel %vm5352_vm6, %v4616_v23, 0.0  ;;  %v2021_v2 = vpop.xlane.xlu1 %2020 }
 0x73d   :  { %2098 = vadd.xlane.f32.xlu0 %v2097_v47  ;;  %v2027_v47 = vpop.xlane.xlu0 %2026 }
 0x73e   :  { %vm2107_vm0 = vcmp.ne.f32.partialorder %v2027_v47, 0.0 }
 0x744   :  { %2056 = vadd.xlane.f32.xlu1 %v2055_v53  ;;  %2014 = vadd.xlane.f32.xlu2 %v2013_v30  ;;  %v2007_v53 = vsel %vm5354_vm12, %v4530_v37, 0.0  ;;  %v4682_v30 = vpop.xlane.xlu1 %2029 }
 0x745   :  { %2017 = vadd.xlane.f32.xlu0 %v2016_v8  ;;  %v4684_v8 = vpop.xlane.xlu0 %2035 }
 0x74c   :  { %2059 = vadd.xlane.f32.xlu2 %v2058_v44  ;;  %v2052_v44 = vsel %vm5355_vm15, %v4610_v29, 0.0  ;;  %v4688_v61 = vpop.xlane.xlu1 %2038 }
 0x74d   :  { %2062 = vadd.xlane.f32.xlu0 %v2061_v34  ;;  %v2045_v34 = vpop.xlane.xlu0 %2044 }
 0x754   :  { %2005 = vadd.xlane.f32.xlu2 %v2004_v60  ;;  %v2048_v60 = vpop.xlane.xlu1 %2047 }
 0x755   :  { %2008 = vadd.xlane.f32.xlu0 %v2007_v53  ;;  %v5356_v53 = vld [vmem:[#allocation87_spill] sm:$0xff] }
 0x756   :  { %v2202_v4 = vmul.f32 %v2186_v36, %v5356_v53 }
 0x75d   :  { %2053 = vadd.xlane.f32.xlu0 %v2052_v44  ;;  %v2187_v44 = vsub.f32 %v4626_v51, %v4558_v24 }
 0x75f   :  { %v2203_v27 = vmul.f32 %v2187_v44, %v4267_v63  ;;  %v2185_v63 = vsub.f32 %v4620_v58, %v4546_v46 }
 0x761   :  { %v2201_v46 = vmul.f32 %v2185_v63, %v4050_v25 }
 0x767   :  { %v2072_v35 = vpop.xlane.xlu0 %2071 }
 0x768   :  { %vm2122_vm10 = vcmp.ne.f32.partialorder %v2072_v35, 0.0  ;;  %v4702_v35 = vpop.xlane.xlu2 %2032 }
 0x769   :  { %vm2138_vm3 = vmor %vm2106_vm13, %vm2122_vm10  ;;  %vm2113_vm13 = vcmp.ne.f32.partialorder %v2045_v34, 0.0  ;;  %vm2114_vm10 = vcmp.ne.f32.partialorder %v2048_v60, 0.0  ;;  %v2192_v34 = vsub.f32 %v4646_v57, %v4588_v45 }
 0x76a   :  { %v2579_v5 = vsel %vm2138_vm3, 1.0, %v5148_v11 }
 0x76b   :  { %v4694_v50 = vmul.f32 %v2579_v5, %v2202_v4 }
 0x76f   :  { %v2075_v10 = vpop.xlane.xlu1 %2074 }
 0x770   :  { %vm2123_vm6 = vcmp.ne.f32.partialorder %v2075_v10, 0.0  ;;  %v2042_v36 = vpop.xlane.xlu2 %2041  ;;  %v2195_v10 = vsub.f32 %v4660_v56, %v4606_v49  ;;  %v2193_v56 = vsub.f32 %v4650_v21, %v4594_v38  ;;  %v2191_v38 = vsub.f32 %v4642_v26, %v4582_v20 }
 0x771   :  { %vm2139_vm9 = vmor %vm2107_vm0, %vm2123_vm6  ;;  %vm2105_vm0 = vcmp.ne.f32.partialorder %v2021_v2, 0.0  ;;  %vm2112_vm14 = vcmp.ne.f32.partialorder %v2042_v36, 0.0  ;;  %v2189_v20 = vsub.f32 %v4634_v43, %v4570_v48 }
 0x772   :  { %v2580_v28 = vsel %vm2139_vm9, 1.0, %v5148_v11  ;;  %v2211_v49 = vmul.f32 %v2195_v10, %v4110_v40  ;;  %v2209_v36 = vmul.f32 %v2193_v56, %v4143_v39 }
 0x773   :  { %v4700_v16 = vmul.f32 %v2580_v28, %v2203_v27  ;;  %v2194_v28 = vsub.f32 %v4654_v6, %v4600_v22 }
 0x775   :  { %v2210_v60 = vmul.f32 %v2194_v28, %v4132_v42 }
 0x778   :  { %v2051_v62 = vpop.xlane.xlu2 %2050 }
 0x779   :  { %vm2115_vm1 = vcmp.ne.f32.partialorder %v2051_v62, 0.0 }
 0x77f   :  { %v2081_v4 = vpop.xlane.xlu0 %2080 }
 0x780   :  { %v4704_v53 = vpop.xlane.xlu2 %2077 }
 0x787   :  { %v2084_v14 = vpop.xlane.xlu1 %2083 }
 0x78f   :  { %v2087_v5 = vpop.xlane.xlu2 %2086 }
 0x797   :  { %v2090_v51 = vpop.xlane.xlu0 %2089 }
 0x798   :  { %vm2128_vm7 = vcmp.ne.f32.partialorder %v2090_v51, 0.0 }
 0x79f   :  { %v2093_v47 = vpop.xlane.xlu1 %2092 }
 0x7a0   :  { %vm2129_vm12 = vcmp.ne.f32.partialorder %v2093_v47, 0.0 }
 0x7a1   :  { %vm4710_vm3 = vmor %vm2113_vm13, %vm2129_vm12  ;;  %vm2127_vm13 = vcmp.ne.f32.partialorder %v2087_v5, 0.0 }
 0x7a2   :  { %v2586_v40 = vsel %vm4710_vm3, 1.0, %v5148_v11  ;;  %vm2124_vm3 = vcmp.ne.f32.partialorder %v4704_v53, 0.0 }
 0x7a3   :  { %v2225_v57 = vmul.f32 %v2586_v40, %v2209_v36  ;;  %v5374_v40 = vld [vmem:[#allocation70_spill] sm:$0xff] }
 0x7a7   :  { %v2096_v24 = vpop.xlane.xlu2 %2095  ;;  %v2066_v58 = vpop.xlane.xlu1 %2065 }
 0x7a8   :  { %vm2130_vm15 = vcmp.ne.f32.partialorder %v2096_v24, 0.0 }
 0x7a9   :  { %vm2146_vm6 = vmor %vm2114_vm10, %vm2130_vm15  ;;  %vm2111_vm10 = vcmp.ne.f32.partialorder %v4688_v61, 0.0  ;;  %v2208_v61 = vmul.f32 %v2192_v34, %v4129_v52  ;;  %v5368_v34 = vld [vmem:[#allocation59_spill] sm:$0xff] }
 0x7aa   :  { %v2587_v6 = vsel %vm2146_vm6, 1.0, %v5148_v11  ;;  %vm2144_vm15 = vmor %vm2112_vm14, %vm2128_vm7  ;;  %vm2109_vm7 = vcmp.ne.f32.partialorder %v4702_v35, 0.0 }
 0x7ab   :  { %v2226_v62 = vmul.f32 %v2587_v6, %v2210_v60  ;;  %v2585_v42 = vsel %vm2144_vm15, 1.0, %v5148_v11  ;;  %vm2120_vm15 = vcmp.ne.f32.partialorder %v2066_v58, 0.0  ;;  %v5361_v6 = vmov 1.0   ;;  %v5370_v60 = vld [vmem:[#allocation77_spill] sm:$0xff] }
 0x7af   :  { %v2069_v44 = vpop.xlane.xlu2 %2068  ;;  %v2012_v5 = vpop.xlane.xlu1 %2011 }
 0x7b0   :  { %vm2121_vm9 = vcmp.ne.f32.partialorder %v2069_v44, 0.0  ;;  %v2099_v47 = vpop.xlane.xlu0 %2098  ;;  %v2182_v44 = vsub.f32 %v4614_v0, %v4534_v7 }
 0x7b1   :  { %vm2137_vm4 = vmor %vm2105_vm0, %vm2121_vm9  ;;  %vm2131_vm11 = vcmp.ne.f32.partialorder %v2099_v47, 0.0  ;;  %vm2126_vm0 = vcmp.ne.f32.partialorder %v2084_v14, 0.0  ;;  %v2190_v14 = vsub.f32 %v4638_v54, %v4576_v31  ;;  %v2224_v31 = vmul.f32 %v2585_v42, %v2208_v61 }
 0x7b2   :  { %v2578_v2 = vsel %vm2137_vm4, 1.0, %v5148_v11  ;;  %vm2147_vm12 = vmor %vm2115_vm1, %vm2131_vm11  ;;  %vm2110_vm4 = vcmp.ne.f32.partialorder %v4684_v8, 0.0  ;;  %vm2125_vm1 = vcmp.ne.f32.partialorder %v2081_v4, 0.0  ;;  %v2207_v8 = vmul.f32 %v2191_v38, %v4175_v55 }
 0x7b3   :  { %v4722_v22 = vmul.f32 %v2578_v2, %v2201_v46  ;;  %v2588_v25 = vsel %vm2147_vm12, 1.0, %v5148_v11  ;;  %vm2143_vm11 = vmor %vm2111_vm10, %vm2127_vm13  ;;  %vm2108_vm9 = vcmp.ne.f32.partialorder %v4682_v30, 0.0  ;;  %v2188_v54 = vsub.f32 %v4630_v33, %v4564_v9  ;;  %v5359_v30 = vld [vmem:[#allocation92_spill] sm:$0xff] }
 0x7b4   :  { %v2227_v21 = vmul.f32 %v2588_v25, %v2211_v49  ;;  %vm2142_vm14 = vmor %vm2110_vm4, %vm2126_vm0  ;;  %v2584_v39 = vsel %vm2143_vm11, 1.0, %v5148_v11  ;;  %v2206_v35 = vmul.f32 %v2190_v14, %v4192_v18  ;;  %v2205_v55 = vmul.f32 %v2189_v20, %v4221_v59  ;;  %v5360_v49 = vld [vmem:[#allocation33_spill] sm:$0xff]  ;;  %v5366_v25 = vld [vmem:[#allocation31_spill] sm:$0xff] }
 0x7b5   :  { %vm2141_vm6 = vmor %vm2109_vm7, %vm2125_vm1  ;;  %v2583_v52 = vsel %vm2142_vm14, 1.0, %v5148_v11  ;;  %v2223_v53 = vmul.f32 %v2584_v39, %v2207_v8  ;;  %v2204_v24 = vmul.f32 %v2188_v54, %v5359_v30  ;;  %v2184_v33 = vsub.f32 %v4618_v19, %v4542_v13  ;;  %v5384_v39 = vld [vmem:[#allocation55_spill] sm:$0xff] }
 0x7b6   :  { %2228 = vmatpush.msra.mxu0 %v2227_v21  ;;  %vm2140_vm12 = vmor %vm2108_vm9, %vm2124_vm3  ;;  %v2582_v48 = vsel %vm2141_vm6, 1.0, %v5148_v11  ;;  %v2222_v43 = vmul.f32 %v2583_v52, %v2206_v35  ;;  %v2183_v59 = vsub.f32 %v4616_v23, %v4538_v17  ;;  %vm2102_vm14 = vcmp.ne.f32.partialorder %v2012_v5, 0.0  ;;  %v5372_v21 = vld [vmem:[#allocation47_spill] sm:$0xff]  ;;  %v5388_v35 = vld [vmem:[#allocation86_spill] sm:$0xff] }
 0x7b7   :  { %v2015_v45 = vpop.xlane.xlu2 %2014  ;;  %v2581_v4 = vsel %vm2140_vm12, 1.0, %v5148_v11  ;;  %v2221_v51 = vmul.f32 %v2582_v48, %v2205_v55  ;;  %v2057_v10 = vpop.xlane.xlu1 %2056  ;;  %v2200_v28 = vmul.f32 %v2184_v33, %v4327_v32  ;;  %v2181_v17 = vsub.f32 %v4612_v15, %v4530_v37  ;;  %v5390_v48 = vld [vmem:[#allocation28_spill] sm:$0xff] }
 0x7b8   :  { %2229 = vmatpush.msra.mxu0 %v2226_v62  ;;  %v2018_v26 = vpop.xlane.xlu0 %2017  ;;  %v2220_v9 = vmul.f32 %v2581_v4, %v2204_v24  ;;  %vm2103_vm11 = vcmp.ne.f32.partialorder %v2015_v45, 0.0  ;;  %vm2117_vm3 = vcmp.ne.f32.partialorder %v2057_v10, 0.0  ;;  %v2199_v23 = vmul.f32 %v2183_v59, %v4339_v12  ;;  %v5392_v4 = vld [vmem:[#allocation83_spill] sm:$0xff]  ;;  %v5398_v10 = vld [vmem:[#allocation89_spill] sm:$0xff] }
 0x7b9   :  { %vm2104_vm13 = vcmp.ne.f32.partialorder %v2018_v26, 0.0  ;;  %v2198_v32 = vmul.f32 %v2182_v44, %v4350_v41  ;;  %v2180_v47 = vsub.f32 %v4610_v29, %v4526_v3  ;;  %v2197_v46 = vmul.f32 %v2181_v17, %v4358_v1  ;;  %v5363_v29 = vld [vmem:[#allocation79_spill] sm:$0xff] }
 0x7ba   :  { %2230 = vmatpush.msra.mxu0 %v2225_v57  ;;  %vm2136_vm0 = vmor %vm2104_vm13, %vm2120_vm15 }
 0x7bb   :  { %v2577_v27 = vsel %vm2136_vm0, 1.0, %v5148_v11  ;;  %v2196_v58 = vmul.f32 %v2180_v47, %v5360_v49  ;;  %vm5375_vm0 = vcmp.eq.s32.totalorder %v5374_v40, %v5363_v29 }
 0x7bc   :  { %2231 = vmatpush.msra.mxu0 %v2224_v31  ;;  %v5386_v31 = vld [vmem:[#allocation90_spill] sm:$0xff] }
 0x7be   :  { %2232 = vmatpush.msra.mxu0 %v2223_v53 }
 0x7bf   :  { %v2060_v18 = vpop.xlane.xlu2 %2059 }
 0x7c0   :  { %2233 = vmatpush.msra.mxu0 %v2222_v43  ;;  %v2063_v63 = vpop.xlane.xlu0 %2062  ;;  %vm2118_vm4 = vcmp.ne.f32.partialorder %v2060_v18, 0.0  ;;  %v5396_v18 = vld [vmem:[#allocation57_spill] sm:$0xff] }
 0x7c1   :  { %vm2119_vm10 = vcmp.ne.f32.partialorder %v2063_v63, 0.0  ;;  %vm2134_vm7 = vmor %vm2102_vm14, %vm2118_vm4 }
 0x7c2   :  { %2234 = vmatpush.msra.mxu0 %v2221_v51  ;;  %vm2135_vm1 = vmor %vm2103_vm11, %vm2119_vm10  ;;  %v2575_v7 = vsel %vm2134_vm7, 1.0, %v5148_v11  ;;  %vm5367_vm10 = vcmp.eq.s32.totalorder %v5366_v25, %v5363_v29  ;;  %vm5376_vm11 = vcmask 64512   ;;  %v5394_v51 = vld [vmem:[#allocation76_spill] sm:$0xff] }
 0x7c3   :  { %v2576_v19 = vsel %vm2135_vm1, 1.0, %v5148_v11  ;;  %v2214_v37 = vmul.f32 %v2575_v7, %v2198_v32  ;;  %vm5377_vm4 = vmmov %vm5376_vm11 }
 0x7c4   :  { %2235 = vmatpush.msra.mxu0 %v2220_v9  ;;  %v2215_v0 = vmul.f32 %v2576_v19, %v2199_v23  ;;  %vm5378_vm1 = vmmov %vm5377_vm4 }
 0x7c5   :  { %vm5379_vm14 = vmmov %vm5378_vm1 }
 0x7c6   :  { %2236 = vmatpush.msra.mxu0 %v4700_v16  ;;  %v2216_v16 = vmul.f32 %v2577_v27, %v2200_v28  ;;  %vm5380_vm7 = vmmov %vm5378_vm1 }
 0x7c7   :  { %v2006_v15 = vpop.xlane.xlu2 %2005 }
 0x7c8   :  { %2237 = vmatpush.msra.mxu0 %v4694_v50  ;;  %v2009_v13 = vpop.xlane.xlu0 %2008  ;;  %vm2100_vm12 = vcmp.ne.f32.partialorder %v2006_v15, 0.0 }
 0x7c9   :  { %vm2101_vm6 = vcmp.ne.f32.partialorder %v2009_v13, 0.0 }
 0x7ca   :  { %vm2133_vm9 = vmor %vm2101_vm6, %vm2117_vm3  ;;  %2238 = vmatpush.msra.mxu0 %v4722_v22 }
 0x7cb   :  { %v2574_v50 = vsel %vm2133_vm9, 1.0, %v5148_v11  ;;  %vm5381_vm3 = vmmov %vm5378_vm1 }
 0x7cc   :  { %2239 = vmatpush.msra.mxu0 %v2216_v16  ;;  %v2213_v12 = vmul.f32 %v2574_v50, %v2197_v46  ;;  %vm5382_vm6 = vmmov %vm5378_vm1 }
 0x7cd   :  { %vm5383_vm9 = vmmov %vm5378_vm1 }
 0x7ce   :  { %2240 = vmatpush.msra.mxu0 %v2215_v0 }
 0x7d0   :  { %2241 = vmatpush.msra.mxu0 %v2214_v37  ;;  %v2054_v56 = vpop.xlane.xlu0 %2053 }
 0x7d1   :  { %vm2116_vm13 = vcmp.ne.f32.partialorder %v2054_v56, 0.0 }
 0x7d2   :  { %vm2132_vm15 = vmor %vm2100_vm12, %vm2116_vm13  ;;  %2242 = vmatpush.msra.mxu0 %v2213_v12 }
 0x7d3   :  { %v2573_v41 = vsel %vm2132_vm15, 1.0, %v5148_v11  ;;  %v2597_v11 = vld [vmem:[%s4875_s13 + $0x8] sm:$0xff]  ;;  %vm5385_vm12 = vmmov %vm5378_vm1 }
 0x7d4   :  { %v2212_v2 = vmul.f32 %v2573_v41, %v2196_v58  ;;  %2310 = vmatpush.msra.mxu3 %v2597_v11  ;;  %vm5387_vm13 = vmmov %vm5378_vm1 }
 0x7d5   :  { %vm5389_vm15 = vmmov %vm5378_vm1 }
 0x7d6   :  { %2243 = vmatpush.msra.mxu0 %v2212_v2 }
 0x7d7   :  { %2589 = vmatmul.msk.f32.vlgmr.msra.gmra.mxu0 %vm1252_vm5, %v5361_v6  ;;  %vm5369_vm5 = vcmp.eq.s32.totalorder %v5368_v34, %v5363_v29 }
 0x7df   :  { %2590 = vmatmul.msk.f32.gmra.mxu0 %vm1253_vm2, %v5361_v6  ;;  %vm5371_vm2 = vcmp.eq.s32.totalorder %v5370_v60, %v5363_v29 }
 0x7e7   :  { %2591 = vmatmul.msk.f32.gmra.mxu0 %vm1254_vm8, %v5361_v6  ;;  %vm5373_vm8 = vcmp.eq.s32.totalorder %v5372_v21, %v5363_v29 }
 0x7ef   :  { %2592 = vmatmul.msk.f32.gmra.mxu0 %vm5367_vm10, %v5361_v6  ;;  %vm5391_vm10 = vmmov %vm5378_vm1 }
 0x7f7   :  { %2593 = vmatmul.msk.f32.gmra.mxu0 %vm5369_vm5, %v5361_v6  ;;  %vm5393_vm5 = vmmov %vm5378_vm1 }
 0x7ff   :  { %2594 = vmatmul.msk.f32.gmra.mxu0 %vm5371_vm2, %v5361_v6  ;;  %vm5395_vm2 = vmmov %vm5378_vm1 }
 0x807   :  { %2595 = vmatmul.msk.f32.gmra.mxu0 %vm5373_vm8, %v5361_v6  ;;  %vm5397_vm8 = vmmov %vm5378_vm1 }
 0x80f   :  { %2596 = vmatmul.msk.f32.gmra.mxu0 %vm5375_vm0, %v5361_v6  ;;  %vm5399_vm0 = vmmov %vm5378_vm1 }
 0x854   :  { %v2245_v38 = vpop.f32.mrf.mxu0 }
 0x855   :  { %2598 = vmatmul.msk.f32.vlgmr.msra.gmra.mxu3 %vm5376_vm11, %v2245_v38 }
 0x85c   :  { %v2248_v36 = vpop.f32.mrf.mxu0 }
 0x85d   :  { %2599 = vmatmul.msk.f32.gmra.mxu3 %vm5377_vm4, %v2248_v36 }
 0x864   :  { %v2251_v62 = vpop.f32.mrf.mxu0 }
 0x865   :  { %2600 = vmatmul.msk.f32.gmra.mxu3 %vm5378_vm1, %v2251_v62 }
 0x86c   :  { %v2254_v42 = vpop.f32.mrf.mxu0 }
 0x86d   :  { %2601 = vmatmul.msk.f32.gmra.mxu3 %vm5379_vm14, %v2254_v42 }
 0x874   :  { %v2257_v14 = vpop.f32.mrf.mxu0 }
 0x875   :  { %2602 = vmatmul.msk.f32.gmra.mxu3 %vm5380_vm7, %v2257_v14 }
 0x87c   :  { %v2260_v61 = vpop.f32.mrf.mxu0 }
 0x87d   :  { %2603 = vmatmul.msk.f32.gmra.mxu3 %vm5381_vm3, %v2260_v61 }
 0x884   :  { %v2263_v57 = vpop.f32.mrf.mxu0 }
 0x885   :  { %2604 = vmatmul.msk.f32.gmra.mxu3 %vm5382_vm6, %v2263_v57 }
 0x88c   :  { %v2266_v45 = vpop.f32.mrf.mxu0 }
 0x88d   :  { %2605 = vmatmul.msk.f32.gmra.mxu3 %vm5383_vm9, %v2266_v45 }
 0x8d8   :  { %v2312_v26 = vpop.f32.mrf.mxu3 }
 0x8d9   :  { %v2336_v20 = vadd.f32 %v2312_v26, %v5384_v39 }
 0x8db   :  { %2344 = vst.msk [vmem:[%s4876_s14] sm:$0xff] %vm5385_vm12, %v2336_v20 }
 0x8e0   :  { %v2315_v8 = vpop.f32.mrf.mxu3 }
 0x8e1   :  { %v2337_v52 = vadd.f32 %v2315_v8, %v5386_v31 }
 0x8e3   :  { %2345 = vst.msk [vmem:[%s4876_s14 + $0x8] sm:$0xff] %vm5387_vm13, %v2337_v52 }
 0x8e8   :  { %v2318_v54 = vpop.f32.mrf.mxu3 }
 0x8e9   :  { %v2338_v53 = vadd.f32 %v2318_v54, %v5388_v35 }
 0x8eb   :  { %2346 = vst.msk [vmem:[%s4876_s14 + $0x10] sm:$0xff] %vm5389_vm15, %v2338_v53 }
 0x8f0   :  { %v2321_v5 = vpop.f32.mrf.mxu3 }
 0x8f1   :  { %v2339_v55 = vadd.f32 %v2321_v5, %v5390_v48 }
 0x8f3   :  { %2347 = vst.msk [vmem:[%s4876_s14 + $0x18] sm:$0xff] %vm5391_vm10, %v2339_v55 }
 0x8f8   :  { %v2324_v43 = vpop.f32.mrf.mxu3 }
 0x8f9   :  { %v2340_v30 = vadd.f32 %v2324_v43, %v5392_v4 }
 0x8fb   :  { %2348 = vst.msk [vmem:[%s4876_s14 + $0x20] sm:$0xff] %vm5393_vm5, %v2340_v30 }
 0x900   :  { %v2327_v24 = vpop.f32.mrf.mxu3 }
 0x901   :  { %v2341_v63 = vadd.f32 %v2327_v24, %v5394_v51 }
 0x903   :  { %2349 = vst.msk [vmem:[%s4876_s14 + $0x28] sm:$0xff] %vm5395_vm2, %v2341_v63 }
 0x908   :  { %v2330_v9 = vpop.f32.mrf.mxu3 }
 0x909   :  { %v2342_v33 = vadd.f32 %v2330_v9, %v5396_v18 }
 0x90b   :  { %2350 = vst.msk [vmem:[%s4876_s14 + $0x30] sm:$0xff] %vm5397_vm8, %v2342_v33 }
 0x910   :  { %v2333_v59 = vpop.f32.mrf.mxu3 }
 0x911   :  { %v2343_v27 = vadd.f32 %v2333_v59, %v5398_v10 }
 0x913   :  { %2351 = vst.msk [vmem:[%s4876_s14 + $0x38] sm:$0xff] %vm5399_vm0, %v2343_v27 }

</bundles_post_ra>
